<compile_context>
chip_gen: v7x
topology: tpu7x:2x2x1
jax: 0.10.0
libtpu: 0.0.40
codegen_flags: <defaults>
</compile_context>

<pallas_src>
import functools
import math

import jax
import jax.numpy as jnp
from jax import lax
from jax.experimental import pallas as pl
from jax.experimental.pallas import tpu as pltpu

EPS = 1e-5
LANE = 128


def _layer_norm(h, gamma, beta):
    # nn.LayerNorm over the last dim (biased variance, eps = 1e-5).
    # TODO(synk): torch_geometric's MLP uses its own (graph-mode) LayerNorm by
    # default; here we use standard per-row last-dim LayerNorm semantics.
    mu = jnp.mean(h, axis=-1, keepdims=True)
    c = h - mu
    var = jnp.mean(c * c, axis=-1, keepdims=True)
    return c * lax.rsqrt(var + EPS) * gamma + beta


def _rowdot(x, w):
    # (B, N, Din) @ (Din, Dout) -> (B, N, Dout); contraction on the last dim.
    return lax.dot_general(x, w, (((x.ndim - 1,), (0,)), ((), ())),
                           preferred_element_type=jnp.float32)


# -----------------------------------------------------------------------------
# The single fused kernel.
# -----------------------------------------------------------------------------
def fused_critic_kernel(x_ref, w_ref, o_ref, qs_ref, ks_ref, vs_ref, *,
                        specs, n_layers, n_heads, n_agents):
    it = iter(specs)

    def take():
        off, r, c = next(it)
        return w_ref[off:off + r, 0:c]          # static slice of the slab (free)

    x_in = x_ref[...]                           # (B, N, Fin)
    B, N, _ = x_in.shape

    # --- readin MLPs (first linears fused into one (Fin, 128) matmul) -------
    w_in, b_in = take(), take()
    ga, bea = take(), take()
    gt, bet = take(), take()
    wa1, ba1 = take(), take()
    wt1, bt1 = take(), take()

    h_both = _rowdot(x_in, w_in) + b_in         # (B, N, 128) = [agent | target]
    half = w_in.shape[1] // 2                   # 64
    ha = jnp.maximum(_layer_norm(h_both[:, :, :half], ga, bea), 0.0)
    ht = jnp.maximum(_layer_norm(h_both[:, :, half:], gt, bet), 0.0)
    x_agent = _rowdot(ha, wa1) + ba1            # (B, N, E)
    x_target = _rowdot(ht, wt1) + bt1           # (B, N, E)

    E = x_agent.shape[-1]
    row = lax.broadcasted_iota(jnp.int32, (N, E), 0)
    x = jnp.where(row < n_agents, x_agent, x_target)   # (B, N, E), no concat

    hd = E // n_heads
    scale = 1.0 / math.sqrt(hd)

    # --- transformer layers (static Python loop; weights already in VMEM) ---
    for _ in range(n_layers):
        wqkv, bqkv = take(), take()
        wo, bo = take(), take()
        g1, be1 = take(), take()
        w1, bb1 = take(), take()
        w2, bb2 = take(), take()

        xn = _layer_norm(x, g1, be1)                       # norm1
        qkv = _rowdot(xn, wqkv) + bqkv                     # fused QKV (B,N,3E)
        q = qkv[:, :, 0:E]
        k = qkv[:, :, E:2 * E]
        v = qkv[:, :, 2 * E:3 * E]

        # Fold heads into the batch dim via VMEM scratch (static-slice stores).
        for h in range(n_heads):
            sl = slice(h * hd, (h + 1) * hd)
            bs = slice(h * B, (h + 1) * B)
            qs_ref[bs] = q[:, :, sl]
            ks_ref[bs] = k[:, :, sl]
            vs_ref[bs] = v[:, :, sl]
        qs, ks, vs = qs_ref[...], ks_ref[...], vs_ref[...]  # (H*B, N, hd)

        # One batched score matmul + ONE softmax chain over all heads.
        s = jnp.einsum('bqd,bkd->bqk', qs, ks,
                       preferred_element_type=jnp.float32) * scale
        s = s - jnp.max(s, axis=-1, keepdims=True)
        p = jnp.exp(s)
        den = jnp.sum(p, axis=-1, keepdims=True)
        r = pl.reciprocal(den, approx=True)                # EUP slot
        r = r * (2.0 - den * r)                            # 1 Newton step
        p = p * r
        ov = jnp.einsum('bqk,bkd->bqd', p, vs,
                        preferred_element_type=jnp.float32)  # (H*B, N, hd)

        # Fold the head-concat into the output projection (no lane concat).
        a = None
        for h in range(n_heads):
            c = _rowdot(ov[h * B:(h + 1) * B], wo[h * hd:(h + 1) * hd, :])
            a = c if a is None else a + c
        a = a + bo                                          # attention output
        x_res = x + a

        # Reference quirk: norm1 applied to the attention output (not norm2 on
        # the residual sum) before the feed-forward — reproduced exactly.
        fn = _layer_norm(a, g1, be1)
        ff = jnp.maximum(_rowdot(fn, w1) + bb1, 0.0)
        x = x_res + _rowdot(ff, w2) + bb2

    # --- readout on the agent rows; mean folded before the 1-wide proj ------
    wr0, br0 = take(), take()
    gr, ber = take(), take()
    wr1t, br1 = take(), take()                  # wr1 stored transposed (1, 2E)

    y = x[:, :n_agents, :]                      # (B, NA, E)
    hr = _rowdot(y, wr0) + br0
    hr = jnp.maximum(_layer_norm(hr, gr, ber), 0.0)
    hr_mean = jnp.mean(hr, axis=1)              # (B, 2E) — mean is linear
    val = jnp.sum(hr_mean * wr1t, axis=-1, keepdims=True) + br1   # (B, 1)
    o_ref[...] = val


# -----------------------------------------------------------------------------
# Wrapper: pack inputs + weights, one pallas_call for the whole forward pass.
# -----------------------------------------------------------------------------
def _pack_params(params):
    """Pack every weight/bias into one lane-dense (rows, 128) f32 slab."""
    wa0, ba0, ga, bea, wa1, ba1 = params['readin_agent']
    wt0, bt0, gt, bet, wt1, bt1 = params['readin_target']
    wr0, br0, gr, ber, wr1, br1 = params['readout']

    fin = wa0.shape[0]                                    # 18
    wt0_p = jnp.pad(wt0, ((0, fin - wt0.shape[0]), (0, 0)))
    w_in = jnp.concatenate([wa0, wt0_p], axis=1)          # (18, 128)
    b_in = jnp.concatenate([ba0, bt0], axis=1)            # (1, 128)

    entries = [w_in, b_in, ga, bea, gt, bet, wa1, ba1, wt1, bt1]
    for lp in params['layers']:
        wqkv = jnp.concatenate([lp['wq'], lp['wk'], lp['wv']], axis=1)  # (E,3E)
        bqkv = jnp.concatenate([lp['bq'], lp['bk'], lp['bv']], axis=1)  # (1,3E)
        entries += [wqkv, bqkv, lp['wo'], lp['bo'], lp['g1'], lp['be1'],
                    lp['w1'], lp['bb1'], lp['w2'], lp['bb2']]
    entries += [wr0, br0, gr, ber, wr1.T, br1]

    specs, blocks, row = [], [], 0
    for a in entries:
        r, c = a.shape
        rp = -(-r // 8) * 8                               # sublane-aligned rows
        blocks.append(jnp.pad(a.astype(jnp.float32),
                              ((0, rp - r), (0, LANE - c))))
        specs.append((row, r, c))
        row += rp
    return jnp.concatenate(blocks, axis=0), tuple(specs)


def transformer_critic_forward(params, action, observation, positions, targets,
                               n_heads):
    B, NA, _ = action.shape
    NT = targets.shape[1]
    N = NA + NT
    n_layers = len(params['layers'])
    embed_dim = params['readin_agent'][4].shape[1]
    head_dim = embed_dim // n_heads
    fin = observation.shape[-1] + 4                       # 18

    # One packed input tensor: agent rows = [obs|pos|act], target rows = [tgt|0].
    x_agent_in = jnp.concatenate([observation, positions, action], axis=-1)
    x_target_in = jnp.pad(targets, ((0, 0), (0, 0), (0, fin - targets.shape[-1])))
    x_in = jnp.concatenate([x_agent_in, x_target_in], axis=1)   # (B, N, 18)

    slab, specs = _pack_params(params)

    kernel = functools.partial(fused_critic_kernel, specs=specs,
                               n_layers=n_layers, n_heads=n_heads, n_agents=NA)
    return pl.pallas_call(
        kernel,
        out_shape=jax.ShapeDtypeStruct((B, 1), jnp.float32),
        scratch_shapes=[
            pltpu.VMEM((n_heads * B, N, head_dim), jnp.float32),  # q head-stack
            pltpu.VMEM((n_heads * B, N, head_dim), jnp.float32),  # k head-stack
            pltpu.VMEM((n_heads * B, N, head_dim), jnp.float32),  # v head-stack
        ],
    )(x_in, slab)


# -----------------------------------------------------------------------------
# Deterministic parameter initialization (synthetic, PyTorch-like shapes).
# Linear weights stored as (in, out) so the kernel does x @ W + b.
# -----------------------------------------------------------------------------
def _linear(key, din, dout):
    kw, kb = jax.random.split(key)
    lim = 1.0 / math.sqrt(din)
    w = jax.random.uniform(kw, (din, dout), jnp.float32, -lim, lim)
    b = jax.random.uniform(kb, (1, dout), jnp.float32, -lim, lim)
    return w, b


def _mlp_params(key, din, dh, dout):
    k0, k1 = jax.random.split(key)
    w0, b0 = _linear(k0, din, dh)
    w1, b1 = _linear(k1, dh, dout)
    g = jnp.ones((1, dh), jnp.float32)
    be = jnp.zeros((1, dh), jnp.float32)
    return (w0, b0, g, be, w1, b1)


def _layer_params(key, E):
    ks = jax.random.split(key, 6)
    wq, bq = _linear(ks[0], E, E)
    wk, bk = _linear(ks[1], E, E)
    wv, bv = _linear(ks[2], E, E)
    wo, bo = _linear(ks[3], E, E)
    w1, bb1 = _linear(ks[4], E, 2 * E)
    w2, bb2 = _linear(ks[5], 2 * E, E)
    return dict(wq=wq, bq=bq, wk=wk, bk=bk, wv=wv, bv=bv, wo=wo, bo=bo,
                g1=jnp.ones((1, E), jnp.float32),
                be1=jnp.zeros((1, E), jnp.float32),
                w1=w1, bb1=bb1, w2=w2, bb2=bb2)


# -----------------------------------------------------------------------------
# Pure-JAX reference for numerical self-check.
# -----------------------------------------------------------------------------
def _ref_mlp(x, p):
    w0, b0, g, be, w1, b1 = p
    h = x @ w0 + b0
    h = _layer_norm(h, g, be)
    h = jnp.maximum(h, 0.0)
    return h @ w1 + b1


def _ref_layer(x, lp, n_heads):
    B, N, E = x.shape
    hd = E // n_heads
    xn = _layer_norm(x, lp['g1'], lp['be1'])
    q = (xn @ lp['wq'] + lp['bq']).reshape(B, N, n_heads, hd).transpose(0, 2, 1, 3)
    k = (xn @ lp['wk'] + lp['bk']).reshape(B, N, n_heads, hd).transpose(0, 2, 1, 3)
    v = (xn @ lp['wv'] + lp['bv']).reshape(B, N, n_heads, hd).transpose(0, 2, 1, 3)
    s = jnp.einsum('bhnd,bhmd->bhnm', q, k) / math.sqrt(hd)
    p = jax.nn.softmax(s, axis=-1)
    attn = jnp.einsum('bhnm,bhmd->bhnd', p, v).transpose(0, 2, 1, 3).reshape(B, N, E)
    a = attn @ lp['wo'] + lp['bo']
    x = x + a
    fn = _layer_norm(a, lp['g1'], lp['be1'])
    f = jnp.maximum(fn @ lp['w1'] + lp['bb1'], 0.0) @ lp['w2'] + lp['bb2']
    return x + f


def _ref_forward(params, action, observation, positions, targets, n_heads):
    x_agent = _ref_mlp(jnp.concatenate([observation, positions, action], -1),
                       params['readin_agent'])
    x_target = _ref_mlp(targets, params['readin_target'])
    x = jnp.concatenate([x_agent, x_target], axis=1)
    for lp in params['layers']:
        x = _ref_layer(x, lp, n_heads)
    y = _ref_mlp(x[:, :action.shape[1]], params['readout'])
    return jnp.mean(y, axis=1)


if __name__ == "__main__":
    key = jax.random.PRNGKey(0)
    n_layers, n_channels, n_heads = 2, 8, 4
    embed_dim = n_channels * n_heads        # 32
    state_ndim = 14
    B, n_agents, n_targets = 2, 6, 4

    k_params, k_act, k_obs, k_pos, k_tgt = jax.random.split(key, 5)
    kp = jax.random.split(k_params, 3 + n_layers)
    params = {
        'readin_agent': _mlp_params(kp[0], state_ndim + 4, 2 * embed_dim, embed_dim),
        'readin_target': _mlp_params(kp[1], 2, 2 * embed_dim, embed_dim),
        'readout': _mlp_params(kp[2], embed_dim, 2 * embed_dim, 1),
        'layers': [_layer_params(kp[3 + i], embed_dim) for i in range(n_layers)],
    }

    action = jax.random.normal(k_act, (B, n_agents, 2), jnp.float32)
    observation = jax.random.normal(k_obs, (B, n_agents, state_ndim), jnp.float32)
    positions = jax.random.normal(k_pos, (B, n_agents, 2), jnp.float32)
    targets = jax.random.normal(k_tgt, (B, n_targets, 2), jnp.float32)

    out = transformer_critic_forward(params, action, observation, positions,
                                     targets, n_heads)
    out = jax.block_until_ready(out)

    ref = _ref_forward(params, action, observation, positions, targets, n_heads)
    assert out.shape == (B, 1), out.shape
    assert jnp.allclose(out, ref, rtol=1e-4, atol=1e-4), (out, ref)
    print("KERNEL_OK")
</pallas_src>

<mosaic_0001>
module attributes {stable_mosaic.version = 11 : i64} {
  func.func @fused_critic_kernel(%arg0: memref<2x10x18xf32, #tpu.memory_space<vmem>>, %arg1: memref<696x128xf32, #tpu.memory_space<vmem>>, %arg2: memref<2x1xf32, #tpu.memory_space<vmem>>, %arg3: memref<8x10x8xf32, #tpu.memory_space<vmem>>, %arg4: memref<8x10x8xf32, #tpu.memory_space<vmem>>, %arg5: memref<8x10x8xf32, #tpu.memory_space<vmem>>) attributes {dimension_semantics = [], scalar_prefetch = 0 : i64, scratch_operands = 3 : i64, tpu.core_type = #tpu.core_type<tc>} {
    %c0 = arith.constant 0 : index
    %c0_0 = arith.constant 0 : index
    %c0_1 = arith.constant 0 : index
    %0 = vector.load %arg0[%c0, %c0_0, %c0_1] : memref<2x10x18xf32, #tpu.memory_space<vmem>>, vector<2x10x18xf32>
    %c0_2 = arith.constant 0 : index
    %c0_3 = arith.constant 0 : index
    %1 = vector.load %arg1[%c0_2, %c0_3] : memref<696x128xf32, #tpu.memory_space<vmem>>, vector<18x128xf32>
    %c24 = arith.constant 24 : index
    %c0_4 = arith.constant 0 : index
    %2 = vector.load %arg1[%c24, %c0_4] : memref<696x128xf32, #tpu.memory_space<vmem>>, vector<1x128xf32>
    %c32 = arith.constant 32 : index
    %c0_5 = arith.constant 0 : index
    %3 = vector.load %arg1[%c32, %c0_5] : memref<696x128xf32, #tpu.memory_space<vmem>>, vector<1x64xf32>
    %c40 = arith.constant 40 : index
    %c0_6 = arith.constant 0 : index
    %4 = vector.load %arg1[%c40, %c0_6] : memref<696x128xf32, #tpu.memory_space<vmem>>, vector<1x64xf32>
    %c48 = arith.constant 48 : index
    %c0_7 = arith.constant 0 : index
    %5 = vector.load %arg1[%c48, %c0_7] : memref<696x128xf32, #tpu.memory_space<vmem>>, vector<1x64xf32>
    %c56 = arith.constant 56 : index
    %c0_8 = arith.constant 0 : index
    %6 = vector.load %arg1[%c56, %c0_8] : memref<696x128xf32, #tpu.memory_space<vmem>>, vector<1x64xf32>
    %c64 = arith.constant 64 : index
    %c0_9 = arith.constant 0 : index
    %7 = vector.load %arg1[%c64, %c0_9] : memref<696x128xf32, #tpu.memory_space<vmem>>, vector<64x32xf32>
    %c128 = arith.constant 128 : index
    %c0_10 = arith.constant 0 : index
    %8 = vector.load %arg1[%c128, %c0_10] : memref<696x128xf32, #tpu.memory_space<vmem>>, vector<1x32xf32>
    %c136 = arith.constant 136 : index
    %c0_11 = arith.constant 0 : index
    %9 = vector.load %arg1[%c136, %c0_11] : memref<696x128xf32, #tpu.memory_space<vmem>>, vector<64x32xf32>
    %c200 = arith.constant 200 : index
    %c0_12 = arith.constant 0 : index
    %10 = vector.load %arg1[%c200, %c0_12] : memref<696x128xf32, #tpu.memory_space<vmem>>, vector<1x32xf32>
    %cst = arith.constant dense<0.000000e+00> : vector<2x10x128xf32>
    %11 = tpu.matmul %0, %1, %cst {dimension_numbers = #tpu.dot_dimension_numbers<[2], [0], [0, 1], [1], [0, 0, 0, 1, 1, 1], [], []>} : vector<2x10x18xf32>, vector<18x128xf32>, vector<2x10x128xf32> -> vector<2x10x128xf32>
    %12 = vector.shape_cast %2 : vector<1x128xf32> to vector<1x1x128xf32>
    %13 = vector.broadcast %12 : vector<1x1x128xf32> to vector<2x10x128xf32>
    %14 = arith.addf %11, %13 : vector<2x10x128xf32>
    %15 = vector.extract_strided_slice %14 {offsets = [0, 0, 0], sizes = [2, 10, 64], strides = [1, 1, 1]} : vector<2x10x128xf32> to vector<2x10x64xf32>
    %cst_13 = arith.constant dense<0.000000e+00> : vector<2x10xf32>
    %16 = vector.multi_reduction <add>, %15, %cst_13 [2] : vector<2x10x64xf32> to vector<2x10xf32>
    %17 = vector.shape_cast %16 : vector<2x10xf32> to vector<2x10x1xf32>
    %cst_14 = arith.constant 6.400000e+01 : f32
    %18 = vector.broadcast %cst_14 : f32 to vector<2x10x1xf32>
    %19 = arith.divf %17, %18 : vector<2x10x1xf32>
    %20 = vector.broadcast %19 : vector<2x10x1xf32> to vector<2x10x64xf32>
    %21 = arith.subf %15, %20 : vector<2x10x64xf32>
    %22 = arith.mulf %21, %21 : vector<2x10x64xf32>
    %cst_15 = arith.constant dense<0.000000e+00> : vector<2x10xf32>
    %23 = vector.multi_reduction <add>, %22, %cst_15 [2] : vector<2x10x64xf32> to vector<2x10xf32>
    %24 = vector.shape_cast %23 : vector<2x10xf32> to vector<2x10x1xf32>
    %cst_16 = arith.constant 6.400000e+01 : f32
    %25 = vector.broadcast %cst_16 : f32 to vector<2x10x1xf32>
    %26 = arith.divf %24, %25 : vector<2x10x1xf32>
    %cst_17 = arith.constant 9.99999974E-6 : f32
    %27 = vector.broadcast %cst_17 : f32 to vector<2x10x1xf32>
    %28 = arith.addf %26, %27 : vector<2x10x1xf32>
    %29 = math.rsqrt %28 : vector<2x10x1xf32>
    %30 = vector.broadcast %29 : vector<2x10x1xf32> to vector<2x10x64xf32>
    %31 = arith.mulf %21, %30 : vector<2x10x64xf32>
    %32 = vector.shape_cast %3 : vector<1x64xf32> to vector<1x1x64xf32>
    %33 = vector.broadcast %32 : vector<1x1x64xf32> to vector<2x10x64xf32>
    %34 = arith.mulf %31, %33 : vector<2x10x64xf32>
    %35 = vector.shape_cast %4 : vector<1x64xf32> to vector<1x1x64xf32>
    %36 = vector.broadcast %35 : vector<1x1x64xf32> to vector<2x10x64xf32>
    %37 = arith.addf %34, %36 : vector<2x10x64xf32>
    %cst_18 = arith.constant 0.000000e+00 : f32
    %38 = vector.broadcast %cst_18 : f32 to vector<2x10x64xf32>
    %39 = arith.maximumf %37, %38 : vector<2x10x64xf32>
    %40 = vector.extract_strided_slice %14 {offsets = [0, 0, 64], sizes = [2, 10, 64], strides = [1, 1, 1]} : vector<2x10x128xf32> to vector<2x10x64xf32>
    %cst_19 = arith.constant dense<0.000000e+00> : vector<2x10xf32>
    %41 = vector.multi_reduction <add>, %40, %cst_19 [2] : vector<2x10x64xf32> to vector<2x10xf32>
    %42 = vector.shape_cast %41 : vector<2x10xf32> to vector<2x10x1xf32>
    %cst_20 = arith.constant 6.400000e+01 : f32
    %43 = vector.broadcast %cst_20 : f32 to vector<2x10x1xf32>
    %44 = arith.divf %42, %43 : vector<2x10x1xf32>
    %45 = vector.broadcast %44 : vector<2x10x1xf32> to vector<2x10x64xf32>
    %46 = arith.subf %40, %45 : vector<2x10x64xf32>
    %47 = arith.mulf %46, %46 : vector<2x10x64xf32>
    %cst_21 = arith.constant dense<0.000000e+00> : vector<2x10xf32>
    %48 = vector.multi_reduction <add>, %47, %cst_21 [2] : vector<2x10x64xf32> to vector<2x10xf32>
    %49 = vector.shape_cast %48 : vector<2x10xf32> to vector<2x10x1xf32>
    %cst_22 = arith.constant 6.400000e+01 : f32
    %50 = vector.broadcast %cst_22 : f32 to vector<2x10x1xf32>
    %51 = arith.divf %49, %50 : vector<2x10x1xf32>
    %cst_23 = arith.constant 9.99999974E-6 : f32
    %52 = vector.broadcast %cst_23 : f32 to vector<2x10x1xf32>
    %53 = arith.addf %51, %52 : vector<2x10x1xf32>
    %54 = math.rsqrt %53 : vector<2x10x1xf32>
    %55 = vector.broadcast %54 : vector<2x10x1xf32> to vector<2x10x64xf32>
    %56 = arith.mulf %46, %55 : vector<2x10x64xf32>
    %57 = vector.shape_cast %5 : vector<1x64xf32> to vector<1x1x64xf32>
    %58 = vector.broadcast %57 : vector<1x1x64xf32> to vector<2x10x64xf32>
    %59 = arith.mulf %56, %58 : vector<2x10x64xf32>
    %60 = vector.shape_cast %6 : vector<1x64xf32> to vector<1x1x64xf32>
    %61 = vector.broadcast %60 : vector<1x1x64xf32> to vector<2x10x64xf32>
    %62 = arith.addf %59, %61 : vector<2x10x64xf32>
    %cst_24 = arith.constant 0.000000e+00 : f32
    %63 = vector.broadcast %cst_24 : f32 to vector<2x10x64xf32>
    %64 = arith.maximumf %62, %63 : vector<2x10x64xf32>
    %cst_25 = arith.constant dense<0.000000e+00> : vector<2x10x32xf32>
    %65 = tpu.matmul %39, %7, %cst_25 {dimension_numbers = #tpu.dot_dimension_numbers<[2], [0], [0, 1], [1], [0, 0, 0, 1, 1, 1], [], []>} : vector<2x10x64xf32>, vector<64x32xf32>, vector<2x10x32xf32> -> vector<2x10x32xf32>
    %66 = vector.shape_cast %8 : vector<1x32xf32> to vector<1x1x32xf32>
    %67 = vector.broadcast %66 : vector<1x1x32xf32> to vector<2x10x32xf32>
    %68 = arith.addf %65, %67 : vector<2x10x32xf32>
    %cst_26 = arith.constant dense<0.000000e+00> : vector<2x10x32xf32>
    %69 = tpu.matmul %64, %9, %cst_26 {dimension_numbers = #tpu.dot_dimension_numbers<[2], [0], [0, 1], [1], [0, 0, 0, 1, 1, 1], [], []>} : vector<2x10x64xf32>, vector<64x32xf32>, vector<2x10x32xf32> -> vector<2x10x32xf32>
    %70 = vector.shape_cast %10 : vector<1x32xf32> to vector<1x1x32xf32>
    %71 = vector.broadcast %70 : vector<1x1x32xf32> to vector<2x10x32xf32>
    %72 = arith.addf %69, %71 : vector<2x10x32xf32>
    %73 = tpu.iota {dimensions = array<i32: 0>} : vector<10x32xi32>
    %c6_i32 = arith.constant 6 : i32
    %74 = vector.broadcast %c6_i32 : i32 to vector<10x32xi32>
    %75 = arith.cmpi slt, %73, %74 : vector<10x32xi32>
    %76 = vector.shape_cast %75 : vector<10x32xi1> to vector<1x10x32xi1>
    %77 = vector.broadcast %76 : vector<1x10x32xi1> to vector<2x10x32xi1>
    %78 = arith.select %77, %68, %72 : vector<2x10x32xi1>, vector<2x10x32xf32>
    %c208 = arith.constant 208 : index
    %c0_27 = arith.constant 0 : index
    %79 = vector.load %arg1[%c208, %c0_27] : memref<696x128xf32, #tpu.memory_space<vmem>>, vector<32x96xf32>
    %c240 = arith.constant 240 : index
    %c0_28 = arith.constant 0 : index
    %80 = vector.load %arg1[%c240, %c0_28] : memref<696x128xf32, #tpu.memory_space<vmem>>, vector<1x96xf32>
    %c248 = arith.constant 248 : index
    %c0_29 = arith.constant 0 : index
    %81 = vector.load %arg1[%c248, %c0_29] : memref<696x128xf32, #tpu.memory_space<vmem>>, vector<32x32xf32>
    %c280 = arith.constant 280 : index
    %c0_30 = arith.constant 0 : index
    %82 = vector.load %arg1[%c280, %c0_30] : memref<696x128xf32, #tpu.memory_space<vmem>>, vector<1x32xf32>
    %c288 = arith.constant 288 : index
    %c0_31 = arith.constant 0 : index
    %83 = vector.load %arg1[%c288, %c0_31] : memref<696x128xf32, #tpu.memory_space<vmem>>, vector<1x32xf32>
    %c296 = arith.constant 296 : index
    %c0_32 = arith.constant 0 : index
    %84 = vector.load %arg1[%c296, %c0_32] : memref<696x128xf32, #tpu.memory_space<vmem>>, vector<1x32xf32>
    %c304 = arith.constant 304 : index
    %c0_33 = arith.constant 0 : index
    %85 = vector.load %arg1[%c304, %c0_33] : memref<696x128xf32, #tpu.memory_space<vmem>>, vector<32x64xf32>
    %c336 = arith.constant 336 : index
    %c0_34 = arith.constant 0 : index
    %86 = vector.load %arg1[%c336, %c0_34] : memref<696x128xf32, #tpu.memory_space<vmem>>, vector<1x64xf32>
    %c344 = arith.constant 344 : index
    %c0_35 = arith.constant 0 : index
    %87 = vector.load %arg1[%c344, %c0_35] : memref<696x128xf32, #tpu.memory_space<vmem>>, vector<64x32xf32>
    %c408 = arith.constant 408 : index
    %c0_36 = arith.constant 0 : index
    %88 = vector.load %arg1[%c408, %c0_36] : memref<696x128xf32, #tpu.memory_space<vmem>>, vector<1x32xf32>
    %cst_37 = arith.constant dense<0.000000e+00> : vector<2x10xf32>
    %89 = vector.multi_reduction <add>, %78, %cst_37 [2] : vector<2x10x32xf32> to vector<2x10xf32>
    %90 = vector.shape_cast %89 : vector<2x10xf32> to vector<2x10x1xf32>
    %cst_38 = arith.constant 3.200000e+01 : f32
    %91 = vector.broadcast %cst_38 : f32 to vector<2x10x1xf32>
    %92 = arith.divf %90, %91 : vector<2x10x1xf32>
    %93 = vector.broadcast %92 : vector<2x10x1xf32> to vector<2x10x32xf32>
    %94 = arith.subf %78, %93 : vector<2x10x32xf32>
    %95 = arith.mulf %94, %94 : vector<2x10x32xf32>
    %cst_39 = arith.constant dense<0.000000e+00> : vector<2x10xf32>
    %96 = vector.multi_reduction <add>, %95, %cst_39 [2] : vector<2x10x32xf32> to vector<2x10xf32>
    %97 = vector.shape_cast %96 : vector<2x10xf32> to vector<2x10x1xf32>
    %cst_40 = arith.constant 3.200000e+01 : f32
    %98 = vector.broadcast %cst_40 : f32 to vector<2x10x1xf32>
    %99 = arith.divf %97, %98 : vector<2x10x1xf32>
    %cst_41 = arith.constant 9.99999974E-6 : f32
    %100 = vector.broadcast %cst_41 : f32 to vector<2x10x1xf32>
    %101 = arith.addf %99, %100 : vector<2x10x1xf32>
    %102 = math.rsqrt %101 : vector<2x10x1xf32>
    %103 = vector.broadcast %102 : vector<2x10x1xf32> to vector<2x10x32xf32>
    %104 = arith.mulf %94, %103 : vector<2x10x32xf32>
    %105 = vector.shape_cast %83 : vector<1x32xf32> to vector<1x1x32xf32>
    %106 = vector.broadcast %105 : vector<1x1x32xf32> to vector<2x10x32xf32>
    %107 = arith.mulf %104, %106 : vector<2x10x32xf32>
    %108 = vector.shape_cast %84 : vector<1x32xf32> to vector<1x1x32xf32>
    %109 = vector.broadcast %108 : vector<1x1x32xf32> to vector<2x10x32xf32>
    %110 = arith.addf %107, %109 : vector<2x10x32xf32>
    %cst_42 = arith.constant dense<0.000000e+00> : vector<2x10x96xf32>
    %111 = tpu.matmul %110, %79, %cst_42 {dimension_numbers = #tpu.dot_dimension_numbers<[2], [0], [0, 1], [1], [0, 0, 0, 1, 1, 1], [], []>} : vector<2x10x32xf32>, vector<32x96xf32>, vector<2x10x96xf32> -> vector<2x10x96xf32>
    %112 = vector.shape_cast %80 : vector<1x96xf32> to vector<1x1x96xf32>
    %113 = vector.broadcast %112 : vector<1x1x96xf32> to vector<2x10x96xf32>
    %114 = arith.addf %111, %113 : vector<2x10x96xf32>
    %115 = vector.extract_strided_slice %114 {offsets = [0, 0, 0], sizes = [2, 10, 32], strides = [1, 1, 1]} : vector<2x10x96xf32> to vector<2x10x32xf32>
    %116 = vector.extract_strided_slice %114 {offsets = [0, 0, 32], sizes = [2, 10, 32], strides = [1, 1, 1]} : vector<2x10x96xf32> to vector<2x10x32xf32>
    %117 = vector.extract_strided_slice %114 {offsets = [0, 0, 64], sizes = [2, 10, 32], strides = [1, 1, 1]} : vector<2x10x96xf32> to vector<2x10x32xf32>
    %118 = vector.extract_strided_slice %115 {offsets = [0, 0, 0], sizes = [2, 10, 8], strides = [1, 1, 1]} : vector<2x10x32xf32> to vector<2x10x8xf32>
    %c0_43 = arith.constant 0 : index
    %c0_44 = arith.constant 0 : index
    %c0_45 = arith.constant 0 : index
    %119 = vector.load %arg3[%c0_43, %c0_44, %c0_45] : memref<8x10x8xf32, #tpu.memory_space<vmem>>, vector<2x10x8xf32>
    tpu.vector_store %arg3[%c0_43, %c0_44, %c0_45], %118 {strides = array<i32>} : memref<8x10x8xf32, #tpu.memory_space<vmem>>, vector<2x10x8xf32>,
    %120 = vector.extract_strided_slice %116 {offsets = [0, 0, 0], sizes = [2, 10, 8], strides = [1, 1, 1]} : vector<2x10x32xf32> to vector<2x10x8xf32>
    %c0_46 = arith.constant 0 : index
    %c0_47 = arith.constant 0 : index
    %c0_48 = arith.constant 0 : index
    %121 = vector.load %arg4[%c0_46, %c0_47, %c0_48] : memref<8x10x8xf32, #tpu.memory_space<vmem>>, vector<2x10x8xf32>
    tpu.vector_store %arg4[%c0_46, %c0_47, %c0_48], %120 {strides = array<i32>} : memref<8x10x8xf32, #tpu.memory_space<vmem>>, vector<2x10x8xf32>,
    %122 = vector.extract_strided_slice %117 {offsets = [0, 0, 0], sizes = [2, 10, 8], strides = [1, 1, 1]} : vector<2x10x32xf32> to vector<2x10x8xf32>
    %c0_49 = arith.constant 0 : index
    %c0_50 = arith.constant 0 : index
    %c0_51 = arith.constant 0 : index
    %123 = vector.load %arg5[%c0_49, %c0_50, %c0_51] : memref<8x10x8xf32, #tpu.memory_space<vmem>>, vector<2x10x8xf32>
    tpu.vector_store %arg5[%c0_49, %c0_50, %c0_51], %122 {strides = array<i32>} : memref<8x10x8xf32, #tpu.memory_space<vmem>>, vector<2x10x8xf32>,
    %124 = vector.extract_strided_slice %115 {offsets = [0, 0, 8], sizes = [2, 10, 8], strides = [1, 1, 1]} : vector<2x10x32xf32> to vector<2x10x8xf32>
    %c2 = arith.constant 2 : index
    %c0_52 = arith.constant 0 : index
    %c0_53 = arith.constant 0 : index
    %125 = vector.load %arg3[%c2, %c0_52, %c0_53] : memref<8x10x8xf32, #tpu.memory_space<vmem>>, vector<2x10x8xf32>
    tpu.vector_store %arg3[%c2, %c0_52, %c0_53], %124 {strides = array<i32>} : memref<8x10x8xf32, #tpu.memory_space<vmem>>, vector<2x10x8xf32>,
    %126 = vector.extract_strided_slice %116 {offsets = [0, 0, 8], sizes = [2, 10, 8], strides = [1, 1, 1]} : vector<2x10x32xf32> to vector<2x10x8xf32>
    %c2_54 = arith.constant 2 : index
    %c0_55 = arith.constant 0 : index
    %c0_56 = arith.constant 0 : index
    %127 = vector.load %arg4[%c2_54, %c0_55, %c0_56] : memref<8x10x8xf32, #tpu.memory_space<vmem>>, vector<2x10x8xf32>
    tpu.vector_store %arg4[%c2_54, %c0_55, %c0_56], %126 {strides = array<i32>} : memref<8x10x8xf32, #tpu.memory_space<vmem>>, vector<2x10x8xf32>,
    %128 = vector.extract_strided_slice %117 {offsets = [0, 0, 8], sizes = [2, 10, 8], strides = [1, 1, 1]} : vector<2x10x32xf32> to vector<2x10x8xf32>
    %c2_57 = arith.constant 2 : index
    %c0_58 = arith.constant 0 : index
    %c0_59 = arith.constant 0 : index
    %129 = vector.load %arg5[%c2_57, %c0_58, %c0_59] : memref<8x10x8xf32, #tpu.memory_space<vmem>>, vector<2x10x8xf32>
    tpu.vector_store %arg5[%c2_57, %c0_58, %c0_59], %128 {strides = array<i32>} : memref<8x10x8xf32, #tpu.memory_space<vmem>>, vector<2x10x8xf32>,
    %130 = vector.extract_strided_slice %115 {offsets = [0, 0, 16], sizes = [2, 10, 8], strides = [1, 1, 1]} : vector<2x10x32xf32> to vector<2x10x8xf32>
    %c4 = arith.constant 4 : index
    %c0_60 = arith.constant 0 : index
    %c0_61 = arith.constant 0 : index
    %131 = vector.load %arg3[%c4, %c0_60, %c0_61] : memref<8x10x8xf32, #tpu.memory_space<vmem>>, vector<2x10x8xf32>
    tpu.vector_store %arg3[%c4, %c0_60, %c0_61], %130 {strides = array<i32>} : memref<8x10x8xf32, #tpu.memory_space<vmem>>, vector<2x10x8xf32>,
    %132 = vector.extract_strided_slice %116 {offsets = [0, 0, 16], sizes = [2, 10, 8], strides = [1, 1, 1]} : vector<2x10x32xf32> to vector<2x10x8xf32>
    %c4_62 = arith.constant 4 : index
    %c0_63 = arith.constant 0 : index
    %c0_64 = arith.constant 0 : index
    %133 = vector.load %arg4[%c4_62, %c0_63, %c0_64] : memref<8x10x8xf32, #tpu.memory_space<vmem>>, vector<2x10x8xf32>
    tpu.vector_store %arg4[%c4_62, %c0_63, %c0_64], %132 {strides = array<i32>} : memref<8x10x8xf32, #tpu.memory_space<vmem>>, vector<2x10x8xf32>,
    %134 = vector.extract_strided_slice %117 {offsets = [0, 0, 16], sizes = [2, 10, 8], strides = [1, 1, 1]} : vector<2x10x32xf32> to vector<2x10x8xf32>
    %c4_65 = arith.constant 4 : index
    %c0_66 = arith.constant 0 : index
    %c0_67 = arith.constant 0 : index
    %135 = vector.load %arg5[%c4_65, %c0_66, %c0_67] : memref<8x10x8xf32, #tpu.memory_space<vmem>>, vector<2x10x8xf32>
    tpu.vector_store %arg5[%c4_65, %c0_66, %c0_67], %134 {strides = array<i32>} : memref<8x10x8xf32, #tpu.memory_space<vmem>>, vector<2x10x8xf32>,
    %136 = vector.extract_strided_slice %115 {offsets = [0, 0, 24], sizes = [2, 10, 8], strides = [1, 1, 1]} : vector<2x10x32xf32> to vector<2x10x8xf32>
    %c6 = arith.constant 6 : index
    %c0_68 = arith.constant 0 : index
    %c0_69 = arith.constant 0 : index
    %137 = vector.load %arg3[%c6, %c0_68, %c0_69] : memref<8x10x8xf32, #tpu.memory_space<vmem>>, vector<2x10x8xf32>
    tpu.vector_store %arg3[%c6, %c0_68, %c0_69], %136 {strides = array<i32>} : memref<8x10x8xf32, #tpu.memory_space<vmem>>, vector<2x10x8xf32>,
    %138 = vector.extract_strided_slice %116 {offsets = [0, 0, 24], sizes = [2, 10, 8], strides = [1, 1, 1]} : vector<2x10x32xf32> to vector<2x10x8xf32>
    %c6_70 = arith.constant 6 : index
    %c0_71 = arith.constant 0 : index
    %c0_72 = arith.constant 0 : index
    %139 = vector.load %arg4[%c6_70, %c0_71, %c0_72] : memref<8x10x8xf32, #tpu.memory_space<vmem>>, vector<2x10x8xf32>
    tpu.vector_store %arg4[%c6_70, %c0_71, %c0_72], %138 {strides = array<i32>} : memref<8x10x8xf32, #tpu.memory_space<vmem>>, vector<2x10x8xf32>,
    %140 = vector.extract_strided_slice %117 {offsets = [0, 0, 24], sizes = [2, 10, 8], strides = [1, 1, 1]} : vector<2x10x32xf32> to vector<2x10x8xf32>
    %c6_73 = arith.constant 6 : index
    %c0_74 = arith.constant 0 : index
    %c0_75 = arith.constant 0 : index
    %141 = vector.load %arg5[%c6_73, %c0_74, %c0_75] : memref<8x10x8xf32, #tpu.memory_space<vmem>>, vector<2x10x8xf32>
    tpu.vector_store %arg5[%c6_73, %c0_74, %c0_75], %140 {strides = array<i32>} : memref<8x10x8xf32, #tpu.memory_space<vmem>>, vector<2x10x8xf32>,
    %c0_76 = arith.constant 0 : index
    %c0_77 = arith.constant 0 : index
    %c0_78 = arith.constant 0 : index
    %142 = vector.load %arg3[%c0_76, %c0_77, %c0_78] : memref<8x10x8xf32, #tpu.memory_space<vmem>>, vector<8x10x8xf32>
    %c0_79 = arith.constant 0 : index
    %c0_80 = arith.constant 0 : index
    %c0_81 = arith.constant 0 : index
    %143 = vector.load %arg4[%c0_79, %c0_80, %c0_81] : memref<8x10x8xf32, #tpu.memory_space<vmem>>, vector<8x10x8xf32>
    %c0_82 = arith.constant 0 : index
    %c0_83 = arith.constant 0 : index
    %c0_84 = arith.constant 0 : index
    %144 = vector.load %arg5[%c0_82, %c0_83, %c0_84] : memref<8x10x8xf32, #tpu.memory_space<vmem>>, vector<8x10x8xf32>
    "tpu.trace_start"() <{level = 10 : i32, message = "bqd,bkd->bqk"}> : () -> ()
    %cst_85 = arith.constant dense<0.000000e+00> : vector<8x10x10xf32>
    %145 = tpu.matmul %142, %143, %cst_85 {dimension_numbers = #tpu.dot_dimension_numbers<[2], [2], [1], [1], [0, 0, 0, 1, 1, 1], [0], [0]>} : vector<8x10x8xf32>, vector<8x10x8xf32>, vector<8x10x10xf32> -> vector<8x10x10xf32>
    "tpu.trace_stop"() : () -> ()
    %cst_86 = arith.constant 0.353553385 : f32
    %146 = vector.broadcast %cst_86 : f32 to vector<8x10x10xf32>
    %147 = arith.mulf %145, %146 : vector<8x10x10xf32>
    %cst_87 = arith.constant dense<0xFF800000> : vector<8x10xf32>
    %148 = vector.multi_reduction <maximumf>, %147, %cst_87 [2] : vector<8x10x10xf32> to vector<8x10xf32>
    %149 = vector.shape_cast %148 : vector<8x10xf32> to vector<8x10x1xf32>
    %150 = vector.broadcast %149 : vector<8x10x1xf32> to vector<8x10x10xf32>
    %151 = arith.subf %147, %150 : vector<8x10x10xf32>
    %152 = math.exp %151 : vector<8x10x10xf32>
    %cst_88 = arith.constant dense<0.000000e+00> : vector<8x10xf32>
    %153 = vector.multi_reduction <add>, %152, %cst_88 [2] : vector<8x10x10xf32> to vector<8x10xf32>
    %154 = vector.shape_cast %153 : vector<8x10xf32> to vector<8x10x1xf32>
    %155 = tpu.reciprocal %154 {approx = true} : vector<8x10x1xf32> -> vector<8x10x1xf32>
    %156 = arith.mulf %154, %155 : vector<8x10x1xf32>
    %cst_89 = arith.constant 2.000000e+00 : f32
    %157 = vector.broadcast %cst_89 : f32 to vector<8x10x1xf32>
    %158 = arith.subf %157, %156 : vector<8x10x1xf32>
    %159 = arith.mulf %155, %158 : vector<8x10x1xf32>
    %160 = vector.broadcast %159 : vector<8x10x1xf32> to vector<8x10x10xf32>
    %161 = arith.mulf %152, %160 : vector<8x10x10xf32>
    "tpu.trace_start"() <{level = 10 : i32, message = "bqk,bkd->bqd"}> : () -> ()
    %cst_90 = arith.constant dense<0.000000e+00> : vector<8x10x8xf32>
    %162 = tpu.matmul %161, %144, %cst_90 {dimension_numbers = #tpu.dot_dimension_numbers<[2], [1], [1], [2], [0, 0, 0, 1, 1, 2], [0], [0]>} : vector<8x10x10xf32>, vector<8x10x8xf32>, vector<8x10x8xf32> -> vector<8x10x8xf32>
    "tpu.trace_stop"() : () -> ()
    %163 = vector.extract_strided_slice %162 {offsets = [0, 0, 0], sizes = [2, 10, 8], strides = [1, 1, 1]} : vector<8x10x8xf32> to vector<2x10x8xf32>
    %164 = vector.extract_strided_slice %81 {offsets = [0, 0], sizes = [8, 32], strides = [1, 1]} : vector<32x32xf32> to vector<8x32xf32>
    %cst_91 = arith.constant dense<0.000000e+00> : vector<2x10x32xf32>
    %165 = tpu.matmul %163, %164, %cst_91 {dimension_numbers = #tpu.dot_dimension_numbers<[2], [0], [0, 1], [1], [0, 0, 0, 1, 1, 1], [], []>} : vector<2x10x8xf32>, vector<8x32xf32>, vector<2x10x32xf32> -> vector<2x10x32xf32>
    %166 = vector.extract_strided_slice %162 {offsets = [2, 0, 0], sizes = [2, 10, 8], strides = [1, 1, 1]} : vector<8x10x8xf32> to vector<2x10x8xf32>
    %167 = vector.extract_strided_slice %81 {offsets = [8, 0], sizes = [8, 32], strides = [1, 1]} : vector<32x32xf32> to vector<8x32xf32>
    %cst_92 = arith.constant dense<0.000000e+00> : vector<2x10x32xf32>
    %168 = tpu.matmul %166, %167, %cst_92 {dimension_numbers = #tpu.dot_dimension_numbers<[2], [0], [0, 1], [1], [0, 0, 0, 1, 1, 1], [], []>} : vector<2x10x8xf32>, vector<8x32xf32>, vector<2x10x32xf32> -> vector<2x10x32xf32>
    %169 = arith.addf %165, %168 : vector<2x10x32xf32>
    %170 = vector.extract_strided_slice %162 {offsets = [4, 0, 0], sizes = [2, 10, 8], strides = [1, 1, 1]} : vector<8x10x8xf32> to vector<2x10x8xf32>
    %171 = vector.extract_strided_slice %81 {offsets = [16, 0], sizes = [8, 32], strides = [1, 1]} : vector<32x32xf32> to vector<8x32xf32>
    %cst_93 = arith.constant dense<0.000000e+00> : vector<2x10x32xf32>
    %172 = tpu.matmul %170, %171, %cst_93 {dimension_numbers = #tpu.dot_dimension_numbers<[2], [0], [0, 1], [1], [0, 0, 0, 1, 1, 1], [], []>} : vector<2x10x8xf32>, vector<8x32xf32>, vector<2x10x32xf32> -> vector<2x10x32xf32>
    %173 = arith.addf %169, %172 : vector<2x10x32xf32>
    %174 = vector.extract_strided_slice %162 {offsets = [6, 0, 0], sizes = [2, 10, 8], strides = [1, 1, 1]} : vector<8x10x8xf32> to vector<2x10x8xf32>
    %175 = vector.extract_strided_slice %81 {offsets = [24, 0], sizes = [8, 32], strides = [1, 1]} : vector<32x32xf32> to vector<8x32xf32>
    %cst_94 = arith.constant dense<0.000000e+00> : vector<2x10x32xf32>
    %176 = tpu.matmul %174, %175, %cst_94 {dimension_numbers = #tpu.dot_dimension_numbers<[2], [0], [0, 1], [1], [0, 0, 0, 1, 1, 1], [], []>} : vector<2x10x8xf32>, vector<8x32xf32>, vector<2x10x32xf32> -> vector<2x10x32xf32>
    %177 = arith.addf %173, %176 : vector<2x10x32xf32>
    %178 = vector.shape_cast %82 : vector<1x32xf32> to vector<1x1x32xf32>
    %179 = vector.broadcast %178 : vector<1x1x32xf32> to vector<2x10x32xf32>
    %180 = arith.addf %177, %179 : vector<2x10x32xf32>
    %181 = arith.addf %78, %180 : vector<2x10x32xf32>
    %cst_95 = arith.constant dense<0.000000e+00> : vector<2x10xf32>
    %182 = vector.multi_reduction <add>, %180, %cst_95 [2] : vector<2x10x32xf32> to vector<2x10xf32>
    %183 = vector.shape_cast %182 : vector<2x10xf32> to vector<2x10x1xf32>
    %cst_96 = arith.constant 3.200000e+01 : f32
    %184 = vector.broadcast %cst_96 : f32 to vector<2x10x1xf32>
    %185 = arith.divf %183, %184 : vector<2x10x1xf32>
    %186 = vector.broadcast %185 : vector<2x10x1xf32> to vector<2x10x32xf32>
    %187 = arith.subf %180, %186 : vector<2x10x32xf32>
    %188 = arith.mulf %187, %187 : vector<2x10x32xf32>
    %cst_97 = arith.constant dense<0.000000e+00> : vector<2x10xf32>
    %189 = vector.multi_reduction <add>, %188, %cst_97 [2] : vector<2x10x32xf32> to vector<2x10xf32>
    %190 = vector.shape_cast %189 : vector<2x10xf32> to vector<2x10x1xf32>
    %cst_98 = arith.constant 3.200000e+01 : f32
    %191 = vector.broadcast %cst_98 : f32 to vector<2x10x1xf32>
    %192 = arith.divf %190, %191 : vector<2x10x1xf32>
    %cst_99 = arith.constant 9.99999974E-6 : f32
    %193 = vector.broadcast %cst_99 : f32 to vector<2x10x1xf32>
    %194 = arith.addf %192, %193 : vector<2x10x1xf32>
    %195 = math.rsqrt %194 : vector<2x10x1xf32>
    %196 = vector.broadcast %195 : vector<2x10x1xf32> to vector<2x10x32xf32>
    %197 = arith.mulf %187, %196 : vector<2x10x32xf32>
    %198 = vector.shape_cast %83 : vector<1x32xf32> to vector<1x1x32xf32>
    %199 = vector.broadcast %198 : vector<1x1x32xf32> to vector<2x10x32xf32>
    %200 = arith.mulf %197, %199 : vector<2x10x32xf32>
    %201 = vector.shape_cast %84 : vector<1x32xf32> to vector<1x1x32xf32>
    %202 = vector.broadcast %201 : vector<1x1x32xf32> to vector<2x10x32xf32>
    %203 = arith.addf %200, %202 : vector<2x10x32xf32>
    %cst_100 = arith.constant dense<0.000000e+00> : vector<2x10x64xf32>
    %204 = tpu.matmul %203, %85, %cst_100 {dimension_numbers = #tpu.dot_dimension_numbers<[2], [0], [0, 1], [1], [0, 0, 0, 1, 1, 1], [], []>} : vector<2x10x32xf32>, vector<32x64xf32>, vector<2x10x64xf32> -> vector<2x10x64xf32>
    %205 = vector.shape_cast %86 : vector<1x64xf32> to vector<1x1x64xf32>
    %206 = vector.broadcast %205 : vector<1x1x64xf32> to vector<2x10x64xf32>
    %207 = arith.addf %204, %206 : vector<2x10x64xf32>
    %cst_101 = arith.constant 0.000000e+00 : f32
    %208 = vector.broadcast %cst_101 : f32 to vector<2x10x64xf32>
    %209 = arith.maximumf %207, %208 : vector<2x10x64xf32>
    %cst_102 = arith.constant dense<0.000000e+00> : vector<2x10x32xf32>
    %210 = tpu.matmul %209, %87, %cst_102 {dimension_numbers = #tpu.dot_dimension_numbers<[2], [0], [0, 1], [1], [0, 0, 0, 1, 1, 1], [], []>} : vector<2x10x64xf32>, vector<64x32xf32>, vector<2x10x32xf32> -> vector<2x10x32xf32>
    %211 = arith.addf %181, %210 : vector<2x10x32xf32>
    %212 = vector.shape_cast %88 : vector<1x32xf32> to vector<1x1x32xf32>
    %213 = vector.broadcast %212 : vector<1x1x32xf32> to vector<2x10x32xf32>
    %214 = arith.addf %211, %213 : vector<2x10x32xf32>
    %c416 = arith.constant 416 : index
    %c0_103 = arith.constant 0 : index
    %215 = vector.load %arg1[%c416, %c0_103] : memref<696x128xf32, #tpu.memory_space<vmem>>, vector<32x96xf32>
    %c448 = arith.constant 448 : index
    %c0_104 = arith.constant 0 : index
    %216 = vector.load %arg1[%c448, %c0_104] : memref<696x128xf32, #tpu.memory_space<vmem>>, vector<1x96xf32>
    %c456 = arith.constant 456 : index
    %c0_105 = arith.constant 0 : index
    %217 = vector.load %arg1[%c456, %c0_105] : memref<696x128xf32, #tpu.memory_space<vmem>>, vector<32x32xf32>
    %c488 = arith.constant 488 : index
    %c0_106 = arith.constant 0 : index
    %218 = vector.load %arg1[%c488, %c0_106] : memref<696x128xf32, #tpu.memory_space<vmem>>, vector<1x32xf32>
    %c496 = arith.constant 496 : index
    %c0_107 = arith.constant 0 : index
    %219 = vector.load %arg1[%c496, %c0_107] : memref<696x128xf32, #tpu.memory_space<vmem>>, vector<1x32xf32>
    %c504 = arith.constant 504 : index
    %c0_108 = arith.constant 0 : index
    %220 = vector.load %arg1[%c504, %c0_108] : memref<696x128xf32, #tpu.memory_space<vmem>>, vector<1x32xf32>
    %c512 = arith.constant 512 : index
    %c0_109 = arith.constant 0 : index
    %221 = vector.load %arg1[%c512, %c0_109] : memref<696x128xf32, #tpu.memory_space<vmem>>, vector<32x64xf32>
    %c544 = arith.constant 544 : index
    %c0_110 = arith.constant 0 : index
    %222 = vector.load %arg1[%c544, %c0_110] : memref<696x128xf32, #tpu.memory_space<vmem>>, vector<1x64xf32>
    %c552 = arith.constant 552 : index
    %c0_111 = arith.constant 0 : index
    %223 = vector.load %arg1[%c552, %c0_111] : memref<696x128xf32, #tpu.memory_space<vmem>>, vector<64x32xf32>
    %c616 = arith.constant 616 : index
    %c0_112 = arith.constant 0 : index
    %224 = vector.load %arg1[%c616, %c0_112] : memref<696x128xf32, #tpu.memory_space<vmem>>, vector<1x32xf32>
    %cst_113 = arith.constant dense<0.000000e+00> : vector<2x10xf32>
    %225 = vector.multi_reduction <add>, %214, %cst_113 [2] : vector<2x10x32xf32> to vector<2x10xf32>
    %226 = vector.shape_cast %225 : vector<2x10xf32> to vector<2x10x1xf32>
    %cst_114 = arith.constant 3.200000e+01 : f32
    %227 = vector.broadcast %cst_114 : f32 to vector<2x10x1xf32>
    %228 = arith.divf %226, %227 : vector<2x10x1xf32>
    %229 = vector.broadcast %228 : vector<2x10x1xf32> to vector<2x10x32xf32>
    %230 = arith.subf %214, %229 : vector<2x10x32xf32>
    %231 = arith.mulf %230, %230 : vector<2x10x32xf32>
    %cst_115 = arith.constant dense<0.000000e+00> : vector<2x10xf32>
    %232 = vector.multi_reduction <add>, %231, %cst_115 [2] : vector<2x10x32xf32> to vector<2x10xf32>
    %233 = vector.shape_cast %232 : vector<2x10xf32> to vector<2x10x1xf32>
    %cst_116 = arith.constant 3.200000e+01 : f32
    %234 = vector.broadcast %cst_116 : f32 to vector<2x10x1xf32>
    %235 = arith.divf %233, %234 : vector<2x10x1xf32>
    %cst_117 = arith.constant 9.99999974E-6 : f32
    %236 = vector.broadcast %cst_117 : f32 to vector<2x10x1xf32>
    %237 = arith.addf %235, %236 : vector<2x10x1xf32>
    %238 = math.rsqrt %237 : vector<2x10x1xf32>
    %239 = vector.broadcast %238 : vector<2x10x1xf32> to vector<2x10x32xf32>
    %240 = arith.mulf %230, %239 : vector<2x10x32xf32>
    %241 = vector.shape_cast %219 : vector<1x32xf32> to vector<1x1x32xf32>
    %242 = vector.broadcast %241 : vector<1x1x32xf32> to vector<2x10x32xf32>
    %243 = arith.mulf %240, %242 : vector<2x10x32xf32>
    %244 = vector.shape_cast %220 : vector<1x32xf32> to vector<1x1x32xf32>
    %245 = vector.broadcast %244 : vector<1x1x32xf32> to vector<2x10x32xf32>
    %246 = arith.addf %243, %245 : vector<2x10x32xf32>
    %cst_118 = arith.constant dense<0.000000e+00> : vector<2x10x96xf32>
    %247 = tpu.matmul %246, %215, %cst_118 {dimension_numbers = #tpu.dot_dimension_numbers<[2], [0], [0, 1], [1], [0, 0, 0, 1, 1, 1], [], []>} : vector<2x10x32xf32>, vector<32x96xf32>, vector<2x10x96xf32> -> vector<2x10x96xf32>
    %248 = vector.shape_cast %216 : vector<1x96xf32> to vector<1x1x96xf32>
    %249 = vector.broadcast %248 : vector<1x1x96xf32> to vector<2x10x96xf32>
    %250 = arith.addf %247, %249 : vector<2x10x96xf32>
    %251 = vector.extract_strided_slice %250 {offsets = [0, 0, 0], sizes = [2, 10, 32], strides = [1, 1, 1]} : vector<2x10x96xf32> to vector<2x10x32xf32>
    %252 = vector.extract_strided_slice %250 {offsets = [0, 0, 32], sizes = [2, 10, 32], strides = [1, 1, 1]} : vector<2x10x96xf32> to vector<2x10x32xf32>
    %253 = vector.extract_strided_slice %250 {offsets = [0, 0, 64], sizes = [2, 10, 32], strides = [1, 1, 1]} : vector<2x10x96xf32> to vector<2x10x32xf32>
    %254 = vector.extract_strided_slice %251 {offsets = [0, 0, 0], sizes = [2, 10, 8], strides = [1, 1, 1]} : vector<2x10x32xf32> to vector<2x10x8xf32>
    %c0_119 = arith.constant 0 : index
    %c0_120 = arith.constant 0 : index
    %c0_121 = arith.constant 0 : index
    %255 = vector.load %arg3[%c0_119, %c0_120, %c0_121] : memref<8x10x8xf32, #tpu.memory_space<vmem>>, vector<2x10x8xf32>
    tpu.vector_store %arg3[%c0_119, %c0_120, %c0_121], %254 {strides = array<i32>} : memref<8x10x8xf32, #tpu.memory_space<vmem>>, vector<2x10x8xf32>,
    %256 = vector.extract_strided_slice %252 {offsets = [0, 0, 0], sizes = [2, 10, 8], strides = [1, 1, 1]} : vector<2x10x32xf32> to vector<2x10x8xf32>
    %c0_122 = arith.constant 0 : index
    %c0_123 = arith.constant 0 : index
    %c0_124 = arith.constant 0 : index
    %257 = vector.load %arg4[%c0_122, %c0_123, %c0_124] : memref<8x10x8xf32, #tpu.memory_space<vmem>>, vector<2x10x8xf32>
    tpu.vector_store %arg4[%c0_122, %c0_123, %c0_124], %256 {strides = array<i32>} : memref<8x10x8xf32, #tpu.memory_space<vmem>>, vector<2x10x8xf32>,
    %258 = vector.extract_strided_slice %253 {offsets = [0, 0, 0], sizes = [2, 10, 8], strides = [1, 1, 1]} : vector<2x10x32xf32> to vector<2x10x8xf32>
    %c0_125 = arith.constant 0 : index
    %c0_126 = arith.constant 0 : index
    %c0_127 = arith.constant 0 : index
    %259 = vector.load %arg5[%c0_125, %c0_126, %c0_127] : memref<8x10x8xf32, #tpu.memory_space<vmem>>, vector<2x10x8xf32>
    tpu.vector_store %arg5[%c0_125, %c0_126, %c0_127], %258 {strides = array<i32>} : memref<8x10x8xf32, #tpu.memory_space<vmem>>, vector<2x10x8xf32>,
    %260 = vector.extract_strided_slice %251 {offsets = [0, 0, 8], sizes = [2, 10, 8], strides = [1, 1, 1]} : vector<2x10x32xf32> to vector<2x10x8xf32>
    %c2_128 = arith.constant 2 : index
    %c0_129 = arith.constant 0 : index
    %c0_130 = arith.constant 0 : index
    %261 = vector.load %arg3[%c2_128, %c0_129, %c0_130] : memref<8x10x8xf32, #tpu.memory_space<vmem>>, vector<2x10x8xf32>
    tpu.vector_store %arg3[%c2_128, %c0_129, %c0_130], %260 {strides = array<i32>} : memref<8x10x8xf32, #tpu.memory_space<vmem>>, vector<2x10x8xf32>,
    %262 = vector.extract_strided_slice %252 {offsets = [0, 0, 8], sizes = [2, 10, 8], strides = [1, 1, 1]} : vector<2x10x32xf32> to vector<2x10x8xf32>
    %c2_131 = arith.constant 2 : index
    %c0_132 = arith.constant 0 : index
    %c0_133 = arith.constant 0 : index
    %263 = vector.load %arg4[%c2_131, %c0_132, %c0_133] : memref<8x10x8xf32, #tpu.memory_space<vmem>>, vector<2x10x8xf32>
    tpu.vector_store %arg4[%c2_131, %c0_132, %c0_133], %262 {strides = array<i32>} : memref<8x10x8xf32, #tpu.memory_space<vmem>>, vector<2x10x8xf32>,
    %264 = vector.extract_strided_slice %253 {offsets = [0, 0, 8], sizes = [2, 10, 8], strides = [1, 1, 1]} : vector<2x10x32xf32> to vector<2x10x8xf32>
    %c2_134 = arith.constant 2 : index
    %c0_135 = arith.constant 0 : index
    %c0_136 = arith.constant 0 : index
    %265 = vector.load %arg5[%c2_134, %c0_135, %c0_136] : memref<8x10x8xf32, #tpu.memory_space<vmem>>, vector<2x10x8xf32>
    tpu.vector_store %arg5[%c2_134, %c0_135, %c0_136], %264 {strides = array<i32>} : memref<8x10x8xf32, #tpu.memory_space<vmem>>, vector<2x10x8xf32>,
    %266 = vector.extract_strided_slice %251 {offsets = [0, 0, 16], sizes = [2, 10, 8], strides = [1, 1, 1]} : vector<2x10x32xf32> to vector<2x10x8xf32>
    %c4_137 = arith.constant 4 : index
    %c0_138 = arith.constant 0 : index
    %c0_139 = arith.constant 0 : index
    %267 = vector.load %arg3[%c4_137, %c0_138, %c0_139] : memref<8x10x8xf32, #tpu.memory_space<vmem>>, vector<2x10x8xf32>
    tpu.vector_store %arg3[%c4_137, %c0_138, %c0_139], %266 {strides = array<i32>} : memref<8x10x8xf32, #tpu.memory_space<vmem>>, vector<2x10x8xf32>,
    %268 = vector.extract_strided_slice %252 {offsets = [0, 0, 16], sizes = [2, 10, 8], strides = [1, 1, 1]} : vector<2x10x32xf32> to vector<2x10x8xf32>
    %c4_140 = arith.constant 4 : index
    %c0_141 = arith.constant 0 : index
    %c0_142 = arith.constant 0 : index
    %269 = vector.load %arg4[%c4_140, %c0_141, %c0_142] : memref<8x10x8xf32, #tpu.memory_space<vmem>>, vector<2x10x8xf32>
    tpu.vector_store %arg4[%c4_140, %c0_141, %c0_142], %268 {strides = array<i32>} : memref<8x10x8xf32, #tpu.memory_space<vmem>>, vector<2x10x8xf32>,
    %270 = vector.extract_strided_slice %253 {offsets = [0, 0, 16], sizes = [2, 10, 8], strides = [1, 1, 1]} : vector<2x10x32xf32> to vector<2x10x8xf32>
    %c4_143 = arith.constant 4 : index
    %c0_144 = arith.constant 0 : index
    %c0_145 = arith.constant 0 : index
    %271 = vector.load %arg5[%c4_143, %c0_144, %c0_145] : memref<8x10x8xf32, #tpu.memory_space<vmem>>, vector<2x10x8xf32>
    tpu.vector_store %arg5[%c4_143, %c0_144, %c0_145], %270 {strides = array<i32>} : memref<8x10x8xf32, #tpu.memory_space<vmem>>, vector<2x10x8xf32>,
    %272 = vector.extract_strided_slice %251 {offsets = [0, 0, 24], sizes = [2, 10, 8], strides = [1, 1, 1]} : vector<2x10x32xf32> to vector<2x10x8xf32>
    %c6_146 = arith.constant 6 : index
    %c0_147 = arith.constant 0 : index
    %c0_148 = arith.constant 0 : index
    %273 = vector.load %arg3[%c6_146, %c0_147, %c0_148] : memref<8x10x8xf32, #tpu.memory_space<vmem>>, vector<2x10x8xf32>
    tpu.vector_store %arg3[%c6_146, %c0_147, %c0_148], %272 {strides = array<i32>} : memref<8x10x8xf32, #tpu.memory_space<vmem>>, vector<2x10x8xf32>,
    %274 = vector.extract_strided_slice %252 {offsets = [0, 0, 24], sizes = [2, 10, 8], strides = [1, 1, 1]} : vector<2x10x32xf32> to vector<2x10x8xf32>
    %c6_149 = arith.constant 6 : index
    %c0_150 = arith.constant 0 : index
    %c0_151 = arith.constant 0 : index
    %275 = vector.load %arg4[%c6_149, %c0_150, %c0_151] : memref<8x10x8xf32, #tpu.memory_space<vmem>>, vector<2x10x8xf32>
    tpu.vector_store %arg4[%c6_149, %c0_150, %c0_151], %274 {strides = array<i32>} : memref<8x10x8xf32, #tpu.memory_space<vmem>>, vector<2x10x8xf32>,
    %276 = vector.extract_strided_slice %253 {offsets = [0, 0, 24], sizes = [2, 10, 8], strides = [1, 1, 1]} : vector<2x10x32xf32> to vector<2x10x8xf32>
    %c6_152 = arith.constant 6 : index
    %c0_153 = arith.constant 0 : index
    %c0_154 = arith.constant 0 : index
    %277 = vector.load %arg5[%c6_152, %c0_153, %c0_154] : memref<8x10x8xf32, #tpu.memory_space<vmem>>, vector<2x10x8xf32>
    tpu.vector_store %arg5[%c6_152, %c0_153, %c0_154], %276 {strides = array<i32>} : memref<8x10x8xf32, #tpu.memory_space<vmem>>, vector<2x10x8xf32>,
    %c0_155 = arith.constant 0 : index
    %c0_156 = arith.constant 0 : index
    %c0_157 = arith.constant 0 : index
    %278 = vector.load %arg3[%c0_155, %c0_156, %c0_157] : memref<8x10x8xf32, #tpu.memory_space<vmem>>, vector<8x10x8xf32>
    %c0_158 = arith.constant 0 : index
    %c0_159 = arith.constant 0 : index
    %c0_160 = arith.constant 0 : index
    %279 = vector.load %arg4[%c0_158, %c0_159, %c0_160] : memref<8x10x8xf32, #tpu.memory_space<vmem>>, vector<8x10x8xf32>
    %c0_161 = arith.constant 0 : index
    %c0_162 = arith.constant 0 : index
    %c0_163 = arith.constant 0 : index
    %280 = vector.load %arg5[%c0_161, %c0_162, %c0_163] : memref<8x10x8xf32, #tpu.memory_space<vmem>>, vector<8x10x8xf32>
    "tpu.trace_start"() <{level = 10 : i32, message = "bqd,bkd->bqk"}> : () -> ()
    %cst_164 = arith.constant dense<0.000000e+00> : vector<8x10x10xf32>
    %281 = tpu.matmul %278, %279, %cst_164 {dimension_numbers = #tpu.dot_dimension_numbers<[2], [2], [1], [1], [0, 0, 0, 1, 1, 1], [0], [0]>} : vector<8x10x8xf32>, vector<8x10x8xf32>, vector<8x10x10xf32> -> vector<8x10x10xf32>
    "tpu.trace_stop"() : () -> ()
    %cst_165 = arith.constant 0.353553385 : f32
    %282 = vector.broadcast %cst_165 : f32 to vector<8x10x10xf32>
    %283 = arith.mulf %281, %282 : vector<8x10x10xf32>
    %cst_166 = arith.constant dense<0xFF800000> : vector<8x10xf32>
    %284 = vector.multi_reduction <maximumf>, %283, %cst_166 [2] : vector<8x10x10xf32> to vector<8x10xf32>
    %285 = vector.shape_cast %284 : vector<8x10xf32> to vector<8x10x1xf32>
    %286 = vector.broadcast %285 : vector<8x10x1xf32> to vector<8x10x10xf32>
    %287 = arith.subf %283, %286 : vector<8x10x10xf32>
    %288 = math.exp %287 : vector<8x10x10xf32>
    %cst_167 = arith.constant dense<0.000000e+00> : vector<8x10xf32>
    %289 = vector.multi_reduction <add>, %288, %cst_167 [2] : vector<8x10x10xf32> to vector<8x10xf32>
    %290 = vector.shape_cast %289 : vector<8x10xf32> to vector<8x10x1xf32>
    %291 = tpu.reciprocal %290 {approx = true} : vector<8x10x1xf32> -> vector<8x10x1xf32>
    %292 = arith.mulf %290, %291 : vector<8x10x1xf32>
    %cst_168 = arith.constant 2.000000e+00 : f32
    %293 = vector.broadcast %cst_168 : f32 to vector<8x10x1xf32>
    %294 = arith.subf %293, %292 : vector<8x10x1xf32>
    %295 = arith.mulf %291, %294 : vector<8x10x1xf32>
    %296 = vector.broadcast %295 : vector<8x10x1xf32> to vector<8x10x10xf32>
    %297 = arith.mulf %288, %296 : vector<8x10x10xf32>
    "tpu.trace_start"() <{level = 10 : i32, message = "bqk,bkd->bqd"}> : () -> ()
    %cst_169 = arith.constant dense<0.000000e+00> : vector<8x10x8xf32>
    %298 = tpu.matmul %297, %280, %cst_169 {dimension_numbers = #tpu.dot_dimension_numbers<[2], [1], [1], [2], [0, 0, 0, 1, 1, 2], [0], [0]>} : vector<8x10x10xf32>, vector<8x10x8xf32>, vector<8x10x8xf32> -> vector<8x10x8xf32>
    "tpu.trace_stop"() : () -> ()
    %299 = vector.extract_strided_slice %298 {offsets = [0, 0, 0], sizes = [2, 10, 8], strides = [1, 1, 1]} : vector<8x10x8xf32> to vector<2x10x8xf32>
    %300 = vector.extract_strided_slice %217 {offsets = [0, 0], sizes = [8, 32], strides = [1, 1]} : vector<32x32xf32> to vector<8x32xf32>
    %cst_170 = arith.constant dense<0.000000e+00> : vector<2x10x32xf32>
    %301 = tpu.matmul %299, %300, %cst_170 {dimension_numbers = #tpu.dot_dimension_numbers<[2], [0], [0, 1], [1], [0, 0, 0, 1, 1, 1], [], []>} : vector<2x10x8xf32>, vector<8x32xf32>, vector<2x10x32xf32> -> vector<2x10x32xf32>
    %302 = vector.extract_strided_slice %298 {offsets = [2, 0, 0], sizes = [2, 10, 8], strides = [1, 1, 1]} : vector<8x10x8xf32> to vector<2x10x8xf32>
    %303 = vector.extract_strided_slice %217 {offsets = [8, 0], sizes = [8, 32], strides = [1, 1]} : vector<32x32xf32> to vector<8x32xf32>
    %cst_171 = arith.constant dense<0.000000e+00> : vector<2x10x32xf32>
    %304 = tpu.matmul %302, %303, %cst_171 {dimension_numbers = #tpu.dot_dimension_numbers<[2], [0], [0, 1], [1], [0, 0, 0, 1, 1, 1], [], []>} : vector<2x10x8xf32>, vector<8x32xf32>, vector<2x10x32xf32> -> vector<2x10x32xf32>
    %305 = arith.addf %301, %304 : vector<2x10x32xf32>
    %306 = vector.extract_strided_slice %298 {offsets = [4, 0, 0], sizes = [2, 10, 8], strides = [1, 1, 1]} : vector<8x10x8xf32> to vector<2x10x8xf32>
    %307 = vector.extract_strided_slice %217 {offsets = [16, 0], sizes = [8, 32], strides = [1, 1]} : vector<32x32xf32> to vector<8x32xf32>
    %cst_172 = arith.constant dense<0.000000e+00> : vector<2x10x32xf32>
    %308 = tpu.matmul %306, %307, %cst_172 {dimension_numbers = #tpu.dot_dimension_numbers<[2], [0], [0, 1], [1], [0, 0, 0, 1, 1, 1], [], []>} : vector<2x10x8xf32>, vector<8x32xf32>, vector<2x10x32xf32> -> vector<2x10x32xf32>
    %309 = arith.addf %305, %308 : vector<2x10x32xf32>
    %310 = vector.extract_strided_slice %298 {offsets = [6, 0, 0], sizes = [2, 10, 8], strides = [1, 1, 1]} : vector<8x10x8xf32> to vector<2x10x8xf32>
    %311 = vector.extract_strided_slice %217 {offsets = [24, 0], sizes = [8, 32], strides = [1, 1]} : vector<32x32xf32> to vector<8x32xf32>
    %cst_173 = arith.constant dense<0.000000e+00> : vector<2x10x32xf32>
    %312 = tpu.matmul %310, %311, %cst_173 {dimension_numbers = #tpu.dot_dimension_numbers<[2], [0], [0, 1], [1], [0, 0, 0, 1, 1, 1], [], []>} : vector<2x10x8xf32>, vector<8x32xf32>, vector<2x10x32xf32> -> vector<2x10x32xf32>
    %313 = arith.addf %309, %312 : vector<2x10x32xf32>
    %314 = vector.shape_cast %218 : vector<1x32xf32> to vector<1x1x32xf32>
    %315 = vector.broadcast %314 : vector<1x1x32xf32> to vector<2x10x32xf32>
    %316 = arith.addf %313, %315 : vector<2x10x32xf32>
    %317 = arith.addf %214, %316 : vector<2x10x32xf32>
    %cst_174 = arith.constant dense<0.000000e+00> : vector<2x10xf32>
    %318 = vector.multi_reduction <add>, %316, %cst_174 [2] : vector<2x10x32xf32> to vector<2x10xf32>
    %319 = vector.shape_cast %318 : vector<2x10xf32> to vector<2x10x1xf32>
    %cst_175 = arith.constant 3.200000e+01 : f32
    %320 = vector.broadcast %cst_175 : f32 to vector<2x10x1xf32>
    %321 = arith.divf %319, %320 : vector<2x10x1xf32>
    %322 = vector.broadcast %321 : vector<2x10x1xf32> to vector<2x10x32xf32>
    %323 = arith.subf %316, %322 : vector<2x10x32xf32>
    %324 = arith.mulf %323, %323 : vector<2x10x32xf32>
    %cst_176 = arith.constant dense<0.000000e+00> : vector<2x10xf32>
    %325 = vector.multi_reduction <add>, %324, %cst_176 [2] : vector<2x10x32xf32> to vector<2x10xf32>
    %326 = vector.shape_cast %325 : vector<2x10xf32> to vector<2x10x1xf32>
    %cst_177 = arith.constant 3.200000e+01 : f32
    %327 = vector.broadcast %cst_177 : f32 to vector<2x10x1xf32>
    %328 = arith.divf %326, %327 : vector<2x10x1xf32>
    %cst_178 = arith.constant 9.99999974E-6 : f32
    %329 = vector.broadcast %cst_178 : f32 to vector<2x10x1xf32>
    %330 = arith.addf %328, %329 : vector<2x10x1xf32>
    %331 = math.rsqrt %330 : vector<2x10x1xf32>
    %332 = vector.broadcast %331 : vector<2x10x1xf32> to vector<2x10x32xf32>
    %333 = arith.mulf %323, %332 : vector<2x10x32xf32>
    %334 = vector.shape_cast %219 : vector<1x32xf32> to vector<1x1x32xf32>
    %335 = vector.broadcast %334 : vector<1x1x32xf32> to vector<2x10x32xf32>
    %336 = arith.mulf %333, %335 : vector<2x10x32xf32>
    %337 = vector.shape_cast %220 : vector<1x32xf32> to vector<1x1x32xf32>
    %338 = vector.broadcast %337 : vector<1x1x32xf32> to vector<2x10x32xf32>
    %339 = arith.addf %336, %338 : vector<2x10x32xf32>
    %cst_179 = arith.constant dense<0.000000e+00> : vector<2x10x64xf32>
    %340 = tpu.matmul %339, %221, %cst_179 {dimension_numbers = #tpu.dot_dimension_numbers<[2], [0], [0, 1], [1], [0, 0, 0, 1, 1, 1], [], []>} : vector<2x10x32xf32>, vector<32x64xf32>, vector<2x10x64xf32> -> vector<2x10x64xf32>
    %341 = vector.shape_cast %222 : vector<1x64xf32> to vector<1x1x64xf32>
    %342 = vector.broadcast %341 : vector<1x1x64xf32> to vector<2x10x64xf32>
    %343 = arith.addf %340, %342 : vector<2x10x64xf32>
    %cst_180 = arith.constant 0.000000e+00 : f32
    %344 = vector.broadcast %cst_180 : f32 to vector<2x10x64xf32>
    %345 = arith.maximumf %343, %344 : vector<2x10x64xf32>
    %cst_181 = arith.constant dense<0.000000e+00> : vector<2x10x32xf32>
    %346 = tpu.matmul %345, %223, %cst_181 {dimension_numbers = #tpu.dot_dimension_numbers<[2], [0], [0, 1], [1], [0, 0, 0, 1, 1, 1], [], []>} : vector<2x10x64xf32>, vector<64x32xf32>, vector<2x10x32xf32> -> vector<2x10x32xf32>
    %347 = arith.addf %317, %346 : vector<2x10x32xf32>
    %348 = vector.shape_cast %224 : vector<1x32xf32> to vector<1x1x32xf32>
    %349 = vector.broadcast %348 : vector<1x1x32xf32> to vector<2x10x32xf32>
    %350 = arith.addf %347, %349 : vector<2x10x32xf32>
    %c624 = arith.constant 624 : index
    %c0_182 = arith.constant 0 : index
    %351 = vector.load %arg1[%c624, %c0_182] : memref<696x128xf32, #tpu.memory_space<vmem>>, vector<32x64xf32>
    %c656 = arith.constant 656 : index
    %c0_183 = arith.constant 0 : index
    %352 = vector.load %arg1[%c656, %c0_183] : memref<696x128xf32, #tpu.memory_space<vmem>>, vector<1x64xf32>
    %c664 = arith.constant 664 : index
    %c0_184 = arith.constant 0 : index
    %353 = vector.load %arg1[%c664, %c0_184] : memref<696x128xf32, #tpu.memory_space<vmem>>, vector<1x64xf32>
    %c672 = arith.constant 672 : index
    %c0_185 = arith.constant 0 : index
    %354 = vector.load %arg1[%c672, %c0_185] : memref<696x128xf32, #tpu.memory_space<vmem>>, vector<1x64xf32>
    %c680 = arith.constant 680 : index
    %c0_186 = arith.constant 0 : index
    %355 = vector.load %arg1[%c680, %c0_186] : memref<696x128xf32, #tpu.memory_space<vmem>>, vector<1x64xf32>
    %c688 = arith.constant 688 : index
    %c0_187 = arith.constant 0 : index
    %356 = vector.load %arg1[%c688, %c0_187] : memref<696x128xf32, #tpu.memory_space<vmem>>, vector<1x1xf32>
    %357 = vector.extract_strided_slice %350 {offsets = [0, 0, 0], sizes = [2, 6, 32], strides = [1, 1, 1]} : vector<2x10x32xf32> to vector<2x6x32xf32>
    %cst_188 = arith.constant dense<0.000000e+00> : vector<2x6x64xf32>
    %358 = tpu.matmul %357, %351, %cst_188 {dimension_numbers = #tpu.dot_dimension_numbers<[2], [0], [0, 1], [1], [0, 0, 0, 1, 1, 1], [], []>} : vector<2x6x32xf32>, vector<32x64xf32>, vector<2x6x64xf32> -> vector<2x6x64xf32>
    %359 = vector.shape_cast %352 : vector<1x64xf32> to vector<1x1x64xf32>
    %360 = vector.broadcast %359 : vector<1x1x64xf32> to vector<2x6x64xf32>
    %361 = arith.addf %358, %360 : vector<2x6x64xf32>
    %cst_189 = arith.constant dense<0.000000e+00> : vector<2x6xf32>
    %362 = vector.multi_reduction <add>, %361, %cst_189 [2] : vector<2x6x64xf32> to vector<2x6xf32>
    %363 = vector.shape_cast %362 : vector<2x6xf32> to vector<2x6x1xf32>
    %cst_190 = arith.constant 6.400000e+01 : f32
    %364 = vector.broadcast %cst_190 : f32 to vector<2x6x1xf32>
    %365 = arith.divf %363, %364 : vector<2x6x1xf32>
    %366 = vector.broadcast %365 : vector<2x6x1xf32> to vector<2x6x64xf32>
    %367 = arith.subf %361, %366 : vector<2x6x64xf32>
    %368 = arith.mulf %367, %367 : vector<2x6x64xf32>
    %cst_191 = arith.constant dense<0.000000e+00> : vector<2x6xf32>
    %369 = vector.multi_reduction <add>, %368, %cst_191 [2] : vector<2x6x64xf32> to vector<2x6xf32>
    %370 = vector.shape_cast %369 : vector<2x6xf32> to vector<2x6x1xf32>
    %cst_192 = arith.constant 6.400000e+01 : f32
    %371 = vector.broadcast %cst_192 : f32 to vector<2x6x1xf32>
    %372 = arith.divf %370, %371 : vector<2x6x1xf32>
    %cst_193 = arith.constant 9.99999974E-6 : f32
    %373 = vector.broadcast %cst_193 : f32 to vector<2x6x1xf32>
    %374 = arith.addf %372, %373 : vector<2x6x1xf32>
    %375 = math.rsqrt %374 : vector<2x6x1xf32>
    %376 = vector.broadcast %375 : vector<2x6x1xf32> to vector<2x6x64xf32>
    %377 = arith.mulf %367, %376 : vector<2x6x64xf32>
    %378 = vector.shape_cast %353 : vector<1x64xf32> to vector<1x1x64xf32>
    %379 = vector.broadcast %378 : vector<1x1x64xf32> to vector<2x6x64xf32>
    %380 = arith.mulf %377, %379 : vector<2x6x64xf32>
    %381 = vector.shape_cast %354 : vector<1x64xf32> to vector<1x1x64xf32>
    %382 = vector.broadcast %381 : vector<1x1x64xf32> to vector<2x6x64xf32>
    %383 = arith.addf %380, %382 : vector<2x6x64xf32>
    %cst_194 = arith.constant 0.000000e+00 : f32
    %384 = vector.broadcast %cst_194 : f32 to vector<2x6x64xf32>
    %385 = arith.maximumf %383, %384 : vector<2x6x64xf32>
    %cst_195 = arith.constant dense<0.000000e+00> : vector<2x64xf32>
    %386 = vector.multi_reduction <add>, %385, %cst_195 [1] : vector<2x6x64xf32> to vector<2x64xf32>
    %cst_196 = arith.constant 6.000000e+00 : f32
    %387 = vector.broadcast %cst_196 : f32 to vector<2x64xf32>
    %388 = arith.divf %386, %387 : vector<2x64xf32>
    %389 = vector.broadcast %355 : vector<1x64xf32> to vector<2x64xf32>
    %390 = arith.mulf %388, %389 : vector<2x64xf32>
    %cst_197 = arith.constant dense<0.000000e+00> : vector<2xf32>
    %391 = vector.multi_reduction <add>, %390, %cst_197 [1] : vector<2x64xf32> to vector<2xf32>
    %392 = vector.shape_cast %391 : vector<2xf32> to vector<2x1xf32>
    %393 = vector.broadcast %356 : vector<1x1xf32> to vector<2x1xf32>
    %394 = arith.addf %392, %393 : vector<2x1xf32>
    %c0_198 = arith.constant 0 : index
    %c0_199 = arith.constant 0 : index
    %395 = vector.load %arg2[%c0_198, %c0_199] : memref<2x1xf32, #tpu.memory_space<vmem>>, vector<2x1xf32>
    tpu.vector_store %arg2[%c0_198, %c0_199], %394 {strides = array<i32>} : memref<2x1xf32, #tpu.memory_space<vmem>>, vector<2x1xf32>,
    return
  }
}

</mosaic_0001>

<bundles_post_ra>
// kernel: tpu_custom_call.1
= control target key start
LH: loop header
LB: loop body
LE: loop exit
PB: predicated region body
PF: predicated region fallthrough
CT: control target
= control target key end

     0   :  { %7 = vsyncpa [#allocation6], 0  ;;  %s12210_s9 = smov [#allocation5]   ;;  %s14319_s0 = inlined_call_operand.vmem [shape: f32[2,10,18], index: 0, kind: input, shape index: {}]   ;;  %s14320_s1 = inlined_call_operand.hbm [shape: f32[696,128], index: 1, kind: input, shape index: {}]   ;;  %s14321_s2 = inlined_call_operand.vmem [shape: f32[2,1], index: 2, kind: output, shape index: {}]  }
   0x1   :  { %s15_s10 = sshll.u32 %s12210_s9, 4  ;;  %s12186_s13 = scalar_lea.hbm %s14320_s1, 11136  ;;  %s16_s10 = int_to_ptr.vmem [resolvable:$true] %s15_s10 }
   0x2   :  { %p12187_p0 = scmp.ne.s32.totalorder %s14320_s1, %s12186_s13  ;;  %p12190_p1 = scmp.lt.u32.totalorder %s12186_s13, %s14320_s1 }
   0x4   :  { %p12192_p2 = pnand %p12190_p1, %p12187_p0 }
   0x6   :  { %12195 = shalt.err (!%p12192_p2)
}
   0x7   :  { %s12196_s18 = scalar_lea.vmem %s16_s10, 11136  ;;  %p12201_p4 = scmp.lt.s32.totalorder %s16_s10, %s16_s10 }
   0x8   :  { %p12197_p3 = scmp.ne.s32.totalorder %s16_s10, %s12196_s18  ;;  %p12202_p5 = scmp.lt.s32.totalorder %s12196_s18, %s12196_s18 }
   0xa   :  { %p12203_p6 = por %p12202_p5, %p12201_p4 }
   0xc   :  { %p12204_p7 = pnand %p12203_p6, %p12197_p3 }
   0xe   :  { %12207 = shalt.err (!%p12204_p7)
}
   0xf   :  { %s12211_s19 = smov 128   ;;  %s12212_s20 = smov 8  }
  0x10   :  { %21 = dma.hbm_to_vmem [thread:$0]  %s14320_s1, 11136, %s16_s10, [#allocation6], %s12211_s19, %s12211_s19, %s12212_s20  }
  0x11   :  { %12208 = dma.done.wait [#allocation6], 11136  }
  0x12   :  { %12209 = vsyncadd [#allocation6], 4294956160  ;;  %v12213_v0 = vmov 0.0|0.0   ;;  %v67_v1 = vlaneseq  ;;  %vm12214_vm0 = vmmov 0   ;;  %v12215_v2 = vmov 0.0   ;;  %v29_v8 = vld [vmem:[#allocation5] sm:$0xff] }
  0x13   :  { %11690 = vmatprep.subr.bf16.mxu0 %v12213_v0  ;;  %11693 = vmatprep.subr.bf16.mxu1 %v12213_v0  ;;  %v12216_v3 = vmov 1983009808   ;;  %v30_v9 = vld [vmem:[#allocation5 + $0x8] sm:$0xff]  ;;  %v25_v11 = vld [vmem:[%s14319_s0] sm:$0xff]  ;;  %v27_v12 = vld [vmem:[%s14319_s0 + $0x10] sm:$0xff]  ;;  %vm223_vm1 = vcmask 1041408  }
  0x14   :  { %11190 = vmatprep.mubr.msk.f32.mxu0 %vm12214_vm0, %v12215_v2  ;;  %v65_v4 = vunpack.c.l.s4 %v12216_v3  ;;  %11215 = vmatprep.mubr.msk.f32.mxu1 %vm12214_vm0, %v12215_v2  ;;  %v12266_v5 = vshrl.u32 %v67_v1, 7  ;;  %v11691_v10 = vpack.c.bf16 %v30_v9, %v29_v8  ;;  %v63_v13 = vcombine.high %v25_v11, %v25_v11  ;;  %v10749_v17 = vld.sshfl [vmem:[%s14319_s0 + $0x8] sm:$0x3 pattern:$0x76325410]  ;;  %s12222_s30 = smov 88  }
  0x15   :  { %v87_v15 = vcombine.high %v27_v12, %v27_v12  ;;  %v31_v18 = vld [vmem:[#allocation5 + $0x10] sm:$0x3]  ;;  %vm216_vm2 = vcmask 146432   ;;  %v10748_v38 = vld [vmem:[#allocation5 + $0x18] ss:$0 sm:$0xff]  ;;  %vm414_vm3 = vcmask 523264  }
  0x16   :  { %v66_v6 = vunpack.c.0.s8 %v65_v4  ;;  %11692 = vmatpush3.bf16.msra.mxu0 %v11691_v10  ;;  %v10750_v33 = vld.sshfl [vmem:[%s14319_s0 + $0x18] sm:$0x3 pattern:$0x76325410]  ;;  %v112_v39 = vcombine.high %v10748_v38, %v10748_v38  ;;  %s12217_s0 = smov 64   ;;  %vm418_vm4 = vcmask 517120  }
  0x17   :  { %11188 = vmatprep.subr.mxu0 %v12215_v2  ;;  %vm1726_vm5 = vcmp.lt.s32.totalorder %v12266_v5, 6  ;;  %vm1866_vm6 = vcmask 261120   ;;  %vm1870_vm7 = vcmask 254976   ;;  %vm2283_vm8 = vcmask 58368   ;;  %s12223_s3 = smov 96   ;;  %s12224_s4 = smov 80  }
  0x18   :  { %v12269_v7 = vsub.s32 %v66_v6, %v12266_v5  ;;  %vm2281_vm9 = vcmask 64512   ;;  %s12225_s5 = smov 120   ;;  %s12226_s6 = smov 112   ;;  %vm12231_vm11 = vmmov 1   ;;  %vm3236_vm13 = vcmask 74752  }
  0x19   :  { %s12227_s7 = smov 72   ;;  %s12228_s8 = smov 104   ;;  %vm12890_vm10 = vmpackc.low %vm2281_vm9, %vm2281_vm9  ;;  %vm3232_vm14 = vcmask 80896   ;;  %vm10419_vm15 = vcmask 521216  }
  0x1a   :  { %v70_v14 = vrot.slane %v25_v11, %v12269_v7  ;;  %v94_v16 = vrot.slane %v27_v12, %v12269_v7  ;;  %v77_v19 = vrot.slane %v63_v13, %v12269_v7  ;;  %v101_v21 = vrot.slane %v87_v15, %v12269_v7  ;;  %11189 = vmatpush3.msk.msra.mxu0 %vm223_vm1, %v31_v18  ;;  %s12229_s9 = smov 56   ;;  %s12230_s10 = smov 48   ;;  %vm12964_vm12 = vmpackc.low %vm223_vm1, %vm12231_vm11 }
  0x1b   :  { %11705 = vmatprep.subr.bf16.mxu0 %v12213_v0  ;;  %v119_v40 = vrot.slane %v10748_v38, %v12269_v7  ;;  %v126_v41 = vrot.slane %v112_v39, %v12269_v7  ;;  %v12218_v38 = vmov 269488144   ;;  %s12232_s11 = smov 40   ;;  %vm10741_vm1 = vcmask 1024  }
  0x1c   :  { %v78_v20 = vcombine.high %v70_v14, %v70_v14  ;;  %v102_v22 = vcombine.high %v94_v16, %v94_v16  ;;  %v79_v23 = vcombine.high %v77_v19, %v77_v19  ;;  %v146_v25 = vcombine.low %v10749_v17, %v94_v16 }
  0x1d   :  { %v103_v32 = vcombine.high %v101_v21, %v101_v21  ;;  %v127_v42 = vcombine.high %v119_v40, %v119_v40  ;;  %v128_v43 = vcombine.high %v126_v41, %v126_v41  ;;  %v188_v48 = vcombine.low %v119_v40, %v119_v40 }
  0x1e   :  { %v129_v24 = vcombine.low %v70_v14, %v78_v20  ;;  %v147_v26 = vcombine.low %v102_v22, %v101_v21  ;;  %v130_v27 = vcombine.low %v77_v19, %v79_v23  ;;  %v154_v30 = vrot.slane %v146_v25, %v12269_v7 }
  0x1f   :  { %v163_v36 = vcombine.low %v103_v32, %v10750_v33  ;;  %v171_v44 = vcombine.low %v119_v40, %v127_v42  ;;  %v172_v45 = vcombine.low %v126_v41, %v128_v43  ;;  %v189_v49 = vcombine.low %v127_v42, %v126_v41 }
  0x20   :  { %v137_v28 = vrot.slane %v129_v24, %v12269_v7  ;;  %v144_v29 = vrot.slane %v130_v27, %v12269_v7  ;;  %v161_v31 = vrot.slane %v147_v26, %v12269_v7  ;;  %v196_v51 = vrot.slane %v188_v48, %v12269_v7 }
  0x21   :  { %v170_v37 = vrot.slane %v163_v36, %v12269_v7  ;;  %v179_v46 = vrot.slane %v171_v44, %v12269_v7  ;;  %v186_v47 = vrot.slane %v172_v45, %v12269_v7  ;;  %v203_v52 = vrot.slane %v189_v49, %v12269_v7 }
  0x22   :  { %v145_v34 = vcombine.low %v137_v28, %v144_v29  ;;  %v162_v35 = vcombine.low %v154_v30, %v161_v31  ;;  %v205_v57 = vcombine.low %v128_v43, %v119_v40  ;;  %v438_v39 = vunpack.c.l.s4 %v12218_v38 }
  0x23   :  { %v187_v50 = vcombine.low %v179_v46, %v186_v47  ;;  %v204_v56 = vcombine.low %v196_v51, %v203_v52  ;;  %v12219_v40 = vmov 842150450   ;;  %v12220_v42 = vmov 1414812756  }
  0x24   :  { %11191 = vmatmul.mubr.msk.f32.vlgmr.msra.gmra.mrb[0].mxu0 %vm216_vm2, %v145_v34  ;;  %v212_v1 = vrot.slane %v205_v57, %v12269_v7  ;;  %v445_v41 = vunpack.c.l.s4 %v12219_v40  ;;  %v452_v43 = vunpack.c.l.s4 %v12220_v42  ;;  %v12221_v44 = vmov 1987475062  }
  0x25   :  { %11193 = vmatprep.mubr.msk.f32.mxu0 %vm12214_vm0, %v12215_v2  ;;  %v459_v45 = vunpack.c.l.s4 %v12221_v44  ;;  %v439_v46 = vunpack.c.0.s8 %v438_v39 }
  0x26   :  { %v446_v47 = vunpack.c.0.s8 %v445_v41  ;;  %v453_v48 = vunpack.c.0.s8 %v452_v43 }
  0x27   :  { %v460_v49 = vunpack.c.0.s8 %v459_v45 }
  0x28   :  { %11194 = vmatmul.mubr.msk.f32.gmra.mrb[2].mxu0 %vm216_vm2, %v162_v35  ;;  %v12381_v51 = vsub.s32 %v446_v47, %v12266_v5  ;;  %v12384_v52 = vsub.s32 %v453_v48, %v12266_v5 }
  0x29   :  { %11196 = vmatprep.mubr.msk.f32.mxu0 %vm12214_vm0, %v12215_v2 }
  0x2c   :  { %11197 = vmatmul.mubr.msk.f32.gmra.mrb[4].mxu0 %vm216_vm2, %v170_v37 }
  0x2d   :  { %11240 = vmatprep.mubr.msk.f32.mxu0 %vm12214_vm0, %v12215_v2 }
  0xf7   :  { %v293_v53 = vpop.f32.mrb[0].mxu0 }
  0xf8   :  { %v294_v54 = vadd.f32 %v293_v53, %v187_v50  ;;  %v11192_v55 = vpop.f32.mrb[1].mxu0  ;;  %v12378_v50 = vsub.s32 %v439_v46, %v12266_v5  ;;  %v12387_v53 = vsub.s32 %v460_v49, %v12266_v5 }
  0xfa   :  { %v310_v58 = vcombine.high %v294_v54, %v294_v54  ;;  %v12308_v59 = vrot.slane %v294_v54, %v12269_v7 }
  0xfb   :  { %v298_v60 = vpop.f32.mrb[2].mxu0 }
  0xfc   :  { %v12311_v61 = vrot.slane %v310_v58, %v12269_v7  ;;  %v299_v62 = vadd.f32 %v298_v60, %v204_v56  ;;  %v11195_v63 = vpop.f32.mrb[3].mxu0  ;;  %v12316_v3 = vcombine.high %v12308_v59, %v12308_v59 }
  0xfe   :  { %v327_v4 = vcombine.high %v299_v62, %v299_v62  ;;  %v12319_v6 = vrot.slane %v299_v62, %v12269_v7  ;;  %v12323_v8 = vcombine.high %v12311_v61, %v12311_v61  ;;  %v362_v9 = vcombine.low %v12308_v59, %v12316_v3 }
  0xff   :  { %v303_v10 = vpop.f32.mrb[4].mxu0 }
 0x100   :  { %v12328_v11 = vrot.slane %v327_v4, %v12269_v7  ;;  %v12332_v12 = vcombine.high %v12319_v6, %v12319_v6  ;;  %v304_v13 = vadd.f32 %v303_v10, %v212_v1  ;;  %v11198_v14 = vpop.f32.mrb[5].mxu0  ;;  %v363_v15 = vcombine.low %v12311_v61, %v12323_v8 }
 0x101   :  { %v370_v16 = vrot.slane %v362_v9, %v12269_v7  ;;  %v12339_v17 = vrot.slane %v12319_v6, %v12269_v7 }
 0x102   :  { %v12342_v18 = vrot.slane %v304_v13, %v12269_v7  ;;  %v377_v19 = vrot.slane %v363_v15, %v12269_v7  ;;  %v12347_v20 = vcombine.high %v12328_v11, %v12328_v11  ;;  %v386_v21 = vcombine.low %v12332_v12, %v12328_v11 }
 0x103   :  { %801 = vrot.lane.b32.xlu1 %v12339_v17, %s12217_s0 }
 0x104   :  { %v378_v22 = vcombine.low %v370_v16, %v377_v19  ;;  %v387_v23 = vcombine.low %v12347_v20, %v12342_v18  ;;  %v394_v24 = vrot.slane %v386_v21, %v12269_v7  ;;  %v12358_v25 = vcombine.high %v12342_v18, %v12342_v18 }
 0x106   :  { %799 = vrot.lane.b32.xlu0 %v378_v22, %s12217_s0  ;;  %v401_v26 = vrot.slane %v387_v23, %v12269_v7  ;;  %v12364_v27 = vrot.slane %v12358_v25, %v12269_v7  ;;  %v415_v37 = vsel %vm414_vm3, %v378_v22, 0.0 }
 0x108   :  { %v12366_v28 = vcombine.low %v394_v24, %v401_v26  ;;  %805 = vrot.lane.b32.xlu1 %v12364_v27, %s12217_s0 }
 0x10a   :  { %803 = vrot.lane.b32.xlu0 %v12366_v28, %s12217_s0 }
 0x175   :  { %v802_v30 = vpop.permute.xlu1 %801 }
 0x176   :  { %v814_v34 = vsel %vm418_vm4, %v802_v30, 0.0 }
 0x178   :  { %v800_v29 = vpop.permute.xlu0 %799 }
 0x179   :  { %v811_v31 = vsel %vm414_vm3, %v800_v29, 0.0 }
 0x17a   :  { %812 = vadd.xlane.f32.xlu0 %v811_v31  ;;  %v806_v33 = vpop.permute.xlu1 %805 }
 0x17b   :  { %v820_v36 = vsel %vm418_vm4, %v806_v33, 0.0 }
 0x17c   :  { %v804_v32 = vpop.permute.xlu0 %803 }
 0x17d   :  { %v817_v35 = vsel %vm414_vm3, %v804_v32, 0.0 }
 0x17e   :  { %815 = vadd.xlane.f32.xlu0 %v814_v34  ;;  %818 = vadd.xlane.f32.xlu1 %v817_v35 }
 0x182   :  { %821 = vadd.xlane.f32.xlu0 %v820_v36 }
 0x186   :  { %416 = vadd.xlane.f32.xlu0 %v415_v37 }
 0x207   :  { %v813_v54 = vpop.xlane.xlu0 %812 }
 0x208   :  { %v823_v55 = vmul.f32 0.015625, %v813_v54 }
 0x20a   :  { %v837_v56 = vrot.slane %v823_v55, %v12378_v50  ;;  %v844_v57 = vrot.slane %v823_v55, %v12381_v51  ;;  %v851_v58 = vrot.slane %v823_v55, %v12384_v52  ;;  %v858_v60 = vrot.slane %v823_v55, %v12387_v53 }
 0x20b   :  { %v816_v62 = vpop.xlane.xlu0 %815  ;;  %v819_v63 = vpop.xlane.xlu1 %818 }
 0x20c   :  { %v12394_v1 = vsub.f32 %v12308_v59, %v837_v56  ;;  %v12397_v4 = vsub.f32 %v12316_v3, %v844_v57  ;;  %v12400_v9 = vsub.f32 %v12311_v61, %v851_v58  ;;  %v12403_v10 = vsub.f32 %v12323_v8, %v858_v60 }
 0x20d   :  { %v824_v13 = vmul.f32 0.015625, %v816_v62  ;;  %v825_v14 = vmul.f32 0.015625, %v819_v63  ;;  %v419_v63 = vsel %vm418_vm4, %v12339_v17, 0.0 }
 0x20e   :  { %v921_v15 = vmul.f32 %v12394_v1, %v12394_v1  ;;  %v922_v16 = vmul.f32 %v12397_v4, %v12397_v4  ;;  %v923_v30 = vmul.f32 %v12400_v9, %v12400_v9  ;;  %v924_v31 = vmul.f32 %v12403_v10, %v12403_v10 }
 0x20f   :  { %v865_v19 = vrot.slane %v824_v13, %v12378_v50  ;;  %v872_v21 = vrot.slane %v825_v14, %v12378_v50  ;;  %v879_v22 = vrot.slane %v825_v14, %v12381_v51  ;;  %v886_v23 = vrot.slane %v825_v14, %v12384_v52  ;;  %v822_v24 = vpop.xlane.xlu0 %821 }
 0x210   :  { %v893_v26 = vrot.slane %v825_v14, %v12387_v53  ;;  %v826_v29 = vmul.f32 0.015625, %v822_v24  ;;  %v941_v40 = vcombine.low %v921_v15, %v922_v16  ;;  %v942_v41 = vcombine.low %v923_v30, %v924_v31  ;;  %v10757_v15 = vld [vmem:[#allocation5 + $0x30] ss:$0 sm:$0xff] }
 0x211   :  { %v12419_v32 = vsub.f32 %v12319_v6, %v865_v19  ;;  %v12422_v33 = vsub.f32 %v12332_v12, %v872_v21  ;;  %v12425_v34 = vsub.f32 %v12328_v11, %v879_v22  ;;  %v12428_v35 = vsub.f32 %v12347_v20, %v886_v23  ;;  %v10758_v21 = vld [vmem:[#allocation5 + $0x38] ss:$0 sm:$0xff] }
 0x212   :  { %v12431_v36 = vsub.f32 %v12342_v18, %v893_v26  ;;  %v900_v37 = vrot.slane %v826_v29, %v12378_v50  ;;  %v949_v48 = vrot.slane %v941_v40, %v12269_v7  ;;  %v956_v54 = vrot.slane %v942_v41, %v12269_v7 }
 0x213   :  { %v925_v38 = vmul.f32 %v12419_v32, %v12419_v32  ;;  %v926_v42 = vmul.f32 %v12422_v33, %v12422_v33  ;;  %v927_v44 = vmul.f32 %v12425_v34, %v12425_v34  ;;  %v928_v45 = vmul.f32 %v12428_v35, %v12428_v35  ;;  %v417_v24 = vpop.xlane.xlu0 %416 }
 0x214   :  { %v12437_v39 = vsub.f32 %v12358_v25, %v900_v37  ;;  %v929_v46 = vmul.f32 %v12431_v36, %v12431_v36  ;;  %v957_v57 = vcombine.low %v949_v48, %v956_v54  ;;  %v425_v13 = vsel %vm418_vm4, %v12364_v27, 0.0 }
 0x215   :  { %v964_v43 = vrot.slane %v925_v38, %v12269_v7  ;;  %v965_v55 = vcombine.low %v926_v42, %v927_v44  ;;  %v422_v14 = vsel %vm414_vm3, %v12366_v28, 0.0  ;;  %v1131_v16 = vrot.slane %v10757_v15, %v12269_v7 }
 0x216   :  { %v930_v47 = vmul.f32 %v12437_v39, %v12437_v39  ;;  %v966_v56 = vcombine.low %v928_v45, %v929_v46  ;;  %v1175_v22 = vrot.slane %v10758_v21, %v12269_v7  ;;  %v1124_v23 = vcombine.high %v10757_v15, %v10757_v15 }
 0x217   :  { %991 = vrot.lane.b32.xlu0 %v964_v43, %s12217_s0  ;;  %v973_v58 = vrot.slane %v965_v55, %v12269_v7  ;;  %v1139_v19 = vcombine.high %v1131_v16, %v1131_v16  ;;  %v1168_v42 = vcombine.high %v10758_v21, %v10758_v21  ;;  %v429_v45 = vmul.f32 0.015625, %v417_v24 }
 0x218   :  { %v988_v49 = vrot.slane %v930_v47, %v12269_v7  ;;  %v980_v60 = vrot.slane %v966_v56, %v12269_v7  ;;  %v1138_v17 = vrot.slane %v1124_v23, %v12269_v7  ;;  %v1183_v28 = vcombine.high %v1175_v22, %v1175_v22 }
 0x219   :  { %v1182_v43 = vrot.slane %v1168_v42, %v12269_v7  ;;  %v443_v46 = vrot.slane %v429_v45, %v12378_v50  ;;  %v450_v47 = vrot.slane %v429_v45, %v12381_v51  ;;  %v457_v48 = vrot.slane %v429_v45, %v12384_v52 }
 0x21a   :  { %995 = vrot.lane.b32.xlu1 %v988_v49, %s12217_s0  ;;  %v981_v62 = vcombine.low %v973_v58, %v980_v60  ;;  %v1140_v27 = vcombine.high %v1138_v17, %v1138_v17  ;;  %v464_v49 = vrot.slane %v429_v45, %v12387_v53 }
 0x21b   :  { %v1184_v44 = vcombine.high %v1182_v43, %v1182_v43  ;;  %v12486_v54 = vsub.f32 %v12308_v59, %v443_v46  ;;  %v12489_v55 = vsub.f32 %v12316_v3, %v450_v47  ;;  %v12492_v56 = vsub.f32 %v12311_v61, %v457_v48 }
 0x21d   :  { %v527_v58 = vmul.f32 %v12486_v54, %v12486_v54  ;;  %v528_v60 = vmul.f32 %v12489_v55, %v12489_v55 }
 0x21e   :  { %989 = vrot.lane.b32.xlu1 %v957_v57, %s12217_s0  ;;  %v12495_v57 = vsub.f32 %v12323_v8, %v464_v49 }
 0x21f   :  { %v547_v3 = vcombine.low %v527_v58, %v528_v60  ;;  %v37_v60 = vld [vmem:[#allocation5 + $0x40] sm:$0xff] }
 0x220   :  { %v530_v59 = vmul.f32 %v12495_v57, %v12495_v57 }
 0x221   :  { %v555_v61 = vrot.slane %v547_v3, %v12269_v7 }
 0x222   :  { %993 = vrot.lane.b32.xlu1 %v981_v62, %s12217_s0  ;;  %v529_v62 = vmul.f32 %v12492_v56, %v12492_v56 }
 0x236   :  { %420 = vadd.xlane.f32.xlu0 %v419_v63  ;;  %v548_v63 = vcombine.low %v529_v62, %v530_v59  ;;  %v38_v62 = vld [vmem:[#allocation5 + $0x48] sm:$0xff] }
 0x237   :  { %v11694_v59 = vpack.c.bf16 %v38_v62, %v37_v60 }
 0x239   :  { %11695 = vmatpush3.bf16.msra.mxu1 %v11694_v59 }
 0x23a   :  { %426 = vadd.xlane.f32.xlu0 %v425_v13  ;;  %v562_v13 = vrot.slane %v548_v63, %v12269_v7  ;;  %11696 = vmatprep.subr.bf16.mxu1 %v12213_v0  ;;  %v39_v63 = vld [vmem:[#allocation5 + $0x50] sm:$0xff] }
 0x23c   :  { %v563_v8 = vcombine.low %v555_v61, %v562_v13  ;;  %v40_v61 = vld [vmem:[#allocation5 + $0x58] sm:$0xff] }
 0x23d   :  { %v11697_v13 = vpack.c.bf16 %v40_v61, %v39_v63 }
 0x23e   :  { %v599_v15 = vsel %vm414_vm3, %v563_v8, 0.0  ;;  %v41_v8 = vld [vmem:[#allocation5 + $0x60] sm:$0xff] }
 0x23f   :  { %11698 = vmatpush3.bf16.msra.mxu1 %v11697_v13 }
 0x240   :  { %11699 = vmatprep.subr.bf16.mxu1 %v12213_v0 }
 0x246   :  { %423 = vadd.xlane.f32.xlu1 %v422_v14 }
 0x250   :  { %1143 = vrot.lane.b32.xlu0 %v1139_v19, %s12217_s0 }
 0x254   :  { %1185 = vrot.lane.b32.xlu0 %v1175_v22, %s12217_s0 }
 0x257   :  { %1141 = vrot.lane.b32.xlu1 %v1131_v16, %s12217_s0 }
 0x25b   :  { %1145 = vrot.lane.b32.xlu1 %v1138_v17, %s12217_s0 }
 0x25f   :  { %1147 = vrot.lane.b32.xlu1 %v1140_v27, %s12217_s0 }
 0x263   :  { %1187 = vrot.lane.b32.xlu1 %v1183_v28, %s12217_s0 }
 0x289   :  { %v992_v26 = vpop.permute.xlu0 %991 }
 0x28a   :  { %v1004_v29 = vsel %vm418_vm4, %v992_v26, 0.0 }
 0x28b   :  { %1005 = vadd.xlane.f32.xlu0 %v1004_v29 }
 0x28c   :  { %v996_v30 = vpop.permute.xlu1 %995 }
 0x28d   :  { %v1010_v31 = vsel %vm418_vm4, %v996_v30, 0.0 }
 0x28f   :  { %1011 = vadd.xlane.f32.xlu0 %v1010_v31 }
 0x290   :  { %v990_v37 = vpop.permute.xlu1 %989 }
 0x291   :  { %v1001_v38 = vsel %vm414_vm3, %v990_v37, 0.0 }
 0x292   :  { %1002 = vadd.xlane.f32.xlu1 %v1001_v38 }
 0x294   :  { %v994_v40 = vpop.permute.xlu1 %993 }
 0x295   :  { %v1007_v41 = vsel %vm414_vm3, %v994_v40, 0.0 }
 0x296   :  { %1008 = vadd.xlane.f32.xlu1 %v1007_v41 }
 0x2a5   :  { %1189 = vrot.lane.b32.xlu0 %v1182_v43, %s12217_s0 }
 0x2a7   :  { %1191 = vrot.lane.b32.xlu1 %v1184_v44, %s12217_s0 }
 0x2c3   :  { %v421_v14 = vpop.xlane.xlu0 %420 }
 0x2c4   :  { %v430_v16 = vmul.f32 0.015625, %v421_v14  ;;  %600 = vadd.xlane.f32.xlu0 %v599_v15  ;;  %v42_v14 = vld [vmem:[#allocation5 + $0x68] sm:$0xff] }
 0x2c5   :  { %v11700_v15 = vpack.c.bf16 %v42_v14, %v41_v8 }
 0x2c6   :  { %v471_v19 = vrot.slane %v430_v16, %v12378_v50  ;;  %v43_v16 = vld [vmem:[#allocation5 + $0x70] sm:$0xff] }
 0x2c7   :  { %v427_v27 = vpop.xlane.xlu0 %426  ;;  %11701 = vmatpush3.bf16.msra.mxu1 %v11700_v15 }
 0x2c8   :  { %v12510_v21 = vsub.f32 %v12319_v6, %v471_v19  ;;  %v432_v28 = vmul.f32 0.015625, %v427_v27  ;;  %v44_v19 = vld [vmem:[#allocation5 + $0x78] sm:$0xff]  ;;  %11702 = vmatprep.subr.bf16.mxu1 %v12213_v0 }
 0x2ca   :  { %v531_v22 = vmul.f32 %v12510_v21, %v12510_v21  ;;  %v506_v29 = vrot.slane %v432_v28, %v12378_v50 }
 0x2cc   :  { %v570_v23 = vrot.slane %v531_v22, %v12269_v7  ;;  %v12534_v43 = vsub.f32 %v12358_v25, %v506_v29  ;;  %v11703_v22 = vpack.c.bf16 %v44_v19, %v43_v16  ;;  %v48_v29 = vld [vmem:[#allocation5 + $0x98] sm:$0xff] }
 0x2ce   :  { %v602_v17 = vsel %vm418_vm4, %v570_v23, 0.0  ;;  %v536_v25 = vmul.f32 %v12534_v43, %v12534_v43  ;;  %11704 = vmatpush3.bf16.msra.mxu1 %v11703_v22 }
 0x2cf   :  { %603 = vadd.xlane.f32.xlu1 %v602_v17  ;;  %11717 = vmatprep.subr.bf16.mxu1 %v12213_v0  ;;  %v12557_v17 = vpop.permute.xlu0 %1143 }
 0x2d0   :  { %v594_v58 = vrot.slane %v536_v25, %v12269_v7 }
 0x2d2   :  { %v608_v3 = vsel %vm418_vm4, %v594_v58, 0.0 }
 0x2d3   :  { %v424_v24 = vpop.xlane.xlu1 %423  ;;  %v12561_v28 = vpop.permute.xlu0 %1185 }
 0x2d4   :  { %v431_v26 = vmul.f32 0.015625, %v424_v24  ;;  %v46_v24 = vld [vmem:[#allocation5 + $0x88] sm:$0xff] }
 0x2d6   :  { %v478_v30 = vrot.slane %v431_v26, %v12378_v50  ;;  %v485_v31 = vrot.slane %v431_v26, %v12381_v51  ;;  %v492_v6 = vrot.slane %v431_v26, %v12384_v52  ;;  %v499_v37 = vrot.slane %v431_v26, %v12387_v53  ;;  %v47_v26 = vld [vmem:[#allocation5 + $0x90] sm:$0xff] }
 0x2d7   :  { %v12555_v23 = vpop.permute.xlu1 %1141 }
 0x2d8   :  { %v12522_v38 = vsub.f32 %v12332_v12, %v478_v30  ;;  %v12525_v40 = vsub.f32 %v12328_v11, %v485_v31  ;;  %v12528_v41 = vsub.f32 %v12347_v20, %v492_v6  ;;  %v12531_v42 = vsub.f32 %v12342_v18, %v499_v37  ;;  %v49_v6 = vld [vmem:[#allocation5 + $0xa0] sm:$0xff] }
 0x2d9   :  { %v11706_v31 = vpack.c.bf16 %v47_v26, %v46_v24 }
 0x2da   :  { %v532_v44 = vmul.f32 %v12522_v38, %v12522_v38  ;;  %v533_v45 = vmul.f32 %v12525_v40, %v12525_v40  ;;  %v534_v12 = vmul.f32 %v12528_v41, %v12528_v41  ;;  %v535_v11 = vmul.f32 %v12531_v42, %v12531_v42 }
 0x2db   :  { %v12559_v27 = vpop.permute.xlu1 %1145  ;;  %11707 = vmatpush3.bf16.msra.mxu0 %v11706_v31 }
 0x2dc   :  { %v571_v20 = vcombine.low %v532_v44, %v533_v45  ;;  %v572_v46 = vcombine.low %v534_v12, %v535_v11  ;;  %v11709_v44 = vpack.c.bf16 %v49_v6, %v48_v29  ;;  %11708 = vmatprep.subr.bf16.mxu0 %v12213_v0  ;;  %v50_v12 = vld [vmem:[#allocation5 + $0xa8] sm:$0xff]  ;;  %v51_v11 = vld [vmem:[#allocation5 + $0xb0] sm:$0xff] }
 0x2de   :  { %v579_v18 = vrot.slane %v571_v20, %v12269_v7  ;;  %v586_v47 = vrot.slane %v572_v46, %v12269_v7 }
 0x2df   :  { %v12563_v30 = vpop.permute.xlu1 %1147  ;;  %11710 = vmatpush3.bf16.msra.mxu0 %v11709_v44 }
 0x2e0   :  { %v587_v48 = vcombine.low %v579_v18, %v586_v47  ;;  %v11712_v47 = vpack.c.bf16 %v51_v11, %v50_v12  ;;  %11711 = vmatprep.subr.bf16.mxu0 %v12213_v0 }
 0x2e2   :  { %v605_v49 = vsel %vm414_vm3, %v587_v48, 0.0  ;;  %v52_v48 = vld [vmem:[#allocation5 + $0xb8] sm:$0xff] }
 0x2e3   :  { %606 = vadd.xlane.f32.xlu0 %v605_v49  ;;  %v12566_v46 = vpop.permute.xlu1 %1187  ;;  %v53_v49 = vld [vmem:[#allocation5 + $0xc0] sm:$0xff]  ;;  %11713 = vmatpush3.bf16.msra.mxu0 %v11712_v47 }
 0x2e4   :  { %v11715_v62 = vpack.c.bf16 %v53_v49, %v52_v48  ;;  %11714 = vmatprep.subr.bf16.mxu0 %v12213_v0 }
 0x2e7   :  { %609 = vadd.xlane.f32.xlu0 %v608_v3  ;;  %11716 = vmatpush3.bf16.msra.mxu0 %v11715_v62 }
 0x318   :  { %v1006_v37 = vpop.xlane.xlu0 %1005 }
 0x319   :  { %v1014_v45 = vmul.f32 0.015625, %v1006_v37 }
 0x31b   :  { %v1018_v20 = vadd.f32 1e-05, %v1014_v45 }
 0x31c   :  { %v1012_v18 = vpop.xlane.xlu0 %1011 }
 0x31d   :  { %12002 = vrsqrt.f32 %v1018_v20  ;;  %v1016_v25 = vmul.f32 0.015625, %v1012_v18 }
 0x31f   :  { %v1020_v58 = vadd.f32 1e-05, %v1016_v25  ;;  %v1003_v60 = vpop.xlane.xlu1 %1002 }
 0x320   :  { %v1013_v59 = vmul.f32 0.015625, %v1003_v60 }
 0x321   :  { %12004 = vrsqrt.f32 %v1020_v58  ;;  %v1190_v58 = vpop.permute.xlu0 %1189 }
 0x322   :  { %v1017_v3 = vadd.f32 1e-05, %v1013_v59 }
 0x323   :  { %v1009_v63 = vpop.xlane.xlu1 %1008 }
 0x324   :  { %12006 = vrsqrt.f32 %v1017_v3  ;;  %v1015_v61 = vmul.f32 0.015625, %v1009_v63 }
 0x326   :  { %v1019_v8 = vadd.f32 1e-05, %v1015_v61 }
 0x327   :  { %v12003_v13 = vpop.eup %12002  ;;  %v1192_v20 = vpop.permute.xlu1 %1191 }
 0x328   :  { %v1063_v14 = vrot.slane %v12003_v13, %v12378_v50  ;;  %12008 = vrsqrt.f32 %v1019_v8 }
 0x32a   :  { %v1113_v16 = vmul.f32 %v1063_v14, %v12419_v32 }
 0x32b   :  { %v12005_v15 = vpop.eup %12004 }
 0x32c   :  { %v1098_v19 = vrot.slane %v12005_v15, %v12378_v50  ;;  %v1157_v26 = vmul.f32 %v12555_v23, %v1113_v16 }
 0x32e   :  { %v1118_v22 = vmul.f32 %v1098_v19, %v12437_v39  ;;  %v12007_v24 = vpop.eup %12006  ;;  %v1201_v18 = vadd.f32 %v12561_v28, %v1157_v26 }
 0x32f   :  { %v1056_v29 = vrot.slane %v12007_v24, %v12387_v53  ;;  %v1049_v31 = vrot.slane %v12007_v24, %v12384_v52  ;;  %v1035_v6 = vrot.slane %v12007_v24, %v12378_v50  ;;  %v1042_v37 = vrot.slane %v12007_v24, %v12381_v51 }
 0x330   :  { %v1162_v44 = vmul.f32 %v12555_v23, %v1118_v22 }
 0x331   :  { %v1112_v45 = vmul.f32 %v1056_v29, %v12403_v10  ;;  %v1111_v32 = vmul.f32 %v1049_v31, %v12400_v9  ;;  %v1109_v12 = vmul.f32 %v1035_v6, %v12394_v1  ;;  %v1110_v39 = vmul.f32 %v1042_v37, %v12397_v4 }
 0x332   :  { %v12009_v11 = vpop.eup %12008  ;;  %v1206_v47 = vadd.f32 %v12561_v28, %v1162_v44 }
 0x333   :  { %v1091_v25 = vrot.slane %v12009_v11, %v12387_v53  ;;  %v1156_v48 = vmul.f32 %v12563_v30, %v1112_v45  ;;  %v1077_v49 = vrot.slane %v12009_v11, %v12381_v51  ;;  %v1084_v10 = vrot.slane %v12009_v11, %v12384_v52 }
 0x334   :  { %v1155_v9 = vmul.f32 %v12559_v27, %v1111_v32  ;;  %v1153_v1 = vmul.f32 %v12555_v23, %v1109_v12  ;;  %v1154_v4 = vmul.f32 %v12557_v17, %v1110_v39  ;;  %v1070_v60 = vrot.slane %v12009_v11, %v12378_v50 }
 0x335   :  { %v1117_v62 = vmul.f32 %v1091_v25, %v12431_v36  ;;  %v1200_v59 = vadd.f32 %v1192_v20, %v1156_v48  ;;  %v1115_v3 = vmul.f32 %v1077_v49, %v12425_v34  ;;  %v1116_v63 = vmul.f32 %v1084_v10, %v12428_v35 }
 0x336   :  { %v1199_v61 = vadd.f32 %v1190_v58, %v1155_v9  ;;  %v1197_v13 = vadd.f32 %v12561_v28, %v1153_v1  ;;  %v1198_v8 = vadd.f32 %v12566_v46, %v1154_v4  ;;  %v1114_v14 = vmul.f32 %v1070_v60, %v12422_v33  ;;  %v10756_v9 = vld [vmem:[#allocation5 + $0x28] ss:$0 sm:$0xff] }
 0x337   :  { %v1161_v15 = vmul.f32 %v12563_v30, %v1117_v62  ;;  %v1210_v16 = vmax.f32 %v1200_v59, 0.0  ;;  %v1159_v19 = vmul.f32 %v12557_v17, %v1115_v3  ;;  %v1160_v22 = vmul.f32 %v12559_v27, %v1116_v63 }
 0x338   :  { %v1209_v36 = vmax.f32 %v1199_v61, 0.0  ;;  %v1207_v24 = vmax.f32 %v1197_v13, 0.0  ;;  %v1208_v26 = vmax.f32 %v1198_v8, 0.0  ;;  %v1158_v34 = vmul.f32 %v12555_v23, %v1114_v14 }
 0x339   :  { %v1205_v35 = vadd.f32 %v1192_v20, %v1161_v15  ;;  %v1203_v29 = vadd.f32 %v12566_v46, %v1159_v19  ;;  %v1204_v31 = vadd.f32 %v1190_v58, %v1160_v22  ;;  %v1211_v32 = vmax.f32 %v1201_v18, 0.0  ;;  %v10755_v58 = vld [vmem:[#allocation5 + $0x20] ss:$0 sm:$0xff] }
 0x33a   :  { %v1500_v6 = vcombine.low %v1209_v36, %v1210_v16  ;;  %v1499_v37 = vcombine.low %v1207_v24, %v1208_v26  ;;  %v1202_v33 = vadd.f32 %v12561_v28, %v1158_v34  ;;  %v1216_v39 = vmax.f32 %v1206_v47, 0.0 }
 0x33b   :  { %v1215_v44 = vmax.f32 %v1205_v35, 0.0  ;;  %v1213_v30 = vmax.f32 %v1203_v29, 0.0  ;;  %v1214_v45 = vmax.f32 %v1204_v31, 0.0  ;;  %v722_v1 = vcombine.high %v10755_v58, %v10755_v58 }
 0x33c   :  { %v1507_v17 = vrot.slane %v1499_v37, %v12269_v7  ;;  %v1514_v27 = vrot.slane %v1500_v6, %v12269_v7  ;;  %v1212_v12 = vmax.f32 %v1202_v33, 0.0  ;;  %v758_v4 = vcombine.high %v10756_v9, %v10756_v9 }
 0x33d   :  { %v1517_v11 = vcombine.low %v1213_v30, %v1214_v45  ;;  %v1533_v25 = vcombine.low %v1215_v44, %v1216_v39  ;;  %v12615_v60 = vrot.slane %v10755_v58, %v12269_v7  ;;  %v12618_v62 = vrot.slane %v722_v1, %v12269_v7 }
 0x33e   :  { %v1515_v23 = vcombine.low %v1507_v17, %v1514_v27  ;;  %v1516_v20 = vcombine.low %v1211_v32, %v1212_v12  ;;  %v12621_v59 = vrot.slane %v10756_v9, %v12269_v7  ;;  %v12624_v61 = vrot.slane %v758_v4, %v12269_v7 }
 0x33f   :  { %v1531_v46 = vrot.slane %v1517_v11, %v12269_v7  ;;  %v1540_v49 = vrot.slane %v1533_v25, %v12269_v7  ;;  %v737_v15 = vcombine.high %v12615_v60, %v12615_v60  ;;  %v738_v19 = vcombine.high %v12618_v62, %v12618_v62 }
 0x340   :  { %1541 = vrot.lane.b32.xlu1 %v1515_v23, %s12217_s0  ;;  %v1524_v28 = vrot.slane %v1516_v20, %v12269_v7  ;;  %v773_v22 = vcombine.high %v12621_v59, %v12621_v59  ;;  %v774_v29 = vcombine.high %v12624_v61, %v12624_v61 }
 0x342   :  { %v1532_v48 = vcombine.low %v1524_v28, %v1531_v46 }
 0x344   :  { %1543 = vrot.lane.b32.xlu0 %v1532_v48, %s12217_s0  ;;  %1545 = vrot.lane.b32.xlu1 %v1540_v49, %s12217_s0 }
 0x351   :  { %v601_v18 = vpop.xlane.xlu0 %600 }
 0x352   :  { %v611_v10 = vmul.f32 0.015625, %v601_v18 }
 0x354   :  { %v615_v47 = vadd.f32 1e-05, %v611_v10 }
 0x356   :  { %12010 = vrsqrt.f32 %v615_v47 }
 0x35c   :  { %v604_v63 = vpop.xlane.xlu1 %603 }
 0x35d   :  { %v612_v36 = vmul.f32 0.015625, %v604_v63 }
 0x35f   :  { %v616_v44 = vadd.f32 1e-05, %v612_v36 }
 0x360   :  { %v12011_v3 = vpop.eup %12010 }
 0x361   :  { %v633_v13 = vrot.slane %v12011_v3, %v12378_v50  ;;  %v640_v8 = vrot.slane %v12011_v3, %v12381_v51  ;;  %v647_v14 = vrot.slane %v12011_v3, %v12384_v52  ;;  %v654_v16 = vrot.slane %v12011_v3, %v12387_v53 }
 0x362   :  { %12012 = vrsqrt.f32 %v616_v44 }
 0x363   :  { %v707_v24 = vmul.f32 %v633_v13, %v12486_v54  ;;  %v708_v26 = vmul.f32 %v640_v8, %v12489_v55  ;;  %v709_v34 = vmul.f32 %v647_v14, %v12492_v56  ;;  %v710_v35 = vmul.f32 %v654_v16, %v12495_v57 }
 0x365   :  { %v743_v31 = vmul.f32 %v12615_v60, %v707_v24  ;;  %v744_v6 = vmul.f32 %v737_v15, %v708_v26  ;;  %v745_v37 = vmul.f32 %v12618_v62, %v709_v34  ;;  %v746_v33 = vmul.f32 %v738_v19, %v710_v35 }
 0x367   :  { %v779_v30 = vadd.f32 %v12621_v59, %v743_v31  ;;  %v780_v45 = vadd.f32 %v773_v22, %v744_v6  ;;  %v781_v54 = vadd.f32 %v12624_v61, %v745_v37  ;;  %v782_v55 = vadd.f32 %v774_v29, %v746_v33 }
 0x369   :  { %v789_v32 = vmax.f32 %v779_v30, 0.0  ;;  %v790_v56 = vmax.f32 %v780_v45, 0.0  ;;  %v791_v17 = vmax.f32 %v781_v54, 0.0  ;;  %v792_v57 = vmax.f32 %v782_v55, 0.0 }
 0x36b   :  { %v1249_v27 = vcombine.low %v789_v32, %v790_v56  ;;  %v1250_v12 = vcombine.low %v791_v17, %v792_v57 }
 0x36c   :  { %v12013_v28 = vpop.eup %12012 }
 0x36d   :  { %v1257_v39 = vrot.slane %v1249_v27, %v12269_v7  ;;  %v1264_v11 = vrot.slane %v1250_v12, %v12269_v7  ;;  %v661_v18 = vrot.slane %v12013_v28, %v12378_v50  ;;  %v10759_v27 = vld [vmem:[#allocation5 + $0x80] ss:$0 sm:$0xff] }
 0x36e   :  { %v1222_v12 = vcombine.high %v10759_v27, %v10759_v27 }
 0x36f   :  { %v1265_v23 = vcombine.low %v1257_v39, %v1264_v11  ;;  %v711_v47 = vmul.f32 %v661_v18, %v12510_v21  ;;  %v1229_v39 = vrot.slane %v10759_v27, %v12269_v7 }
 0x370   :  { %v607_v20 = vpop.xlane.xlu0 %606  ;;  %v1236_v11 = vrot.slane %v1222_v12, %v12269_v7 }
 0x371   :  { %11216 = vmatmul.mubr.msk.f32.vlgmr.msra.gmra.mrb[0].mxu1 %vm414_vm3, %v1265_v23  ;;  %v613_v25 = vmul.f32 0.015625, %v607_v20  ;;  %v747_v9 = vmul.f32 %v12615_v60, %v711_v47  ;;  %v1237_v23 = vcombine.high %v1229_v39, %v1229_v39  ;;  %v1308_v20 = vcombine.low %v1229_v39, %v1229_v39 }
 0x372   :  { %11218 = vmatprep.mubr.msk.f32.mxu1 %vm12214_vm0, %v12215_v2 }
 0x373   :  { %v617_v46 = vadd.f32 1e-05, %v613_v25  ;;  %v783_v36 = vadd.f32 %v12621_v59, %v747_v9  ;;  %v1309_v25 = vcombine.low %v1237_v23, %v1236_v11 }
 0x374   :  { %v610_v48 = vpop.xlane.xlu0 %609 }
 0x375   :  { %12014 = vrsqrt.f32 %v617_v46  ;;  %v614_v49 = vmul.f32 0.015625, %v610_v48  ;;  %v793_v37 = vmax.f32 %v783_v36, 0.0  ;;  %v1316_v46 = vrot.slane %v1308_v20, %v12269_v7 }
 0x376   :  { %v1323_v28 = vrot.slane %v1309_v25, %v12269_v7  ;;  %v1238_v48 = vcombine.high %v1236_v11, %v1236_v11 }
 0x377   :  { %v618_v10 = vadd.f32 1e-05, %v614_v49 }
 0x378   :  { %v1324_v49 = vcombine.low %v1316_v46, %v1323_v28  ;;  %v1325_v18 = vcombine.low %v1238_v48, %v1229_v39 }
 0x379   :  { %12016 = vrsqrt.f32 %v618_v10 }
 0x37a   :  { %v1332_v9 = vrot.slane %v1325_v18, %v12269_v7 }
 0x37f   :  { %v12015_v58 = vpop.eup %12014 }
 0x380   :  { %v668_v1 = vrot.slane %v12015_v58, %v12378_v50  ;;  %v675_v4 = vrot.slane %v12015_v58, %v12381_v51  ;;  %v682_v3 = vrot.slane %v12015_v58, %v12384_v52  ;;  %v689_v63 = vrot.slane %v12015_v58, %v12387_v53 }
 0x382   :  { %v712_v13 = vmul.f32 %v668_v1, %v12522_v38  ;;  %v713_v8 = vmul.f32 %v675_v4, %v12525_v40  ;;  %v714_v14 = vmul.f32 %v682_v3, %v12528_v41  ;;  %v715_v16 = vmul.f32 %v689_v63, %v12531_v42 }
 0x383   :  { %v12017_v21 = vpop.eup %12016 }
 0x384   :  { %v696_v24 = vrot.slane %v12017_v21, %v12378_v50  ;;  %v748_v26 = vmul.f32 %v12615_v60, %v712_v13  ;;  %v749_v34 = vmul.f32 %v737_v15, %v713_v8  ;;  %v750_v35 = vmul.f32 %v12618_v62, %v714_v14 }
 0x385   :  { %v751_v31 = vmul.f32 %v738_v19, %v715_v16 }
 0x386   :  { %v716_v6 = vmul.f32 %v696_v24, %v12534_v43  ;;  %v784_v38 = vadd.f32 %v12621_v59, %v748_v26  ;;  %v785_v40 = vadd.f32 %v773_v22, %v749_v34  ;;  %v786_v41 = vadd.f32 %v12624_v61, %v750_v35  ;;  %v10763_v26 = vld [vmem:[#allocation5 + $0xc8] ss:$0 sm:$0xff] }
 0x387   :  { %v787_v42 = vadd.f32 %v774_v29, %v751_v31  ;;  %v1291_v31 = vcombine.low %v1229_v39, %v1237_v23 }
 0x388   :  { %v794_v33 = vmax.f32 %v784_v38, 0.0  ;;  %v795_v44 = vmax.f32 %v785_v40, 0.0  ;;  %v796_v30 = vmax.f32 %v786_v41, 0.0  ;;  %v752_v45 = vmul.f32 %v12615_v60, %v716_v6 }
 0x389   :  { %v797_v19 = vmax.f32 %v787_v42, 0.0  ;;  %v1292_v6 = vcombine.low %v1236_v11, %v1238_v48  ;;  %v1472_v38 = vcombine.high %v10763_v26, %v10763_v26  ;;  %v1479_v41 = vrot.slane %v10763_v26, %v12269_v7 }
 0x38a   :  { %v1266_v54 = vcombine.low %v793_v37, %v794_v33  ;;  %v1267_v55 = vcombine.low %v795_v44, %v796_v30  ;;  %v788_v15 = vadd.f32 %v12621_v59, %v752_v45  ;;  %v1299_v37 = vrot.slane %v1291_v31, %v12269_v7 }
 0x38b   :  { %v1306_v42 = vrot.slane %v1292_v6, %v12269_v7  ;;  %v1486_v33 = vrot.slane %v1472_v38, %v12269_v7  ;;  %v1487_v44 = vcombine.high %v1479_v41, %v1479_v41 }
 0x38c   :  { %v1274_v62 = vrot.slane %v1266_v54, %v12269_v7  ;;  %v1281_v43 = vrot.slane %v1267_v55, %v12269_v7  ;;  %v798_v32 = vmax.f32 %v788_v15, 0.0 }
 0x38d   :  { %v1307_v30 = vcombine.low %v1299_v37, %v1306_v42  ;;  %v1488_v45 = vcombine.high %v1486_v33, %v1486_v33  ;;  %v1547_v54 = vcombine.low %v1479_v41, %v1487_v44 }
 0x38e   :  { %v1282_v22 = vcombine.low %v1274_v62, %v1281_v43  ;;  %v1283_v56 = vcombine.low %v797_v19, %v798_v32  ;;  %v1564_v32 = vcombine.low %v1479_v41, %v1479_v41 }
 0x38f   :  { %v1548_v15 = vcombine.low %v1486_v33, %v1488_v45  ;;  %v1555_v62 = vrot.slane %v1547_v54, %v12269_v7  ;;  %v1581_v23 = vcombine.low %v1488_v45, %v1479_v41 }
 0x390   :  { %11219 = vmatmul.mubr.msk.f32.gmra.mrb[2].mxu1 %vm414_vm3, %v1282_v22  ;;  %v1290_v61 = vrot.slane %v1283_v56, %v12269_v7  ;;  %v1565_v22 = vcombine.low %v1487_v44, %v1486_v33 }
 0x391   :  { %11221 = vmatprep.mubr.msk.f32.mxu1 %vm12214_vm0, %v12215_v2  ;;  %v1562_v19 = vrot.slane %v1548_v15, %v12269_v7 }
 0x394   :  { %11222 = vmatmul.mubr.msk.f32.gmra.mrb[4].mxu1 %vm414_vm3, %v1290_v61  ;;  %v1563_v61 = vcombine.low %v1555_v62, %v1562_v19 }
 0x395   :  { %11257 = vmatprep.mubr.msk.f32.mxu1 %vm12214_vm0, %v12215_v2 }
 0x3b2   :  { %v1542_v60 = vpop.permute.xlu1 %1541 }
 0x3b3   :  { %11241 = vmatmul.mubr.msk.f32.vlgmr.msra.gmra.mrb[6].mxu0 %vm414_vm3, %v1542_v60  ;;  %v1572_v60 = vrot.slane %v1564_v32, %v12269_v7 }
 0x3b4   :  { %11243 = vmatprep.mubr.msk.f32.mxu0 %vm12214_vm0, %v12215_v2 }
 0x3b6   :  { %v1544_v59 = vpop.permute.xlu0 %1543  ;;  %v1546_v29 = vpop.permute.xlu1 %1545 }
 0x3b7   :  { %11244 = vmatmul.mubr.msk.f32.gmra.mrb[8].mxu0 %vm414_vm3, %v1544_v59  ;;  %v1579_v59 = vrot.slane %v1565_v22, %v12269_v7 }
 0x3b8   :  { %11246 = vmatprep.mubr.msk.f32.mxu0 %vm12214_vm0, %v12215_v2 }
 0x3b9   :  { %v1580_v39 = vcombine.low %v1572_v60, %v1579_v59 }
 0x3bb   :  { %11247 = vmatmul.mubr.msk.f32.gmra.mrb[10].mxu0 %vm414_vm3, %v1546_v29 }
 0x444   :  { %v1408_v17 = vpop.f32.mrb[0].mxu1 }
 0x445   :  { %v11217_v57 = vpop.f32.mrb[1].mxu1  ;;  %v1409_v55 = vadd.f32 %v1408_v17, %v1307_v30 }
 0x447   :  { %v1425_v43 = vcombine.high %v1409_v55, %v1409_v55  ;;  %v1432_v29 = vrot.slane %v1409_v55, %v12269_v7 }
 0x449   :  { %v1439_v56 = vrot.slane %v1425_v43, %v12269_v7  ;;  %v1440_v11 = vcombine.high %v1432_v29, %v1432_v29 }
 0x44b   :  { %v1441_v27 = vcombine.high %v1439_v56, %v1439_v56 }
 0x44d   :  { %v1733_v28 = vcombine.low %v1439_v56, %v1441_v27 }
 0x463   :  { %v1413_v10 = vpop.f32.mrb[2].mxu1 }
 0x464   :  { %v1414_v47 = vadd.f32 %v1413_v10, %v1324_v49  ;;  %v11220_v58 = vpop.f32.mrb[3].mxu1 }
 0x465   :  { %v1588_v58 = vrot.slane %v1581_v23, %v12269_v7 }
 0x466   :  { %v1442_v1 = vcombine.high %v1414_v47, %v1414_v47  ;;  %v1449_v4 = vrot.slane %v1414_v47, %v12269_v7  ;;  %v1732_v47 = vcombine.low %v1432_v29, %v1440_v11 }
 0x467   :  { %v1418_v3 = vpop.f32.mrb[4].mxu1 }
 0x468   :  { %v1456_v63 = vrot.slane %v1442_v1, %v12269_v7  ;;  %v1457_v13 = vcombine.high %v1449_v4, %v1449_v4  ;;  %v1419_v8 = vadd.f32 %v1418_v3, %v1332_v9  ;;  %v11223_v14 = vpop.f32.mrb[5].mxu1 }
 0x46a   :  { %v1756_v16 = vcombine.low %v1457_v13, %v1456_v63  ;;  %v1458_v21 = vcombine.high %v1456_v63, %v1456_v63  ;;  %v1465_v36 = vrot.slane %v1419_v8, %v12269_v7  ;;  %v1747_v13 = vrot.slane %v1733_v28, %v12269_v7 }
 0x46c   :  { %v1757_v24 = vcombine.low %v1458_v21, %v1465_v36  ;;  %v1764_v34 = vrot.slane %v1756_v16, %v12269_v7 }
 0x46e   :  { %v1771_v35 = vrot.slane %v1757_v24, %v12269_v7  ;;  %v1740_v24 = vrot.slane %v1732_v47, %v12269_v7 }
 0x470   :  { %v12697_v40 = vcombine.low %v1764_v34, %v1771_v35  ;;  %v1748_v38 = vcombine.low %v1740_v24, %v1747_v13 }
 0x486   :  { %v1664_v57 = vpop.f32.mrb[6].mxu0 }
 0x487   :  { %v1665_v17 = vadd.f32 %v1664_v57, %v1563_v61  ;;  %v11242_v12 = vpop.f32.mrb[7].mxu0 }
 0x489   :  { %v1681_v20 = vcombine.high %v1665_v17, %v1665_v17  ;;  %v1688_v25 = vrot.slane %v1665_v17, %v12269_v7 }
 0x48a   :  { %v1669_v46 = vpop.f32.mrb[8].mxu0 }
 0x48b   :  { %v1695_v48 = vrot.slane %v1681_v20, %v12269_v7  ;;  %v1696_v49 = vcombine.high %v1688_v25, %v1688_v25  ;;  %v1670_v18 = vadd.f32 %v1669_v46, %v1580_v39  ;;  %v11245_v10 = vpop.f32.mrb[9].mxu0 }
 0x48c   :  { %v1842_v10 = vld [vmem:[#allocation5 + $0xe0] sm:$0xff] }
 0x48d   :  { %v1697_v9 = vcombine.high %v1695_v48, %v1695_v48  ;;  %v1784_v1 = vcombine.low %v1688_v25, %v1696_v49  ;;  %v1698_v4 = vcombine.high %v1670_v18, %v1670_v18  ;;  %v1705_v3 = vrot.slane %v1670_v18, %v12269_v7  ;;  %v1840_v49 = vld [vmem:[#allocation5 + $0xd0] sm:$0xff]  ;;  %v1841_v18 = vld [vmem:[#allocation5 + $0xd8] sm:$0xff] }
 0x48e   :  { %v1674_v63 = vpop.f32.mrb[10].mxu0  ;;  %v11718_v47 = vpack.c.bf16 %v1841_v18, %v1840_v49 }
 0x48f   :  { %v1785_v8 = vcombine.low %v1695_v48, %v1697_v9  ;;  %v1712_v14 = vrot.slane %v1698_v4, %v12269_v7  ;;  %v1713_v16 = vcombine.high %v1705_v3, %v1705_v3  ;;  %v11248_v21 = vpop.f32.mrb[11].mxu0  ;;  %v1675_v36 = vadd.f32 %v1674_v63, %v1588_v58  ;;  %v1843_v58 = vld [vmem:[#allocation5 + $0xe8] sm:$0xff] }
 0x490   :  { %v1792_v26 = vrot.slane %v1784_v1, %v12269_v7  ;;  %v12735_v62 = vrot.slane %v1705_v3, %v12269_v7  ;;  %11719 = vmatpush3.bf16.msra.mxu1 %v11718_v47  ;;  %v11721_v9 = vpack.c.bf16 %v1843_v58, %v1842_v10 }
 0x491   :  { %v1799_v34 = vrot.slane %v1785_v8, %v12269_v7  ;;  %v1714_v35 = vcombine.high %v1712_v14, %v1712_v14  ;;  %v1808_v31 = vcombine.low %v1713_v16, %v1712_v14  ;;  %v1721_v6 = vrot.slane %v1675_v36, %v12269_v7  ;;  %11720 = vmatprep.subr.bf16.mxu1 %v12213_v0 }
 0x492   :  { %v1871_v19 = vsel %vm1870_vm7, %v12735_v62, 0.0 }
 0x493   :  { %v1800_v41 = vcombine.low %v1792_v26, %v1799_v34  ;;  %v1722_v37 = vcombine.high %v1721_v6, %v1721_v6  ;;  %v1809_v42 = vcombine.low %v1714_v35, %v1721_v6  ;;  %v1816_v44 = vrot.slane %v1808_v31, %v12269_v7  ;;  %v10767_v35 = vld [vmem:[#allocation5 + $0x120] ss:$0 sm:$0xff]  ;;  %v10768_v6 = vld [vmem:[#allocation5 + $0x128] ss:$0 sm:$0xff] }
 0x494   :  { %11722 = vmatpush3.bf16.msra.mxu1 %v11721_v9 }
 0x495   :  { %v12720_v33 = vsel %vm1726_vm5, %v1748_v38, %v1800_v41  ;;  %v1823_v30 = vrot.slane %v1809_v42, %v12269_v7  ;;  %v12727_v54 = vrot.slane %v1722_v37, %v12269_v7 }
 0x496   :  { %v1867_v45 = vsel %vm1866_vm6, %v12720_v33, 0.0 }
 0x497   :  { %1868 = vadd.xlane.f32.xlu1 %v1867_v45  ;;  %v1824_v55 = vcombine.low %v1816_v44, %v1823_v30  ;;  %v1877_v15 = vsel %vm1870_vm7, %v12727_v54, 0.0 }
 0x499   :  { %v12730_v5 = vsel %vm1726_vm5, %v12697_v40, %v1824_v55 }
 0x49a   :  { %v1874_v43 = vsel %vm1866_vm6, %v12730_v5, 0.0 }
 0x49b   :  { %1878 = vadd.xlane.f32.xlu1 %v1877_v15  ;;  %1875 = vadd.xlane.f32.xlu0 %v1874_v43 }
 0x49f   :  { %1872 = vadd.xlane.f32.xlu0 %v1871_v19 }
 0x524   :  { %v1869_v32 = vpop.xlane.xlu1 %1868 }
 0x525   :  { %v1881_v22 = vmul.f32 0.03125, %v1869_v32 }
 0x527   :  { %v1885_v40 = vsub.f32 %v12720_v33, %v1881_v22 }
 0x528   :  { %v1879_v56 = vpop.xlane.xlu1 %1878  ;;  %v1876_v61 = vpop.xlane.xlu0 %1875 }
 0x529   :  { %v1884_v60 = vmul.f32 0.03125, %v1879_v56  ;;  %v1889_v59 = vmul.f32 %v1885_v40, %v1885_v40  ;;  %v1883_v29 = vmul.f32 0.03125, %v1876_v61 }
 0x52b   :  { %v1893_v57 = vsel %vm1866_vm6, %v1889_v59, 0.0  ;;  %v1887_v27 = vsub.f32 %v12730_v5, %v1883_v29  ;;  %v1888_v17 = vsub.f32 %v12727_v54, %v1884_v60 }
 0x52c   :  { %1894 = vadd.xlane.f32.xlu0 %v1893_v57  ;;  %v1873_v12 = vpop.xlane.xlu0 %1872 }
 0x52d   :  { %v1882_v39 = vmul.f32 0.03125, %v1873_v12  ;;  %v1891_v11 = vmul.f32 %v1887_v27, %v1887_v27  ;;  %v1892_v25 = vmul.f32 %v1888_v17, %v1888_v17 }
 0x52f   :  { %v1886_v23 = vsub.f32 %v12735_v62, %v1882_v39  ;;  %v1899_v20 = vsel %vm1866_vm6, %v1891_v11, 0.0  ;;  %v1902_v48 = vsel %vm1870_vm7, %v1892_v25, 0.0 }
 0x530   :  { %1900 = vadd.xlane.f32.xlu1 %v1899_v20 }
 0x531   :  { %v1890_v46 = vmul.f32 %v1886_v23, %v1886_v23 }
 0x533   :  { %v1896_v28 = vsel %vm1870_vm7, %v1890_v46, 0.0 }
 0x534   :  { %1897 = vadd.xlane.f32.xlu0 %v1896_v28  ;;  %1903 = vadd.xlane.f32.xlu1 %v1902_v48 }
 0x5b9   :  { %v1895_v1 = vpop.xlane.xlu0 %1894 }
 0x5ba   :  { %v1905_v4 = vmul.f32 0.03125, %v1895_v1 }
 0x5bc   :  { %v1909_v3 = vadd.f32 1e-05, %v1905_v4  ;;  %v10769_v4 = vld [vmem:[#allocation5 + $0xf0] ss:$0 sm:$0xff] }
 0x5bd   :  { %v1901_v63 = vpop.xlane.xlu1 %1900 }
 0x5be   :  { %12018 = vrsqrt.f32 %v1909_v3  ;;  %v1907_v13 = vmul.f32 0.03125, %v1901_v63  ;;  %v1994_v3 = vcombine.high %v10769_v4, %v10769_v4  ;;  %v2001_v63 = vrot.slane %v10769_v4, %v12269_v7 }
 0x5c0   :  { %v1911_v8 = vadd.f32 1e-05, %v1907_v13  ;;  %v2008_v13 = vrot.slane %v1994_v3, %v12269_v7 }
 0x5c1   :  { %v1898_v14 = vpop.xlane.xlu0 %1897  ;;  %v1904_v16 = vpop.xlane.xlu1 %1903 }
 0x5c2   :  { %12020 = vrsqrt.f32 %v1911_v8  ;;  %v1906_v21 = vmul.f32 0.03125, %v1898_v14  ;;  %v1908_v36 = vmul.f32 0.03125, %v1904_v16  ;;  %v2009_v8 = vcombine.high %v2001_v63, %v2001_v63 }
 0x5c3   :  { %v2010_v14 = vcombine.high %v2008_v13, %v2008_v13 }
 0x5c4   :  { %v1910_v24 = vadd.f32 1e-05, %v1906_v21  ;;  %v1912_v26 = vadd.f32 1e-05, %v1908_v36  ;;  %v2053_v16 = vcombine.low %v2001_v63, %v2009_v8 }
 0x5c5   :  { %v2054_v21 = vcombine.low %v2008_v13, %v2010_v14 }
 0x5c6   :  { %12022 = vrsqrt.f32 %v1910_v24  ;;  %v2061_v36 = vrot.slane %v2053_v16, %v12269_v7 }
 0x5c7   :  { %12024 = vrsqrt.f32 %v1912_v26  ;;  %v2068_v24 = vrot.slane %v2054_v21, %v12269_v7  ;;  %v2070_v26 = vcombine.low %v2001_v63, %v2001_v63 }
 0x5c8   :  { %v12019_v34 = vpop.eup %12018 }
 0x5c9   :  { %v1917_v31 = vmul.f32 %v12019_v34, %v1885_v40  ;;  %v2071_v34 = vcombine.low %v2009_v8, %v2008_v13 }
 0x5cb   :  { %v1925_v38 = vmul.f32 %v10767_v35, %v1917_v31  ;;  %v2078_v31 = vrot.slane %v2070_v26, %v12269_v7 }
 0x5cc   :  { %v12021_v41 = vpop.eup %12020 }
 0x5cd   :  { %v1933_v37 = vadd.f32 %v10768_v6, %v1925_v38  ;;  %v1919_v42 = vmul.f32 %v12021_v41, %v1887_v27 }
 0x5cf   :  { %v1945_v44 = vcombine.high %v1933_v37, %v1933_v37  ;;  %v1952_v30 = vrot.slane %v1933_v37, %v12269_v7  ;;  %v1927_v45 = vmul.f32 %v10767_v35, %v1919_v42 }
 0x5d0   :  { %v12023_v55 = vpop.eup %12022 }
 0x5d1   :  { %v1959_v15 = vrot.slane %v1945_v44, %v12269_v7  ;;  %v1960_v43 = vcombine.high %v1952_v30, %v1952_v30  ;;  %v12025_v19 = vpop.eup %12024  ;;  %v1918_v32 = vmul.f32 %v12023_v55, %v1886_v23  ;;  %v1935_v22 = vadd.f32 %v10768_v6, %v1927_v45 }
 0x5d2   :  { %v1920_v56 = vmul.f32 %v12025_v19, %v1888_v17  ;;  %v2087_v44 = vcombine.low %v2010_v14, %v2001_v63 }
 0x5d3   :  { %v1961_v61 = vcombine.high %v1959_v15, %v1959_v15  ;;  %v2011_v60 = vcombine.low %v1952_v30, %v1960_v43  ;;  %v1926_v40 = vmul.f32 %v10767_v35, %v1918_v32  ;;  %v1969_v59 = vcombine.high %v1935_v22, %v1935_v22 }
 0x5d4   :  { %v1976_v29 = vrot.slane %v1935_v22, %v12269_v7  ;;  %v1928_v27 = vmul.f32 %v10767_v35, %v1920_v56  ;;  %v2069_v35 = vcombine.low %v2061_v36, %v2068_v24  ;;  %v2094_v22 = vrot.slane %v2087_v44, %v12269_v7 }
 0x5d5   :  { %v2012_v57 = vcombine.low %v1959_v15, %v1961_v61  ;;  %v1934_v12 = vadd.f32 %v10768_v6, %v1926_v40  ;;  %v1983_v39 = vrot.slane %v1969_v59, %v12269_v7  ;;  %v2019_v20 = vrot.slane %v2011_v60, %v12269_v7 }
 0x5d6   :  { %v1984_v11 = vcombine.high %v1976_v29, %v1976_v29  ;;  %v1936_v46 = vadd.f32 %v10768_v6, %v1928_v27  ;;  %v2085_v6 = vrot.slane %v2071_v34, %v12269_v7 }
 0x5d7   :  { %v2026_v25 = vrot.slane %v2012_v57, %v12269_v7  ;;  %v1968_v23 = vrot.slane %v1934_v12, %v12269_v7  ;;  %v1985_v49 = vcombine.high %v1983_v39, %v1983_v39 }
 0x5d8   :  { %v2029_v17 = vcombine.low %v1984_v11, %v1983_v39  ;;  %v1992_v18 = vrot.slane %v1936_v46, %v12269_v7  ;;  %v2086_v42 = vcombine.low %v2078_v31, %v2085_v6 }
 0x5d9   :  { %v2027_v28 = vcombine.low %v2019_v20, %v2026_v25  ;;  %v2028_v48 = vcombine.low %v1968_v23, %v1976_v29 }
 0x5da   :  { %v2043_v47 = vrot.slane %v2029_v17, %v12269_v7  ;;  %v2045_v9 = vcombine.low %v1985_v49, %v1992_v18 }
 0x5db   :  { %11258 = vmatmul.mubr.msk.f32.vlgmr.msra.gmra.mrb[6].mxu1 %vm1866_vm6, %v2027_v28  ;;  %v2036_v10 = vrot.slane %v2028_v48, %v12269_v7 }
 0x5dc   :  { %11260 = vmatprep.mubr.msk.f32.mxu1 %vm12214_vm0, %v12215_v2  ;;  %v2052_v1 = vrot.slane %v2045_v9, %v12269_v7 }
 0x5dd   :  { %v2044_v58 = vcombine.low %v2036_v10, %v2043_v47 }
 0x5df   :  { %11261 = vmatmul.mubr.msk.f32.gmra.mrb[8].mxu1 %vm1866_vm6, %v2044_v58 }
 0x5e0   :  { %11263 = vmatprep.mubr.msk.f32.mxu1 %vm12214_vm0, %v12215_v2 }
 0x5e3   :  { %11264 = vmatmul.mubr.msk.f32.gmra.mrb[10].mxu1 %vm1866_vm6, %v2052_v1 }
 0x6ae   :  { %v2170_v38 = vpop.f32.mrb[6].mxu1 }
 0x6af   :  { %v2171_v41 = vadd.f32 %v2170_v38, %v2069_v35  ;;  %v11259_v37 = vpop.f32.mrb[7].mxu1 }
 0x6b1   :  { %v2187_v30 = vcombine.high %v2171_v41, %v2171_v41  ;;  %v2194_v45 = vrot.slane %v2171_v41, %v12269_v7 }
 0x6b2   :  { %v2175_v43 = vpop.f32.mrb[8].mxu1 }
 0x6b3   :  { %v2201_v55 = vrot.slane %v2187_v30, %v12269_v7  ;;  %v2202_v15 = vcombine.high %v2194_v45, %v2194_v45  ;;  %v2176_v19 = vadd.f32 %v2175_v43, %v2086_v42  ;;  %v11262_v32 = vpop.f32.mrb[9].mxu1 }
 0x6b5   :  { %v2203_v56 = vcombine.high %v2201_v55, %v2201_v55  ;;  %v2229_v61 = vcombine.low %v2194_v45, %v2202_v15  ;;  %v2204_v60 = vcombine.high %v2176_v19, %v2176_v19  ;;  %v2211_v40 = vrot.slane %v2176_v19, %v12269_v7 }
 0x6b6   :  { %v2180_v29 = vpop.f32.mrb[10].mxu1 }
 0x6b7   :  { %v2230_v59 = vcombine.low %v2201_v55, %v2203_v56  ;;  %v2218_v57 = vrot.slane %v2204_v60, %v12269_v7  ;;  %v2219_v27 = vcombine.high %v2211_v40, %v2211_v40  ;;  %v12780_v12 = vrot.slane %v2211_v40, %v12269_v7  ;;  %v11265_v11 = vpop.f32.mrb[11].mxu1 }
 0x6b8   :  { %v2181_v39 = vadd.f32 %v2180_v29, %v2094_v22  ;;  %v2237_v20 = vrot.slane %v2229_v61, %v12269_v7 }
 0x6b9   :  { %v2244_v25 = vrot.slane %v2230_v59, %v12269_v7  ;;  %v2253_v46 = vcombine.low %v2219_v27, %v2218_v57  ;;  %v2220_v23 = vcombine.high %v2218_v57, %v2218_v57  ;;  %2338 = vrot.lane.b32.xlu0 %v12780_v12, %s12222_s30  ;;  %2289 = vrot.lane.b32.xlu1 %v12780_v12, %s12223_s3 }
 0x6ba   :  { %v2227_v17 = vrot.slane %v2181_v39, %v12269_v7  ;;  %2284 = vst.msk [vmem:[#allocation2 + $0x8] sm:$0x3] %vm2283_vm8, %v12780_v12 }
 0x6bb   :  { %v12791_v28 = vcombine.low %v2237_v20, %v2244_v25  ;;  %v2261_v18 = vrot.slane %v2253_v46, %v12269_v7 }
 0x6bc   :  { %v2228_v48 = vcombine.high %v2227_v17, %v2227_v17  ;;  %v2254_v49 = vcombine.low %v2220_v23, %v2227_v17 }
 0x6bd   :  { %2282 = vst.msk [vmem:[#allocation2] sm:$0xff] %vm2281_vm9, %v12791_v28  ;;  %2389 = vrot.lane.b32.xlu0 %v12780_v12, %s12224_s4  ;;  %2336 = vrot.lane.b32.xlu1 %v12791_v28, %s12222_s30 }
 0x6be   :  { %v2268_v10 = vrot.slane %v2254_v49, %v12269_v7  ;;  %v12798_v47 = vrot.slane %v2228_v48, %v12269_v7 }
 0x6c0   :  { %v12804_v58 = vcombine.low %v2261_v18, %v2268_v10  ;;  %2286 = vst.msk [vmem:[#allocation2 + $0x18] sm:$0x3] %vm2283_vm8, %v12798_v47 }
 0x6c1   :  { %2287 = vrot.lane.b32.xlu0 %v12791_v28, %s12223_s3  ;;  %2387 = vrot.lane.b32.xlu1 %v12791_v28, %s12224_s4  ;;  %v2473_v43 = vld [vmem:[#allocation2 + $0x8] sm:$0x3] }
 0x6c2   :  { %2285 = vst.msk [vmem:[#allocation2 + $0x10] sm:$0xff] %vm2281_vm9, %v12804_v58 }
 0x6c4   :  { %v2472_v9 = vld [vmem:[#allocation2] sm:$0xff] }
 0x6c5   :  { %11270 = vmatprep.mubr.msk.f32.mxu0 %vm2281_vm9, %v2472_v9  ;;  %2321 = vrot.lane.b32.xlu0 %v12780_v12, %s12225_s5 }
 0x6c6   :  { %2319 = vrot.lane.b32.xlu1 %v12791_v28, %s12225_s5 }
 0x6c7   :  { %v2475_v11 = vld [vmem:[#allocation2 + $0x18] sm:$0x3] }
 0x6c9   :  { %v2474_v1 = vld [vmem:[#allocation2 + $0x10] sm:$0xff]  ;;  %2293 = vrot.lane.b32.xlu0 %v12798_v47, %s12223_s3 }
 0x6ca   :  { %2291 = vrot.lane.b32.xlu1 %v12804_v58, %s12223_s3  ;;  %11277 = vmatprep.mubr.msk.f32.mxu1 %vm2281_vm9, %v2474_v1 }
 0x6cd   :  { %2342 = vrot.lane.b32.xlu0 %v12798_v47, %s12222_s30 }
 0x6ce   :  { %2370 = vrot.lane.b32.xlu1 %v12791_v28, %s12226_s6 }
 0x6d1   :  { %2393 = vrot.lane.b32.xlu0 %v12798_v47, %s12224_s4 }
 0x6d2   :  { %2340 = vrot.lane.b32.xlu1 %v12804_v58, %s12222_s30 }
 0x6d5   :  { %2325 = vrot.lane.b32.xlu0 %v12798_v47, %s12225_s5 }
 0x6d6   :  { %2391 = vrot.lane.b32.xlu1 %v12804_v58, %s12224_s4 }
 0x6d9   :  { %2372 = vrot.lane.b32.xlu0 %v12780_v12, %s12226_s6 }
 0x6da   :  { %2323 = vrot.lane.b32.xlu1 %v12804_v58, %s12225_s5 }
 0x6dd   :  { %2440 = vrot.lane.b32.xlu0 %v12780_v12, %s12227_s7 }
 0x6de   :  { %2438 = vrot.lane.b32.xlu1 %v12791_v28, %s12227_s7 }
 0x6e1   :  { %2376 = vrot.lane.b32.xlu0 %v12798_v47, %s12226_s6 }
 0x6e2   :  { %2374 = vrot.lane.b32.xlu1 %v12804_v58, %s12226_s6 }
 0x6e5   :  { %2423 = vrot.lane.b32.xlu0 %v12780_v12, %s12228_s8 }
 0x6e6   :  { %2421 = vrot.lane.b32.xlu1 %v12791_v28, %s12228_s8 }
 0x6e9   :  { %2444 = vrot.lane.b32.xlu0 %v12798_v47, %s12227_s7 }
 0x6ea   :  { %2442 = vrot.lane.b32.xlu1 %v12804_v58, %s12227_s7 }
 0x6ed   :  { %2427 = vrot.lane.b32.xlu0 %v12798_v47, %s12228_s8 }
 0x6ee   :  { %2425 = vrot.lane.b32.xlu1 %v12804_v58, %s12228_s8 }
 0x6f1   :  { %2303 = vrot.lane.b32.xlu0 %v12791_v28, %s12217_s0 }
 0x6f2   :  { %2305 = vrot.lane.b32.xlu1 %v12780_v12, %s12217_s0 }
 0x6f5   :  { %2355 = vrot.lane.b32.xlu0 %v12780_v12, %s12229_s9 }
 0x6f6   :  { %2353 = vrot.lane.b32.xlu1 %v12791_v28, %s12229_s9 }
 0x6f9   :  { %2309 = vrot.lane.b32.xlu0 %v12798_v47, %s12217_s0 }
 0x6fa   :  { %2404 = vrot.lane.b32.xlu1 %v12791_v28, %s12230_s10 }
 0x6fd   :  { %2406 = vrot.lane.b32.xlu0 %v12780_v12, %s12230_s10 }
 0x6fe   :  { %2307 = vrot.lane.b32.xlu1 %v12804_v58, %s12217_s0 }
 0x701   :  { %2359 = vrot.lane.b32.xlu0 %v12798_v47, %s12229_s9 }
 0x702   :  { %2357 = vrot.lane.b32.xlu1 %v12804_v58, %s12229_s9 }
 0x72b   :  { %v2339_v4 = vpop.permute.xlu0 %2338  ;;  %v2290_v3 = vpop.permute.xlu1 %2289 }
 0x72c   :  { %2350 = vst.msk [vmem:[#allocation3 + $0x28] sm:$0x3] %vm2283_vm8, %v2339_v4  ;;  %2300 = vst.msk [vmem:[#allocation3 + $0x8] sm:$0x3] %vm2283_vm8, %v2290_v3 }
 0x72f   :  { %v2390_v63 = vpop.permute.xlu0 %2389  ;;  %v2337_v13 = vpop.permute.xlu1 %2336 }
 0x730   :  { %2401 = vst.msk [vmem:[#allocation3 + $0x48] sm:$0x3] %vm2283_vm8, %v2390_v63 }
 0x731   :  { %2349 = vst.msk [vmem:[#allocation3 + $0x20] sm:$0xff] %vm2281_vm9, %v2337_v13 }
 0x733   :  { %v2288_v8 = vpop.permute.xlu0 %2287  ;;  %v2388_v14 = vpop.permute.xlu1 %2387  ;;  %v2489_v34 = vld [vmem:[#allocation3 + $0x8] sm:$0x3] }
 0x734   :  { %2299 = vst.msk [vmem:[#allocation3] sm:$0xff] %vm2281_vm9, %v2288_v8  ;;  %2400 = vst.msk [vmem:[#allocation3 + $0x40] sm:$0xff] %vm2281_vm9, %v2388_v14  ;;  %v2493_v38 = vld [vmem:[#allocation3 + $0x28] sm:$0x3] }
 0x737   :  { %v2322_v16 = vpop.permute.xlu0 %2321  ;;  %v2497_v32 = vld [vmem:[#allocation3 + $0x48] sm:$0x3] }
 0x738   :  { %v2320_v21 = vpop.permute.xlu1 %2319  ;;  %2333 = vst.msk [vmem:[#allocation2 + $0x28] sm:$0x3] %vm2283_vm8, %v2322_v16  ;;  %v2492_v35 = vld [vmem:[#allocation3 + $0x20] sm:$0xff] }
 0x739   :  { %2332 = vst.msk [vmem:[#allocation2 + $0x20] sm:$0xff] %vm2281_vm9, %v2320_v21  ;;  %v11735_v41 = vpack.c.bf16 %v2493_v38, %v2492_v35 }
 0x73b   :  { %v2488_v26 = vld [vmem:[#allocation3] sm:$0xff]  ;;  %v2294_v31 = vpop.permute.xlu0 %2293 }
 0x73c   :  { %v2292_v24 = vpop.permute.xlu1 %2291  ;;  %v11723_v6 = vpack.c.bf16 %v2489_v34, %v2488_v26  ;;  %2302 = vst.msk [vmem:[#allocation3 + $0x18] sm:$0x3] %vm2283_vm8, %v2294_v31  ;;  %v2496_v15 = vld [vmem:[#allocation3 + $0x40] sm:$0xff] }
 0x73d   :  { %2301 = vst.msk [vmem:[#allocation3 + $0x10] sm:$0xff] %vm2281_vm9, %v2292_v24  ;;  %v11747_v61 = vpack.c.bf16 %v2497_v32, %v2496_v15 }
 0x73e   :  { %11725 = vmatprep.subr.msk.bf16.mxu0 %vm12890_vm10, %v11723_v6 }
 0x73f   :  { %11728 = vmatpush3.bf16.xpose.msk.msra.mxu0 %vm12890_vm10, %v11723_v6  ;;  %v2343_v42 = vpop.permute.xlu0 %2342  ;;  %v2477_v39 = vld [vmem:[#allocation2 + $0x28] sm:$0x3] }
 0x740   :  { %v2371_v37 = vpop.permute.xlu1 %2370  ;;  %11737 = vmatprep.subr.msk.bf16.mxu0 %vm12890_vm10, %v11735_v41  ;;  %2352 = vst.msk [vmem:[#allocation3 + $0x38] sm:$0x3] %vm2283_vm8, %v2343_v42  ;;  %v2476_v22 = vld [vmem:[#allocation2 + $0x20] sm:$0xff] }
 0x741   :  { %2383 = vst.msk [vmem:[#allocation2 + $0x40] sm:$0xff] %vm2281_vm9, %v2371_v37 }
 0x743   :  { %v2394_v45 = vpop.permute.xlu0 %2393  ;;  %v2491_v55 = vld [vmem:[#allocation3 + $0x18] sm:$0x3] }
 0x744   :  { %v2341_v44 = vpop.permute.xlu1 %2340  ;;  %v2490_v30 = vld [vmem:[#allocation3 + $0x10] sm:$0xff]  ;;  %2403 = vst.msk [vmem:[#allocation3 + $0x58] sm:$0x3] %vm2283_vm8, %v2394_v45 }
 0x745   :  { %2351 = vst.msk [vmem:[#allocation3 + $0x30] sm:$0xff] %vm2281_vm9, %v2341_v44  ;;  %v11729_v19 = vpack.c.bf16 %v2491_v55, %v2490_v30 }
 0x746   :  { %11271 = vmatmul.mubr.msk.f32.vlgmr.msra.gmra.mrb[12].mxu0 %vm2281_vm9, %v2473_v43  ;;  %v6024_v43 = vld [vmem:[#allocation5 + $0x1d0] sm:$0xff] }
 0x747   :  { %11731 = vmatprep.subr.msk.bf16.mxu1 %vm12890_vm10, %v11729_v19  ;;  %11740 = vmatpush3.bf16.xpose.msk.msra.mxu0 %vm12890_vm10, %v11735_v41  ;;  %v2326_v60 = vpop.permute.xlu0 %2325  ;;  %v2495_v29 = vld [vmem:[#allocation3 + $0x38] sm:$0x3] }
 0x748   :  { %v2392_v56 = vpop.permute.xlu1 %2391  ;;  %11734 = vmatpush3.bf16.xpose.msk.msra.mxu1 %vm12890_vm10, %v11729_v19  ;;  %11284 = vmatprep.mubr.msk.f32.mxu0 %vm2281_vm9, %v2476_v22  ;;  %2335 = vst.msk [vmem:[#allocation2 + $0x38] sm:$0x3] %vm2283_vm8, %v2326_v60  ;;  %v2480_v20 = vld [vmem:[#allocation2 + $0x40] sm:$0xff] }
 0x749   :  { %2402 = vst.msk [vmem:[#allocation3 + $0x50] sm:$0xff] %vm2281_vm9, %v2392_v56  ;;  %11749 = vmatprep.subr.msk.bf16.mxu0 %vm12890_vm10, %v11747_v61 }
 0x74b   :  { %v2373_v57 = vpop.permute.xlu0 %2372  ;;  %v2499_v23 = vld [vmem:[#allocation3 + $0x58] sm:$0x3] }
 0x74c   :  { %v2324_v40 = vpop.permute.xlu1 %2323  ;;  %v2494_v59 = vld [vmem:[#allocation3 + $0x30] sm:$0xff]  ;;  %2384 = vst.msk [vmem:[#allocation2 + $0x48] sm:$0x3] %vm2283_vm8, %v2373_v57 }
 0x74d   :  { %2334 = vst.msk [vmem:[#allocation2 + $0x30] sm:$0xff] %vm2281_vm9, %v2324_v40  ;;  %v11741_v27 = vpack.c.bf16 %v2495_v29, %v2494_v59 }
 0x74e   :  { %11285 = vmatmul.mubr.msk.f32.vlgmr.msra.gmra.mrb[14].mxu0 %vm2281_vm9, %v2477_v39 }
 0x74f   :  { %11743 = vmatprep.subr.msk.bf16.mxu1 %vm12890_vm10, %v11741_v27  ;;  %11278 = vmatmul.mubr.msk.f32.vlgmr.msra.gmra.mrb[12].mxu1 %vm2281_vm9, %v2475_v11  ;;  %v2441_v17 = vpop.permute.xlu0 %2440  ;;  %v2479_v1 = vld [vmem:[#allocation2 + $0x38] sm:$0x3] }
 0x750   :  { %11752 = vmatpush3.bf16.xpose.msk.msra.mxu0 %vm12890_vm10, %v11747_v61  ;;  %v2439_v25 = vpop.permute.xlu1 %2438  ;;  %v2498_v46 = vld [vmem:[#allocation3 + $0x50] sm:$0xff]  ;;  %11746 = vmatpush3.bf16.xpose.msk.msra.mxu1 %vm12890_vm10, %v11741_v27  ;;  %2452 = vst.msk [vmem:[#allocation3 + $0x68] sm:$0x3] %vm2283_vm8, %v2441_v17 }
 0x751   :  { %11298 = vmatprep.mubr.msk.f32.mxu0 %vm2281_vm9, %v2480_v20  ;;  %2451 = vst.msk [vmem:[#allocation3 + $0x60] sm:$0xff] %vm2281_vm9, %v2439_v25  ;;  %v11753_v48 = vpack.c.bf16 %v2499_v23, %v2498_v46 }
 0x753   :  { %11755 = vmatprep.subr.msk.bf16.mxu1 %vm12890_vm10, %v11753_v48  ;;  %v2377_v10 = vpop.permute.xlu0 %2376  ;;  %v2481_v9 = vld [vmem:[#allocation2 + $0x48] sm:$0x3] }
 0x754   :  { %v2375_v49 = vpop.permute.xlu1 %2374  ;;  %v2478_v18 = vld [vmem:[#allocation2 + $0x30] sm:$0xff]  ;;  %2386 = vst.msk [vmem:[#allocation2 + $0x58] sm:$0x3] %vm2283_vm8, %v2377_v10 }
 0x755   :  { %2385 = vst.msk [vmem:[#allocation2 + $0x50] sm:$0xff] %vm2281_vm9, %v2375_v49  ;;  %11291 = vmatprep.mubr.msk.f32.mxu1 %vm2281_vm9, %v2478_v18 }
 0x757   :  { %11299 = vmatmul.mubr.msk.f32.vlgmr.msra.gmra.mrb[16].mxu0 %vm2281_vm9, %v2481_v9  ;;  %11292 = vmatmul.mubr.msk.f32.vlgmr.msra.gmra.mrb[14].mxu1 %vm2281_vm9, %v2479_v1  ;;  %v2424_v63 = vpop.permute.xlu0 %2423  ;;  %v2501_v13 = vld [vmem:[#allocation3 + $0x68] sm:$0x3] }
 0x758   :  { %v2422_v4 = vpop.permute.xlu1 %2421  ;;  %v2500_v3 = vld [vmem:[#allocation3 + $0x60] sm:$0xff]  ;;  %11758 = vmatpush3.bf16.xpose.msk.msra.mxu1 %vm12890_vm10, %v11753_v48  ;;  %2435 = vst.msk [vmem:[#allocation2 + $0x68] sm:$0x3] %vm2283_vm8, %v2424_v63 }
 0x759   :  { %2434 = vst.msk [vmem:[#allocation2 + $0x60] sm:$0xff] %vm2281_vm9, %v2422_v4  ;;  %v11759_v8 = vpack.c.bf16 %v2501_v13, %v2500_v3 }
 0x75b   :  { %11761 = vmatprep.subr.msk.bf16.mxu0 %vm12890_vm10, %v11759_v8  ;;  %v2445_v21 = vpop.permute.xlu0 %2444  ;;  %v2483_v24 = vld [vmem:[#allocation2 + $0x58] sm:$0x3] }
 0x75c   :  { %v2443_v14 = vpop.permute.xlu1 %2442  ;;  %v2482_v16 = vld [vmem:[#allocation2 + $0x50] sm:$0xff]  ;;  %11764 = vmatpush3.bf16.xpose.msk.msra.mxu0 %vm12890_vm10, %v11759_v8  ;;  %2454 = vst.msk [vmem:[#allocation3 + $0x78] sm:$0x3] %vm2283_vm8, %v2445_v21 }
 0x75d   :  { %2453 = vst.msk [vmem:[#allocation3 + $0x70] sm:$0xff] %vm2281_vm9, %v2443_v14  ;;  %11305 = vmatprep.mubr.msk.f32.mxu1 %vm2281_vm9, %v2482_v16 }
 0x75f   :  { %11306 = vmatmul.mubr.msk.f32.vlgmr.msra.gmra.mrb[16].mxu1 %vm2281_vm9, %v2483_v24  ;;  %v2428_v35 = vpop.permute.xlu0 %2427  ;;  %v2485_v31 = vld [vmem:[#allocation2 + $0x68] sm:$0x3] }
 0x760   :  { %v2426_v26 = vpop.permute.xlu1 %2425  ;;  %v2484_v34 = vld [vmem:[#allocation2 + $0x60] sm:$0xff]  ;;  %2437 = vst.msk [vmem:[#allocation2 + $0x78] sm:$0x3] %vm2283_vm8, %v2428_v35 }
 0x761   :  { %2436 = vst.msk [vmem:[#allocation2 + $0x70] sm:$0xff] %vm2281_vm9, %v2426_v26  ;;  %11312 = vmatprep.mubr.msk.f32.mxu0 %vm2281_vm9, %v2484_v34 }
 0x763   :  { %11313 = vmatmul.mubr.msk.f32.vlgmr.msra.gmra.mrb[18].mxu0 %vm2281_vm9, %v2485_v31  ;;  %v2304_v41 = vpop.permute.xlu0 %2303  ;;  %v2503_v37 = vld [vmem:[#allocation3 + $0x78] sm:$0x3] }
 0x764   :  { %v2306_v6 = vpop.permute.xlu1 %2305  ;;  %v2502_v38 = vld [vmem:[#allocation3 + $0x70] sm:$0xff]  ;;  %2315 = vst.msk [vmem:[#allocation4] sm:$0xff] %vm2281_vm9, %v2304_v41 }
 0x765   :  { %2316 = vst.msk [vmem:[#allocation4 + $0x8] sm:$0x3] %vm2283_vm8, %v2306_v6  ;;  %v11765_v42 = vpack.c.bf16 %v2503_v37, %v2502_v38 }
 0x767   :  { %11767 = vmatprep.subr.msk.bf16.mxu1 %vm12890_vm10, %v11765_v42  ;;  %v2356_v45 = vpop.permute.xlu0 %2355  ;;  %v2487_v56 = vld [vmem:[#allocation2 + $0x78] sm:$0x3] }
 0x768   :  { %v2354_v44 = vpop.permute.xlu1 %2353  ;;  %v2486_v30 = vld [vmem:[#allocation2 + $0x70] sm:$0xff]  ;;  %11770 = vmatpush3.bf16.xpose.msk.msra.mxu1 %vm12890_vm10, %v11765_v42  ;;  %2367 = vst.msk [vmem:[#allocation4 + $0x28] sm:$0x3] %vm2283_vm8, %v2356_v45 }
 0x769   :  { %2366 = vst.msk [vmem:[#allocation4 + $0x20] sm:$0xff] %vm2281_vm9, %v2354_v44  ;;  %11319 = vmatprep.mubr.msk.f32.mxu1 %vm2281_vm9, %v2486_v30 }
 0x76b   :  { %v2310_v19 = vpop.permute.xlu0 %2309  ;;  %v2504_v32 = vld [vmem:[#allocation4] sm:$0xff] }
 0x76c   :  { %v2405_v55 = vpop.permute.xlu1 %2404  ;;  %v2505_v15 = vld [vmem:[#allocation4 + $0x8] sm:$0x3]  ;;  %2318 = vst.msk [vmem:[#allocation4 + $0x18] sm:$0x3] %vm2283_vm8, %v2310_v19 }
 0x76d   :  { %2417 = vst.msk [vmem:[#allocation4 + $0x40] sm:$0xff] %vm2281_vm9, %v2405_v55  ;;  %v11771_v22 = vpack.c.bf16 %v2505_v15, %v2504_v32 }
 0x76f   :  { %11320 = vmatmul.mubr.msk.f32.vlgmr.msra.gmra.mrb[18].mxu1 %vm2281_vm9, %v2487_v56  ;;  %11773 = vmatprep.subr.msk.bf16.mxu0 %vm12964_vm12, %v11771_v22  ;;  %v2407_v40 = vpop.permute.xlu0 %2406  ;;  %v2509_v59 = vld [vmem:[#allocation4 + $0x28] sm:$0x3] }
 0x770   :  { %v2308_v61 = vpop.permute.xlu1 %2307  ;;  %v2508_v60 = vld [vmem:[#allocation4 + $0x20] sm:$0xff]  ;;  %11776 = vmatpush3.bf16.msk.msra.mxu0 %vm12964_vm12, %v11771_v22  ;;  %2418 = vst.msk [vmem:[#allocation4 + $0x48] sm:$0x3] %vm2283_vm8, %v2407_v40 }
 0x771   :  { %2317 = vst.msk [vmem:[#allocation4 + $0x10] sm:$0xff] %vm2281_vm9, %v2308_v61  ;;  %v11783_v29 = vpack.c.bf16 %v2509_v59, %v2508_v60 }
 0x773   :  { %11785 = vmatprep.subr.msk.bf16.mxu1 %vm12964_vm12, %v11783_v29  ;;  %v2360_v27 = vpop.permute.xlu0 %2359  ;;  %v2507_v11 = vld [vmem:[#allocation4 + $0x18] sm:$0x3] }
 0x774   :  { %v2358_v57 = vpop.permute.xlu1 %2357  ;;  %11788 = vmatpush3.bf16.msk.msra.mxu1 %vm12964_vm12, %v11783_v29  ;;  %2369 = vst.msk [vmem:[#allocation4 + $0x38] sm:$0x3] %vm2283_vm8, %v2360_v27  ;;  %v2512_v25 = vld [vmem:[#allocation4 + $0x40] sm:$0xff] }
 0x775   :  { %2368 = vst.msk [vmem:[#allocation4 + $0x30] sm:$0xff] %vm2281_vm9, %v2358_v57 }
 0x777   :  { %v2513_v46 = vld [vmem:[#allocation4 + $0x48] sm:$0x3] }
 0x778   :  { %v2506_v39 = vld [vmem:[#allocation4 + $0x10] sm:$0xff]  ;;  %v12985_v23 = vpack.c.bf16 %v2513_v46, %v2512_v25 }
 0x779   :  { %v12983_v20 = vpack.c.bf16 %v2507_v11, %v2506_v39 }
 0x77a   :  { %11797 = vmatprep.subr.msk.bf16.mxu1 %vm12964_vm12, %v12985_v23 }
 0x77b   :  { %11779 = vmatprep.subr.msk.bf16.mxu0 %vm12964_vm12, %v12983_v20 }
 0x819   :  { %v11272_v17 = vpop.f32.mrb[12].mxu0 }
 0x81a   :  { %v12993_v48 = vmul.f32 0.35355338, %v11272_v17  ;;  %v2598_v49 = vpop.f32.mrb[13].mxu0 }
 0x81b   :  { %v12995_v18 = vmul.f32 0.35355338, %v2598_v49 }
 0x81c   :  { %v3237_v10 = vsel %vm3236_vm13, %v12993_v48, -inf }
 0x81d   :  { %3238 = vmax.xlane.f32.xlu0 %v3237_v10  ;;  %v3233_v9 = vsel %vm3232_vm14, %v12995_v18, -inf }
 0x81e   :  { %3234 = vmax.xlane.f32.xlu1 %v3233_v9 }
 0x821   :  { %v11286_v1 = vpop.f32.mrb[14].mxu0 }
 0x822   :  { %v11279_v4 = vpop.f32.mrb[12].mxu1  ;;  %v2772_v3 = vpop.f32.mrb[15].mxu0  ;;  %v13005_v14 = vmul.f32 0.35355338, %v11286_v1 }
 0x823   :  { %v13001_v63 = vmul.f32 0.35355338, %v11279_v4  ;;  %v2685_v13 = vpop.f32.mrb[13].mxu1  ;;  %v13009_v21 = vmul.f32 0.35355338, %v2772_v3 }
 0x824   :  { %v13003_v8 = vmul.f32 0.35355338, %v2685_v13  ;;  %v3249_v26 = vsel %vm3236_vm13, %v13005_v14, -inf }
 0x825   :  { %v3243_v16 = vsel %vm3236_vm13, %v13001_v63, -inf  ;;  %v3246_v31 = vsel %vm3232_vm14, %v13009_v21, -inf }
 0x826   :  { %3244 = vmax.xlane.f32.xlu1 %v3243_v16  ;;  %v3240_v24 = vsel %vm3232_vm14, %v13003_v8, -inf }
 0x827   :  { %3241 = vmax.xlane.f32.xlu0 %v3240_v24 }
 0x82a   :  { %v11300_v34 = vpop.f32.mrb[16].mxu0  ;;  %v11293_v35 = vpop.f32.mrb[14].mxu1  ;;  %3250 = vmax.xlane.f32.xlu1 %v3249_v26 }
 0x82b   :  { %v2946_v6 = vpop.f32.mrb[17].mxu0  ;;  %v13017_v38 = vmul.f32 0.35355338, %v11293_v35  ;;  %v2859_v41 = vpop.f32.mrb[15].mxu1  ;;  %3247 = vmax.xlane.f32.xlu0 %v3246_v31  ;;  %v13021_v42 = vmul.f32 0.35355338, %v11300_v34 }
 0x82c   :  { %v13019_v37 = vmul.f32 0.35355338, %v2859_v41  ;;  %v13025_v30 = vmul.f32 0.35355338, %v2946_v6 }
 0x82d   :  { %v3255_v44 = vsel %vm3236_vm13, %v13017_v38, -inf  ;;  %v3261_v55 = vsel %vm3236_vm13, %v13021_v42, -inf }
 0x82e   :  { %3256 = vmax.xlane.f32.xlu1 %v3255_v44  ;;  %v3252_v45 = vsel %vm3232_vm14, %v13019_v37, -inf  ;;  %v3258_v19 = vsel %vm3232_vm14, %v13025_v30, -inf }
 0x82f   :  { %3253 = vmax.xlane.f32.xlu0 %v3252_v45 }
 0x832   :  { %v11307_v15 = vpop.f32.mrb[16].mxu1  ;;  %3262 = vmax.xlane.f32.xlu1 %v3261_v55 }
 0x833   :  { %v13033_v32 = vmul.f32 0.35355338, %v11307_v15  ;;  %v3033_v22 = vpop.f32.mrb[17].mxu1  ;;  %3259 = vmax.xlane.f32.xlu0 %v3258_v19 }
 0x834   :  { %v13035_v56 = vmul.f32 0.35355338, %v3033_v22 }
 0x835   :  { %v3267_v61 = vsel %vm3236_vm13, %v13033_v32, -inf }
 0x836   :  { %3268 = vmax.xlane.f32.xlu1 %v3267_v61  ;;  %v11314_v60 = vpop.f32.mrb[18].mxu0  ;;  %v3264_v40 = vsel %vm3232_vm14, %v13035_v56, -inf }
 0x837   :  { %v13041_v59 = vmul.f32 0.35355338, %v11314_v60  ;;  %3265 = vmax.xlane.f32.xlu0 %v3264_v40  ;;  %v3120_v29 = vpop.f32.mrb[19].mxu0 }
 0x838   :  { %v13043_v57 = vmul.f32 0.35355338, %v3120_v29 }
 0x839   :  { %v3273_v27 = vsel %vm3236_vm13, %v13041_v59, -inf }
 0x83a   :  { %3274 = vmax.xlane.f32.xlu1 %v3273_v27  ;;  %v3270_v39 = vsel %vm3232_vm14, %v13043_v57, -inf }
 0x83b   :  { %3271 = vmax.xlane.f32.xlu0 %v3270_v39 }
 0x842   :  { %v11321_v11 = vpop.f32.mrb[18].mxu1 }
 0x843   :  { %v3207_v25 = vpop.f32.mrb[19].mxu1  ;;  %v13053_v46 = vmul.f32 0.35355338, %v11321_v11 }
 0x844   :  { %v13055_v17 = vmul.f32 0.35355338, %v3207_v25 }
 0x845   :  { %v3279_v49 = vsel %vm3236_vm13, %v13053_v46, -inf }
 0x846   :  { %v3276_v10 = vsel %vm3232_vm14, %v13055_v17, -inf }
 0x84b   :  { %2410 = vrot.lane.b32.xlu1 %v12798_v47, %s12230_s10 }
 0x851   :  { %2408 = vrot.lane.b32.xlu0 %v12804_v58, %s12230_s10 }
 0x86f   :  { %3280 = vmax.xlane.f32.xlu1 %v3279_v49 }
 0x870   :  { %3277 = vmax.xlane.f32.xlu0 %v3276_v10 }
 0x880   :  { %2455 = vrot.lane.b32.xlu1 %v12791_v28, %s12232_s11 }
 0x886   :  { %2457 = vrot.lane.b32.xlu0 %v12780_v12, %s12232_s11 }
 0x8aa   :  { %v3239_v9 = vpop.xlane.xlu0 %3238 }
 0x8ab   :  { %v3283_v1 = vsub.f32 %v12993_v48, %v3239_v9  ;;  %v3235_v4 = vpop.xlane.xlu1 %3234 }
 0x8ac   :  { %v3282_v3 = vsub.f32 %v12995_v18, %v3235_v4 }
 0x8ad   :  { %v3300_v13 = vmul.f32 1.442695, %v3283_v1 }
 0x8ae   :  { %v3298_v16 = vmul.f32 1.442695, %v3282_v3 }
 0x8af   :  { %12026 = vpow2.f32 %v3300_v13 }
 0x8b0   :  { %12028 = vpow2.f32 %v3298_v16 }
 0x8b3   :  { %v3245_v24 = vpop.xlane.xlu1 %3244 }
 0x8b4   :  { %v3285_v26 = vsub.f32 %v13001_v63, %v3245_v24  ;;  %v3242_v34 = vpop.xlane.xlu0 %3241 }
 0x8b5   :  { %v3284_v35 = vsub.f32 %v13003_v8, %v3242_v34 }
 0x8b6   :  { %v3304_v28 = vmul.f32 1.442695, %v3285_v26 }
 0x8b7   :  { %v3302_v31 = vmul.f32 1.442695, %v3284_v35  ;;  %v3251_v6 = vpop.xlane.xlu1 %3250 }
 0x8b8   :  { %12030 = vpow2.f32 %v3304_v28  ;;  %v3287_v12 = vsub.f32 %v13005_v14, %v3251_v6  ;;  %v3248_v48 = vpop.xlane.xlu0 %3247 }
 0x8b9   :  { %v13070_v41 = vpop.eup %12026  ;;  %12032 = vpow2.f32 %v3302_v31  ;;  %v3286_v18 = vsub.f32 %v13009_v21, %v3248_v48 }
 0x8ba   :  { %v13073_v44 = vpop.eup %12028  ;;  %v3308_v45 = vmul.f32 1.442695, %v3287_v12  ;;  %v3333_v63 = vsel %vm3236_vm13, %v13070_v41, 0.0 }
 0x8bb   :  { %v3306_v55 = vmul.f32 1.442695, %v3286_v18  ;;  %v3257_v8 = vpop.xlane.xlu1 %3256  ;;  %3334 = vadd.xlane.f32.xlu1 %v3333_v63  ;;  %v3330_v15 = vsel %vm3232_vm14, %v13073_v44, 0.0 }
 0x8bc   :  { %12034 = vpow2.f32 %v3308_v45  ;;  %v3289_v14 = vsub.f32 %v13017_v38, %v3257_v8  ;;  %v3254_v19 = vpop.xlane.xlu0 %3253  ;;  %3331 = vadd.xlane.f32.xlu0 %v3330_v15 }
 0x8bd   :  { %12036 = vpow2.f32 %v3306_v55  ;;  %v3288_v21 = vsub.f32 %v13019_v37, %v3254_v19 }
 0x8be   :  { %v3312_v22 = vmul.f32 1.442695, %v3289_v14 }
 0x8bf   :  { %v3310_v61 = vmul.f32 1.442695, %v3288_v21  ;;  %v3263_v60 = vpop.xlane.xlu1 %3262 }
 0x8c0   :  { %12038 = vpow2.f32 %v3312_v22  ;;  %v3291_v40 = vsub.f32 %v13021_v42, %v3263_v60  ;;  %v3260_v29 = vpop.xlane.xlu0 %3259 }
 0x8c1   :  { %12040 = vpow2.f32 %v3310_v61  ;;  %v3290_v27 = vsub.f32 %v13025_v30, %v3260_v29 }
 0x8c2   :  { %v13083_v39 = vpop.eup %12030  ;;  %v3316_v11 = vmul.f32 1.442695, %v3291_v40 }
 0x8c3   :  { %v13085_v25 = vpop.eup %12032  ;;  %v3314_v38 = vmul.f32 1.442695, %v3290_v27  ;;  %v3269_v49 = vpop.xlane.xlu1 %3268  ;;  %v3339_v37 = vsel %vm3236_vm13, %v13083_v39, 0.0 }
 0x8c4   :  { %12042 = vpow2.f32 %v3316_v11  ;;  %v3293_v10 = vsub.f32 %v13033_v32, %v3269_v49  ;;  %v3266_v9 = vpop.xlane.xlu0 %3265  ;;  %3340 = vadd.xlane.f32.xlu1 %v3339_v37  ;;  %v3336_v42 = vsel %vm3232_vm14, %v13085_v25, 0.0 }
 0x8c5   :  { %12044 = vpow2.f32 %v3314_v38  ;;  %v3292_v30 = vsub.f32 %v13035_v56, %v3266_v9  ;;  %3337 = vadd.xlane.f32.xlu0 %v3336_v42 }
 0x8c6   :  { %v13093_v1 = vpop.eup %12034  ;;  %v3320_v4 = vmul.f32 1.442695, %v3293_v10 }
 0x8c7   :  { %v13095_v3 = vpop.eup %12036  ;;  %v3318_v13 = vmul.f32 1.442695, %v3292_v30  ;;  %v3275_v16 = vpop.xlane.xlu1 %3274  ;;  %v3345_v24 = vsel %vm3236_vm13, %v13093_v1, 0.0 }
 0x8c8   :  { %12046 = vpow2.f32 %v3320_v4  ;;  %v3295_v32 = vsub.f32 %v13041_v59, %v3275_v16  ;;  %3346 = vadd.xlane.f32.xlu1 %v3345_v24  ;;  %v3272_v26 = vpop.xlane.xlu0 %3271  ;;  %v3342_v34 = vsel %vm3232_vm14, %v13095_v3, 0.0 }
 0x8c9   :  { %12048 = vpow2.f32 %v3318_v13  ;;  %v3294_v56 = vsub.f32 %v13043_v57, %v3272_v26  ;;  %3343 = vadd.xlane.f32.xlu0 %v3342_v34 }
 0x8ca   :  { %v13103_v35 = vpop.eup %12038  ;;  %v3324_v28 = vmul.f32 1.442695, %v3295_v32 }
 0x8cb   :  { %v13105_v31 = vpop.eup %12040  ;;  %v3322_v6 = vmul.f32 1.442695, %v3294_v56  ;;  %v2411_v12 = vpop.permute.xlu1 %2410  ;;  %v3351_v48 = vsel %vm3236_vm13, %v13103_v35, 0.0 }
 0x8cc   :  { %12050 = vpow2.f32 %v3324_v28  ;;  %2420 = vst.msk [vmem:[#allocation4 + $0x58] sm:$0x3] %vm2283_vm8, %v2411_v12  ;;  %3352 = vadd.xlane.f32.xlu1 %v3351_v48  ;;  %v2409_v59 = vpop.permute.xlu0 %2408  ;;  %v3348_v18 = vsel %vm3232_vm14, %v13105_v31, 0.0 }
 0x8cd   :  { %12052 = vpow2.f32 %v3322_v6  ;;  %2419 = vst.msk [vmem:[#allocation4 + $0x50] sm:$0xff] %vm2281_vm9, %v2409_v59  ;;  %3349 = vadd.xlane.f32.xlu0 %v3348_v18 }
 0x8ce   :  { %v13113_v57 = vpop.eup %12042 }
 0x8cf   :  { %v13115_v45 = vpop.eup %12044  ;;  %v3357_v63 = vsel %vm3236_vm13, %v13113_v57, 0.0 }
 0x8d0   :  { %3358 = vadd.xlane.f32.xlu1 %v3357_v63  ;;  %v3354_v55 = vsel %vm3232_vm14, %v13115_v45, 0.0  ;;  %v2510_v63 = vld [vmem:[#allocation4 + $0x30] sm:$0xff] }
 0x8d1   :  { %3355 = vadd.xlane.f32.xlu0 %v3354_v55  ;;  %v2511_v55 = vld [vmem:[#allocation4 + $0x38] sm:$0x3] }
 0x8d2   :  { %v13121_v8 = vpop.eup %12046 }
 0x8d3   :  { %v13123_v15 = vpop.eup %12048  ;;  %v3363_v14 = vsel %vm3236_vm13, %v13121_v8, 0.0 }
 0x8d4   :  { %3364 = vadd.xlane.f32.xlu1 %v3363_v14  ;;  %v3360_v19 = vsel %vm3232_vm14, %v13123_v15, 0.0 }
 0x8d5   :  { %3361 = vadd.xlane.f32.xlu0 %v3360_v19 }
 0x8d6   :  { %v13129_v21 = vpop.eup %12050 }
 0x8d7   :  { %v13131_v22 = vpop.eup %12052  ;;  %v3369_v61 = vsel %vm3236_vm13, %v13129_v21, 0.0 }
 0x8d8   :  { %3370 = vadd.xlane.f32.xlu1 %v3369_v61  ;;  %v3366_v60 = vsel %vm3232_vm14, %v13131_v22, 0.0 }
 0x8d9   :  { %3367 = vadd.xlane.f32.xlu0 %v3366_v60 }
 0x8fc   :  { %v3281_v40 = vpop.xlane.xlu1 %3280 }
 0x8fd   :  { %v3297_v29 = vsub.f32 %v13053_v46, %v3281_v40  ;;  %v3278_v27 = vpop.xlane.xlu0 %3277 }
 0x8fe   :  { %v3296_v11 = vsub.f32 %v13055_v17, %v3278_v27 }
 0x8ff   :  { %v3328_v38 = vmul.f32 1.442695, %v3297_v29 }
 0x900   :  { %v3326_v49 = vmul.f32 1.442695, %v3296_v11  ;;  %v2456_v37 = vpop.permute.xlu1 %2455  ;;  %v11789_v11 = vpack.c.bf16 %v2511_v55, %v2510_v63 }
 0x901   :  { %12054 = vpow2.f32 %v3328_v38  ;;  %2468 = vst.msk [vmem:[#allocation4 + $0x60] sm:$0xff] %vm2281_vm9, %v2456_v37  ;;  %v2458_v10 = vpop.permute.xlu0 %2457 }
 0x902   :  { %12056 = vpow2.f32 %v3326_v49  ;;  %2469 = vst.msk [vmem:[#allocation4 + $0x68] sm:$0x3] %vm2283_vm8, %v2458_v10 }
 0x90b   :  { %v13141_v9 = vpop.eup %12054 }
 0x90c   :  { %v13143_v42 = vpop.eup %12056  ;;  %v3375_v46 = vsel %vm3236_vm13, %v13141_v9, 0.0 }
 0x90d   :  { %3376 = vadd.xlane.f32.xlu0 %v3375_v46  ;;  %v3372_v17 = vsel %vm3232_vm14, %v13143_v42, 0.0 }
 0x90e   :  { %3373 = vadd.xlane.f32.xlu1 %v3372_v17 }
 0x91f   :  { %2459 = vrot.lane.b32.xlu1 %v12804_v58, %s12232_s11 }
 0x923   :  { %2461 = vrot.lane.b32.xlu0 %v12798_v47, %s12232_s11 }
 0x948   :  { %v3335_v30 = vpop.xlane.xlu1 %3334 }
 0x949   :  { %12058 = vrcp.f32 %v3335_v30  ;;  %v3332_v4 = vpop.xlane.xlu0 %3331 }
 0x94a   :  { %12060 = vrcp.f32 %v3332_v4 }
 0x951   :  { %v3341_v13 = vpop.xlane.xlu1 %3340 }
 0x952   :  { %12062 = vrcp.f32 %v3341_v13  ;;  %v3338_v16 = vpop.xlane.xlu0 %3337 }
 0x953   :  { %v12059_v24 = vpop.eup %12058  ;;  %12064 = vrcp.f32 %v3338_v16 }
 0x954   :  { %v12061_v32 = vpop.eup %12060  ;;  %v3395_v26 = vmul.f32 %v12059_v24, %v3335_v30 }
 0x955   :  { %v3394_v34 = vmul.f32 %v12061_v32, %v3332_v4  ;;  %v3347_v56 = vpop.xlane.xlu1 %3346 }
 0x956   :  { %v3411_v28 = vsub.f32 2.0, %v3395_v26  ;;  %12066 = vrcp.f32 %v3347_v56  ;;  %v3344_v6 = vpop.xlane.xlu0 %3343  ;;  %v2515_v26 = vld [vmem:[#allocation4 + $0x58] sm:$0x3] }
 0x957   :  { %v3410_v58 = vsub.f32 2.0, %v3394_v34  ;;  %12068 = vrcp.f32 %v3344_v6 }
 0x958   :  { %v3427_v12 = vmul.f32 %v12059_v24, %v3411_v28 }
 0x959   :  { %v3426_v47 = vmul.f32 %v12061_v32, %v3410_v58  ;;  %v3353_v48 = vpop.xlane.xlu1 %3352 }
 0x95a   :  { %12070 = vrcp.f32 %v3353_v48  ;;  %v3350_v59 = vpop.xlane.xlu0 %3349  ;;  %v3443_v19 = vmul.f32 %v13070_v41, %v3427_v12 }
 0x95b   :  { %12072 = vrcp.f32 %v3350_v59  ;;  %v3442_v18 = vmul.f32 %v13073_v44, %v3426_v47 }
 0x95c   :  { %v12063_v14 = vpop.eup %12062 }
 0x95d   :  { %v12065_v61 = vpop.eup %12064  ;;  %v3397_v60 = vmul.f32 %v12063_v14, %v3341_v13  ;;  %v3359_v40 = vpop.xlane.xlu1 %3358  ;;  %11326 = vmatprep.mubr.msk.f32.mxu0 %vm3232_vm14, %v3442_v18 }
 0x95e   :  { %v3396_v29 = vmul.f32 %v12065_v61, %v3338_v16  ;;  %12074 = vrcp.f32 %v3359_v40  ;;  %v3356_v27 = vpop.xlane.xlu0 %3355  ;;  %11327 = vmatmul.mubr.msk.f32.vlgmr.msra.gmra.mrb[20].mxu0 %vm3232_vm14, %v3443_v19  ;;  %v2517_v19 = vld [vmem:[#allocation4 + $0x68] sm:$0x3] }
 0x95f   :  { %v3413_v38 = vsub.f32 2.0, %v3397_v60  ;;  %12076 = vrcp.f32 %v3356_v27  ;;  %11782 = vmatpush3.bf16.msk.msra.mxu0 %vm12964_vm12, %v12983_v20  ;;  %v2514_v20 = vld [vmem:[#allocation4 + $0x50] sm:$0xff] }
 0x960   :  { %v12067_v44 = vpop.eup %12066  ;;  %v3412_v49 = vsub.f32 2.0, %v3396_v29  ;;  %11791 = vmatprep.subr.msk.bf16.mxu0 %vm12964_vm12, %v11789_v11  ;;  %v11801_v55 = vpack.c.bf16 %v2515_v26, %v2514_v20 }
 0x961   :  { %v12069_v41 = vpop.eup %12068  ;;  %v3429_v37 = vmul.f32 %v12063_v14, %v3413_v38  ;;  %v3399_v10 = vmul.f32 %v12067_v44, %v3347_v56  ;;  %v3365_v46 = vpop.xlane.xlu1 %3364 }
 0x962   :  { %v3428_v17 = vmul.f32 %v12065_v61, %v3412_v49  ;;  %v3398_v30 = vmul.f32 %v12069_v41, %v3344_v6  ;;  %12078 = vrcp.f32 %v3365_v46  ;;  %v3362_v4 = vpop.xlane.xlu0 %3361 }
 0x963   :  { %v3415_v13 = vsub.f32 2.0, %v3399_v10  ;;  %12080 = vrcp.f32 %v3362_v4  ;;  %v3445_v28 = vmul.f32 %v13083_v39, %v3429_v37 }
 0x964   :  { %v12071_v16 = vpop.eup %12070  ;;  %v3414_v24 = vsub.f32 2.0, %v3398_v30  ;;  %v3444_v32 = vmul.f32 %v13085_v25, %v3428_v17 }
 0x965   :  { %v12073_v34 = vpop.eup %12072  ;;  %v3431_v58 = vmul.f32 %v12067_v44, %v3415_v13  ;;  %v3401_v12 = vmul.f32 %v12071_v16, %v3353_v48  ;;  %v3371_v47 = vpop.xlane.xlu1 %3370  ;;  %v2516_v48 = vld [vmem:[#allocation4 + $0x60] sm:$0xff] }
 0x966   :  { %v3430_v56 = vmul.f32 %v12069_v41, %v3414_v24  ;;  %v3400_v18 = vmul.f32 %v12073_v34, %v3350_v59  ;;  %12082 = vrcp.f32 %v3371_v47  ;;  %11333 = vmatprep.mubr.msk.f32.mxu0 %vm3232_vm14, %v3444_v32  ;;  %v3368_v6 = vpop.xlane.xlu0 %3367 }
 0x967   :  { %v3417_v63 = vsub.f32 2.0, %v3401_v12  ;;  %12084 = vrcp.f32 %v3368_v6  ;;  %11334 = vmatmul.mubr.msk.f32.vlgmr.msra.gmra.mrb[22].mxu0 %vm3232_vm14, %v3445_v28  ;;  %v3447_v59 = vmul.f32 %v13093_v1, %v3431_v58 }
 0x968   :  { %v12075_v25 = vpop.eup %12074  ;;  %v3416_v14 = vsub.f32 2.0, %v3400_v18  ;;  %11794 = vmatpush3.bf16.msk.msra.mxu0 %vm12964_vm12, %v11789_v11  ;;  %v3446_v39 = vmul.f32 %v13095_v3, %v3430_v56  ;;  %v11807_v11 = vpack.c.bf16 %v2517_v19, %v2516_v48 }
 0x969   :  { %v12077_v61 = vpop.eup %12076  ;;  %v3433_v60 = vmul.f32 %v12071_v16, %v3417_v63  ;;  %v3403_v29 = vmul.f32 %v12075_v25, %v3359_v40  ;;  %11803 = vmatprep.subr.msk.bf16.mxu0 %vm12964_vm12, %v11801_v55 }
 0x96a   :  { %v3432_v38 = vmul.f32 %v12073_v34, %v3416_v14  ;;  %v3402_v44 = vmul.f32 %v12077_v61, %v3356_v27  ;;  %11340 = vmatprep.mubr.msk.f32.mxu1 %vm3232_vm14, %v3446_v39 }
 0x96b   :  { %v3419_v49 = vsub.f32 2.0, %v3403_v29  ;;  %11341 = vmatmul.mubr.msk.f32.vlgmr.msra.gmra.mrb[20].mxu1 %vm3232_vm14, %v3447_v59  ;;  %v3449_v37 = vmul.f32 %v13103_v35, %v3433_v60  ;;  %v1846_v29 = vld [vmem:[#allocation5 + $0x100] sm:$0xff] }
 0x96c   :  { %v12079_v41 = vpop.eup %12078  ;;  %v3418_v3 = vsub.f32 2.0, %v3402_v44  ;;  %11800 = vmatpush3.bf16.msk.msra.mxu1 %vm12964_vm12, %v12985_v23  ;;  %v3448_v1 = vmul.f32 %v13105_v31, %v3432_v38  ;;  %v1847_v38 = vld [vmem:[#allocation5 + $0x108] sm:$0xff] }
 0x96d   :  { %v12081_v40 = vpop.eup %12080  ;;  %v3435_v10 = vmul.f32 %v12075_v25, %v3419_v49  ;;  %v3405_v17 = vmul.f32 %v12079_v41, %v3365_v46  ;;  %11809 = vmatprep.subr.msk.bf16.mxu1 %vm12964_vm12, %v11807_v11 }
 0x96e   :  { %v3434_v27 = vmul.f32 %v12077_v61, %v3418_v3  ;;  %v3404_v30 = vmul.f32 %v12081_v40, %v3362_v4  ;;  %11347 = vmatprep.mubr.msk.f32.mxu0 %vm3232_vm14, %v3448_v1 }
 0x96f   :  { %v3421_v13 = vsub.f32 2.0, %v3405_v17  ;;  %11348 = vmatmul.mubr.msk.f32.vlgmr.msra.gmra.mrb[24].mxu0 %vm3232_vm14, %v3449_v37  ;;  %v3451_v31 = vmul.f32 %v13113_v57, %v3435_v10 }
 0x970   :  { %v12083_v16 = vpop.eup %12082  ;;  %v3420_v24 = vsub.f32 2.0, %v3404_v30  ;;  %11806 = vmatpush3.bf16.msk.msra.mxu0 %vm12964_vm12, %v11801_v55  ;;  %v3450_v23 = vmul.f32 %v13115_v45, %v3434_v27 }
 0x971   :  { %v12085_v35 = vpop.eup %12084  ;;  %v3437_v46 = vmul.f32 %v12079_v41, %v3421_v13  ;;  %v3407_v32 = vmul.f32 %v12083_v16, %v3371_v47 }
 0x972   :  { %v3436_v20 = vmul.f32 %v12081_v40, %v3420_v24  ;;  %v3406_v26 = vmul.f32 %v12085_v35, %v3368_v6  ;;  %11354 = vmatprep.mubr.msk.f32.mxu1 %vm3232_vm14, %v3450_v23 }
 0x973   :  { %v3423_v4 = vsub.f32 2.0, %v3407_v32  ;;  %11355 = vmatmul.mubr.msk.f32.vlgmr.msra.gmra.mrb[22].mxu1 %vm3232_vm14, %v3451_v31  ;;  %v3453_v45 = vmul.f32 %v13121_v8, %v3437_v46 }
 0x974   :  { %v3422_v34 = vsub.f32 2.0, %v3406_v26  ;;  %11812 = vmatpush3.bf16.msk.msra.mxu1 %vm12964_vm12, %v11807_v11  ;;  %v3452_v28 = vmul.f32 %v13123_v15, %v3436_v20 }
 0x975   :  { %v3439_v58 = vmul.f32 %v12083_v16, %v3423_v4  ;;  %11378 = vmatprep.subr.mxu1 %v12215_v2 }
 0x976   :  { %v3438_v57 = vmul.f32 %v12085_v35, %v3422_v34  ;;  %11361 = vmatprep.mubr.msk.f32.mxu0 %vm3232_vm14, %v3452_v28 }
 0x977   :  { %11362 = vmatmul.mubr.msk.f32.vlgmr.msra.gmra.mrb[26].mxu0 %vm3232_vm14, %v3453_v45  ;;  %v3455_v47 = vmul.f32 %v13129_v21, %v3439_v58 }
 0x978   :  { %v3454_v12 = vmul.f32 %v13131_v22, %v3438_v57 }
 0x97a   :  { %11368 = vmatprep.mubr.msk.f32.mxu1 %vm3232_vm14, %v3454_v12 }
 0x97b   :  { %11369 = vmatmul.mubr.msk.f32.vlgmr.msra.gmra.mrb[24].mxu1 %vm3232_vm14, %v3455_v47 }
 0x97c   :  { %11380 = vmatprep.mubr.msk.f32.mxu1 %vm12214_vm0, %v12215_v2  ;;  %11379 = vmatpush3.msra.mxu1 %v1846_v29 }
 0x97d   :  { %11389 = vmatprep.subr.mxu1 %v12215_v2 }
 0x99a   :  { %v3377_v8 = vpop.xlane.xlu0 %3376 }
 0x99b   :  { %12086 = vrcp.f32 %v3377_v8  ;;  %v3374_v15 = vpop.xlane.xlu1 %3373 }
 0x99c   :  { %12088 = vrcp.f32 %v3374_v15 }
 0x99e   :  { %v2462_v56 = vpop.permute.xlu0 %2461 }
 0x99f   :  { %2471 = vst.msk [vmem:[#allocation4 + $0x78] sm:$0x3] %vm2283_vm8, %v2462_v56  ;;  %v2460_v18 = vpop.permute.xlu1 %2459 }
 0x9a0   :  { %2470 = vst.msk [vmem:[#allocation4 + $0x70] sm:$0xff] %vm2281_vm9, %v2460_v18 }
 0x9a5   :  { %v12087_v22 = vpop.eup %12086 }
 0x9a6   :  { %v12089_v6 = vpop.eup %12088  ;;  %v3409_v21 = vmul.f32 %v12087_v22, %v3377_v8  ;;  %v2519_v63 = vld [vmem:[#allocation4 + $0x78] sm:$0x3] }
 0x9a7   :  { %v3408_v55 = vmul.f32 %v12089_v6, %v3374_v15  ;;  %v2518_v25 = vld [vmem:[#allocation4 + $0x70] sm:$0xff] }
 0x9a8   :  { %v3425_v14 = vsub.f32 2.0, %v3409_v21  ;;  %v11813_v39 = vpack.c.bf16 %v2519_v63, %v2518_v25 }
 0x9a9   :  { %v3424_v48 = vsub.f32 2.0, %v3408_v55 }
 0x9aa   :  { %v3441_v19 = vmul.f32 %v12087_v22, %v3425_v14  ;;  %11815 = vmatprep.subr.msk.bf16.mxu0 %vm12964_vm12, %v11813_v39 }
 0x9ab   :  { %v3440_v61 = vmul.f32 %v12089_v6, %v3424_v48  ;;  %11818 = vmatpush3.bf16.msk.msra.mxu0 %vm12964_vm12, %v11813_v39 }
 0x9ac   :  { %11400 = vmatprep.subr.mxu0 %v12215_v2  ;;  %v3457_v60 = vmul.f32 %v13141_v9, %v3441_v19 }
 0x9ad   :  { %v3456_v59 = vmul.f32 %v13143_v42, %v3440_v61 }
 0x9af   :  { %11375 = vmatprep.mubr.msk.f32.mxu0 %vm3232_vm14, %v3456_v59 }
 0x9b0   :  { %11376 = vmatmul.mubr.msk.f32.vlgmr.msra.gmra.mrb[28].mxu0 %vm3232_vm14, %v3457_v60 }
 0x9b1   :  { %11402 = vmatprep.mubr.msk.f32.mxu0 %vm12214_vm0, %v12215_v2  ;;  %11401 = vmatpush3.msra.mxu0 %v1847_v38 }
 0x9b2   :  { %11411 = vmatprep.subr.mxu0 %v12215_v2 }
 0xa31   :  { %v11328_v44 = vpop.f32.mrb[20].mxu0 }
 0xa32   :  { %v3533_v49 = vpop.f32.mrb[21].mxu0  ;;  %v4337_v9 = vrot.slane %v11328_v44, %v12269_v7 }
 0xa33   :  { %v4314_v17 = vcombine.high %v3533_v49, %v3533_v49  ;;  %v4321_v6 = vrot.slane %v3533_v49, %v12269_v7  ;;  %v1845_v49 = vld [vmem:[#allocation5 + $0xf8] sm:$0xff] }
 0xa35   :  { %v4328_v26 = vrot.slane %v4314_v17, %v12269_v7 }
 0xa37   :  { %v4330_v21 = vcombine.high %v4328_v26, %v4328_v26 }
 0xa3a   :  { %v11335_v42 = vpop.f32.mrb[22].mxu0 }
 0xa3b   :  { %v3617_v11 = vpop.f32.mrb[23].mxu0  ;;  %v4361_v30 = vrot.slane %v11335_v42, %v12269_v7  ;;  %v4329_v42 = vcombine.high %v4321_v6, %v4321_v6 }
 0xa3c   :  { %v4338_v41 = vcombine.high %v3617_v11, %v3617_v11  ;;  %v4345_v3 = vrot.slane %v3617_v11, %v12269_v7  ;;  %v4363_v11 = vcombine.low %v4328_v26, %v4330_v21 }
 0xa3e   :  { %v4352_v1 = vrot.slane %v4338_v41, %v12269_v7  ;;  %v4353_v40 = vcombine.high %v4345_v3, %v4345_v3  ;;  %v4379_v37 = vcombine.low %v4337_v9, %v4345_v3  ;;  %v11342_v10 = vpop.f32.mrb[20].mxu1 }
 0xa3f   :  { %v3701_v27 = vpop.f32.mrb[21].mxu1  ;;  %v4157_v4 = vrot.slane %v11342_v10, %v12269_v7 }
 0xa40   :  { %v4354_v13 = vcombine.high %v4352_v1, %v4352_v1  ;;  %v4380_v16 = vcombine.low %v4353_v40, %v4352_v1  ;;  %v4134_v24 = vcombine.high %v3701_v27, %v3701_v27  ;;  %v4141_v23 = vrot.slane %v3701_v27, %v12269_v7 }
 0xa41   :  { %v4387_v35 = vrot.slane %v4379_v37, %v12269_v7 }
 0xa42   :  { %v4394_v31 = vrot.slane %v4380_v16, %v12269_v7  ;;  %v13224_v46 = vcombine.low %v4354_v13, %v4361_v30  ;;  %v4148_v32 = vrot.slane %v4134_v24, %v12269_v7  ;;  %v11349_v20 = vpop.f32.mrb[24].mxu0  ;;  %v4149_v34 = vcombine.high %v4141_v23, %v4141_v23 }
 0xa43   :  { %v3785_v28 = vpop.f32.mrb[25].mxu0  ;;  %v4181_v63 = vrot.slane %v11349_v20, %v12269_v7 }
 0xa44   :  { %v4150_v45 = vcombine.high %v4148_v32, %v4148_v32  ;;  %v4158_v58 = vcombine.high %v3785_v28, %v3785_v28  ;;  %v4165_v57 = vrot.slane %v3785_v28, %v12269_v7  ;;  %v13230_v12 = vcombine.low %v4387_v35, %v4394_v31 }
 0xa45   :  { %v4182_v47 = vcombine.low %v4141_v23, %v4149_v34  ;;  %v4362_v23 = vcombine.low %v4321_v6, %v4329_v42  ;;  %v4377_v35 = vrot.slane %v4363_v11, %v12269_v7 }
 0xa46   :  { %v4183_v8 = vcombine.low %v4148_v32, %v4150_v45  ;;  %v4172_v15 = vrot.slane %v4158_v58, %v12269_v7  ;;  %v4173_v56 = vcombine.high %v4165_v57, %v4165_v57  ;;  %v4199_v18 = vcombine.low %v4157_v4, %v4165_v57  ;;  %v11356_v22 = vpop.f32.mrb[22].mxu1 }
 0xa47   :  { %v3869_v55 = vpop.f32.mrb[23].mxu1  ;;  %v4190_v25 = vrot.slane %v4182_v47, %v12269_v7  ;;  %v4572_v1 = vrot.slane %v11356_v22, %v12269_v7  ;;  %v1848_v22 = vld [vmem:[#allocation5 + $0x110] sm:$0xff]  ;;  %v4370_v6 = vrot.slane %v4362_v23, %v12269_v7 }
 0xa48   :  { %v4197_v14 = vrot.slane %v4183_v8, %v12269_v7  ;;  %v4174_v39 = vcombine.high %v4172_v15, %v4172_v15  ;;  %v4200_v48 = vcombine.low %v4173_v56, %v4172_v15  ;;  %v4549_v19 = vcombine.high %v3869_v55, %v3869_v55 }
 0xa49   :  { %v4556_v61 = vrot.slane %v3869_v55, %v12269_v7  ;;  %v4207_v60 = vrot.slane %v4199_v18, %v12269_v7 }
 0xa4a   :  { %v4198_v59 = vcombine.low %v4190_v25, %v4197_v14  ;;  %v4214_v29 = vrot.slane %v4200_v48, %v12269_v7  ;;  %v4216_v38 = vcombine.low %v4174_v39, %v4181_v63  ;;  %v11363_v44 = vpop.f32.mrb[26].mxu0  ;;  %v4563_v9 = vrot.slane %v4549_v19, %v12269_v7 }
 0xa4b   :  { %v4564_v41 = vcombine.high %v4556_v61, %v4556_v61  ;;  %v3953_v3 = vpop.f32.mrb[27].mxu0  ;;  %v4596_v20 = vrot.slane %v11363_v44, %v12269_v7  ;;  %v4378_v25 = vcombine.low %v4370_v6, %v4377_v35 }
 0xa4c   :  { %v4573_v40 = vcombine.high %v3953_v3, %v3953_v3  ;;  %v4580_v37 = vrot.slane %v3953_v3, %v12269_v7  ;;  %11381 = vmatmul.mubr.msk.f32.vlgmr.msra.gmra.mrb[26].mxu1 %vm2281_vm9, %v4198_v59  ;;  %v4215_v10 = vcombine.low %v4207_v60, %v4214_v29  ;;  %v4565_v17 = vcombine.high %v4563_v9, %v4563_v9 }
 0xa4d   :  { %v4597_v27 = vcombine.low %v4556_v61, %v4564_v41  ;;  %11383 = vmatprep.mubr.msk.f32.mxu1 %vm12214_vm0, %v12215_v2  ;;  %11390 = vmatpush3.msra.mxu1 %v1845_v49  ;;  %v4223_v57 = vrot.slane %v4216_v38, %v12269_v7  ;;  %v4403_v59 = vrot.slane %v13224_v46, %v12269_v7 }
 0xa4e   :  { %v4587_v30 = vrot.slane %v4573_v40, %v12269_v7  ;;  %v4588_v13 = vcombine.high %v4580_v37, %v4580_v37  ;;  %v4614_v16 = vcombine.low %v4572_v1, %v4580_v37  ;;  %v11370_v24 = vpop.f32.mrb[24].mxu1  ;;  %11819 = vmatprep.subr.bf16.mxu1 %v12213_v0  ;;  %v4598_v31 = vcombine.low %v4563_v9, %v4565_v17 }
 0xa4f   :  { %v4037_v32 = vpop.f32.mrb[25].mxu1  ;;  %v4605_v28 = vrot.slane %v4597_v27, %v12269_v7  ;;  %v4817_v38 = vrot.slane %v11370_v24, %v12269_v7 }
 0xa50   :  { %v4589_v26 = vcombine.high %v4587_v30, %v4587_v30  ;;  %v4615_v4 = vcombine.low %v4588_v13, %v4587_v30  ;;  %v4794_v34 = vcombine.high %v4037_v32, %v4037_v32  ;;  %11384 = vmatmul.mubr.msk.f32.gmra.mrb[28].mxu1 %vm2281_vm9, %v4215_v10  ;;  %v4612_v45 = vrot.slane %v4598_v31, %v12269_v7 }
 0xa51   :  { %v4801_v58 = vrot.slane %v4037_v32, %v12269_v7  ;;  %11386 = vmatprep.mubr.msk.f32.mxu1 %vm12214_vm0, %v12215_v2  ;;  %v4622_v47 = vrot.slane %v4614_v16, %v12269_v7 }
 0xa52   :  { %v4629_v8 = vrot.slane %v4615_v4, %v12269_v7  ;;  %v4631_v15 = vcombine.low %v4589_v26, %v4596_v20  ;;  %v4808_v56 = vrot.slane %v4794_v34, %v12269_v7  ;;  %v4613_v18 = vcombine.low %v4605_v28, %v4612_v45 }
 0xa53   :  { %v4809_v55 = vcombine.high %v4801_v58, %v4801_v58 }
 0xa54   :  { %v4810_v21 = vcombine.high %v4808_v56, %v4808_v56  ;;  %11387 = vmatmul.mubr.msk.f32.gmra.mrb[30].mxu1 %vm2281_vm9, %v4223_v57  ;;  %v4630_v63 = vcombine.low %v4622_v47, %v4629_v8  ;;  %11403 = vmatmul.mubr.msk.f32.vlgmr.msra.gmra.mrb[30].mxu0 %vm2281_vm9, %v4613_v18  ;;  %v4638_v19 = vrot.slane %v4631_v15, %v12269_v7  ;;  %v10841_v57 = vld [vmem:[#allocation5 + $0x118] ss:$0 sm:$0xff] }
 0xa55   :  { %11391 = vmatprep.mubr.msk.f32.mxu1 %vm12214_vm0, %v12215_v2  ;;  %11405 = vmatprep.mubr.msk.f32.mxu0 %vm12214_vm0, %v12215_v2  ;;  %v4842_v39 = vcombine.low %v4801_v58, %v4809_v55 }
 0xa56   :  { %11412 = vmatpush3.msra.mxu0 %v1848_v22  ;;  %v4843_v14 = vcombine.low %v4808_v56, %v4810_v21 }
 0xa57   :  { %11825 = vmatprep.subr.bf16.mxu0 %v12213_v0  ;;  %v4850_v61 = vrot.slane %v4842_v39, %v12269_v7  ;;  %v5040_v39 = vcombine.high %v10841_v57, %v10841_v57 }
 0xa58   :  { %11392 = vmatmul.mubr.msk.f32.vlgmr.msra.gmra.mrb[26].mxu1 %vm2281_vm9, %v4378_v25  ;;  %11406 = vmatmul.mubr.msk.f32.gmra.mrb[32].mxu0 %vm2281_vm9, %v4630_v63  ;;  %v4857_v48 = vrot.slane %v4843_v14, %v12269_v7 }
 0xa59   :  { %11394 = vmatprep.mubr.msk.f32.mxu1 %vm12214_vm0, %v12215_v2  ;;  %11408 = vmatprep.mubr.msk.f32.mxu0 %vm12214_vm0, %v12215_v2 }
 0xa5a   :  { %v4858_v60 = vcombine.low %v4850_v61, %v4857_v48 }
 0xa5c   :  { %11395 = vmatmul.mubr.msk.f32.gmra.mrb[28].mxu1 %vm2281_vm9, %v13230_v12  ;;  %11409 = vmatmul.mubr.msk.f32.gmra.mrb[34].mxu0 %vm2281_vm9, %v4638_v19 }
 0xa5d   :  { %11397 = vmatprep.mubr.msk.f32.mxu1 %vm12214_vm0, %v12215_v2  ;;  %11413 = vmatprep.mubr.msk.f32.mxu0 %vm12214_vm0, %v12215_v2 }
 0xa60   :  { %11398 = vmatmul.mubr.msk.f32.gmra.mrb[30].mxu1 %vm2281_vm9, %v4403_v59  ;;  %11414 = vmatmul.mubr.msk.f32.vlgmr.msra.gmra.mrb[36].mxu0 %vm2281_vm9, %v4858_v60 }
 0xa61   :  { %11430 = vmatprep.mubr.msk.f32.mxu1 %vm12214_vm0, %v12215_v2  ;;  %11416 = vmatprep.mubr.msk.f32.mxu0 %vm12214_vm0, %v12215_v2 }
 0xa83   :  { %v11377_v12 = vpop.f32.mrb[28].mxu0 }
 0xa84   :  { %v4121_v29 = vpop.f32.mrb[29].mxu0  ;;  %v4841_v9 = vrot.slane %v11377_v12, %v12269_v7 }
 0xa85   :  { %v4818_v44 = vcombine.high %v4121_v29, %v4121_v29  ;;  %v4825_v49 = vrot.slane %v4121_v29, %v12269_v7 }
 0xa87   :  { %v4832_v46 = vrot.slane %v4818_v44, %v12269_v7  ;;  %v4833_v42 = vcombine.high %v4825_v49, %v4825_v49  ;;  %v4859_v11 = vcombine.low %v4817_v38, %v4825_v49  ;;  %v13315_v38 = vrot.slane %v10841_v57, %v12269_v7 }
 0xa89   :  { %v4834_v41 = vcombine.high %v4832_v46, %v4832_v46  ;;  %v4860_v3 = vcombine.low %v4833_v42, %v4832_v46  ;;  %v4867_v1 = vrot.slane %v4859_v11, %v12269_v7 }
 0xa8b   :  { %v4874_v40 = vrot.slane %v4860_v3, %v12269_v7  ;;  %v4876_v37 = vcombine.low %v4834_v41, %v4841_v9 }
 0xa8d   :  { %v4875_v10 = vcombine.low %v4867_v1, %v4874_v40  ;;  %v4883_v17 = vrot.slane %v4876_v37, %v12269_v7  ;;  %v5054_v40 = vrot.slane %v5040_v39, %v12269_v7 }
 0xa8f   :  { %11417 = vmatmul.mubr.msk.f32.gmra.mrb[38].mxu0 %vm2281_vm9, %v4875_v10 }
 0xa90   :  { %11419 = vmatprep.mubr.msk.f32.mxu0 %vm12214_vm0, %v12215_v2 }
 0xa93   :  { %11420 = vmatmul.mubr.msk.f32.gmra.mrb[40].mxu0 %vm2281_vm9, %v4883_v17 }
 0xa94   :  { %11455 = vmatprep.mubr.msk.f32.mxu0 %vm12214_vm0, %v12215_v2 }
 0xb27   :  { %v4711_v27 = vpop.f32.mrb[30].mxu0 }
 0xb28   :  { %v4728_v30 = vcombine.high %v4711_v27, %v4711_v27  ;;  %v11404_v13 = vpop.f32.mrb[31].mxu0  ;;  %v4735_v16 = vrot.slane %v4711_v27, %v12269_v7 }
 0xb2a   :  { %v4742_v24 = vrot.slane %v4728_v30, %v12269_v7  ;;  %v4743_v34 = vcombine.high %v4735_v16, %v4735_v16 }
 0xb2b   :  { %v4476_v23 = vpop.f32.mrb[26].mxu1  ;;  %v4716_v32 = vpop.f32.mrb[32].mxu0 }
 0xb2c   :  { %v4493_v35 = vcombine.high %v4476_v23, %v4476_v23  ;;  %v4500_v31 = vrot.slane %v4476_v23, %v12269_v7  ;;  %v11393_v20 = vpop.f32.mrb[27].mxu1  ;;  %v4745_v26 = vcombine.high %v4716_v32, %v4716_v32  ;;  %v11407_v4 = vpop.f32.mrb[33].mxu0  ;;  %v4744_v47 = vcombine.high %v4742_v24, %v4742_v24 }
 0xb2d   :  { %v4752_v8 = vrot.slane %v4716_v32, %v12269_v7  ;;  %v5055_v23 = vcombine.high %v13315_v38, %v13315_v38 }
 0xb2e   :  { %v4507_v28 = vrot.slane %v4493_v35, %v12269_v7  ;;  %v4508_v45 = vcombine.high %v4500_v31, %v4500_v31  ;;  %v4780_v58 = vadd.f32 %v4735_v16, %v4500_v31  ;;  %v4759_v15 = vrot.slane %v4745_v26, %v12269_v7 }
 0xb2f   :  { %v4481_v56 = vpop.f32.mrb[28].mxu1  ;;  %v4721_v63 = vpop.f32.mrb[34].mxu0  ;;  %v4760_v59 = vcombine.high %v4752_v8, %v4752_v8  ;;  %v5056_v26 = vcombine.high %v5054_v40, %v5054_v40 }
 0xb30   :  { %v4509_v18 = vcombine.high %v4507_v28, %v4507_v28  ;;  %v4781_v22 = vadd.f32 %v4743_v34, %v4508_v45  ;;  %v4782_v6 = vadd.f32 %v4742_v24, %v4507_v28  ;;  %v4510_v21 = vcombine.high %v4481_v56, %v4481_v56  ;;  %v11396_v55 = vpop.f32.mrb[29].mxu1  ;;  %v11410_v14 = vpop.f32.mrb[35].mxu0 }
 0xb31   :  { %v4517_v25 = vrot.slane %v4481_v56, %v12269_v7  ;;  %v4768_v61 = vrot.slane %v4721_v63, %v12269_v7  ;;  %v4761_v44 = vcombine.high %v4759_v15, %v4759_v15 }
 0xb32   :  { %v4783_v48 = vadd.f32 %v4744_v47, %v4509_v18  ;;  %v4524_v19 = vrot.slane %v4510_v21, %v12269_v7 }
 0xb33   :  { %v4525_v60 = vcombine.high %v4517_v25, %v4517_v25  ;;  %v4784_v12 = vadd.f32 %v4752_v8, %v4517_v25  ;;  %v4486_v29 = vpop.f32.mrb[30].mxu1  ;;  %v4956_v11 = vpop.f32.mrb[36].mxu0  ;;  %v4769_v17 = vcombine.high %v4768_v61, %v4768_v61 }
 0xb34   :  { %v4526_v49 = vcombine.high %v4524_v19, %v4524_v19  ;;  %v4786_v46 = vadd.f32 %v4759_v15, %v4524_v19  ;;  %v4533_v42 = vrot.slane %v4486_v29, %v12269_v7  ;;  %v11399_v9 = vpop.f32.mrb[31].mxu1  ;;  %v4973_v3 = vcombine.high %v4956_v11, %v4956_v11  ;;  %v11415_v37 = vpop.f32.mrb[37].mxu0 }
 0xb35   :  { %v4785_v41 = vadd.f32 %v4760_v59, %v4525_v60  ;;  %v4980_v1 = vrot.slane %v4956_v11, %v12269_v7 }
 0xb36   :  { %v4787_v10 = vadd.f32 %v4761_v44, %v4526_v49  ;;  %v4534_v27 = vcombine.high %v4533_v42, %v4533_v42  ;;  %v4788_v30 = vadd.f32 %v4768_v61, %v4533_v42  ;;  %v4987_v13 = vrot.slane %v4973_v3, %v12269_v7 }
 0xb37   :  { %v4988_v16 = vcombine.high %v4980_v1, %v4980_v1  ;;  %v5025_v24 = vadd.f32 %v4980_v1, %v4780_v58 }
 0xb38   :  { %v4789_v35 = vadd.f32 %v4769_v17, %v4534_v27  ;;  %v4989_v31 = vcombine.high %v4987_v13, %v4987_v13  ;;  %v5027_v20 = vadd.f32 %v4987_v13, %v4782_v6 }
 0xb39   :  { %v5026_v32 = vadd.f32 %v4988_v16, %v4781_v22  ;;  %v5061_v34 = vadd.f32 %v13315_v38, %v5025_v24 }
 0xb3a   :  { %v5028_v4 = vadd.f32 %v4989_v31, %v4783_v48  ;;  %v5063_v45 = vadd.f32 %v5054_v40, %v5027_v20 }
 0xb3b   :  { %v5062_v28 = vadd.f32 %v5055_v23, %v5026_v32 }
 0xb3c   :  { %v5064_v57 = vadd.f32 %v5056_v26, %v5028_v4 }
 0xb3d   :  { %v5081_v47 = vcombine.low %v5061_v34, %v5062_v28 }
 0xb3e   :  { %v5082_v8 = vcombine.low %v5063_v45, %v5064_v57 }
 0xb3f   :  { %v5089_v15 = vrot.slane %v5081_v47, %v12269_v7 }
 0xb40   :  { %v5096_v58 = vrot.slane %v5082_v8, %v12269_v7 }
 0xb42   :  { %v13326_v56 = vcombine.low %v5089_v15, %v5096_v58 }
 0xb44   :  { %v5137_v18 = vsel %vm1866_vm6, %v13326_v56, 0.0 }
 0xb45   :  { %5138 = vadd.xlane.f32.xlu1 %v5137_v18 }
 0xb62   :  { %v4961_v22 = vpop.f32.mrb[38].mxu0 }
 0xb63   :  { %v4990_v6 = vcombine.high %v4961_v22, %v4961_v22  ;;  %v4997_v21 = vrot.slane %v4961_v22, %v12269_v7  ;;  %v11418_v63 = vpop.f32.mrb[39].mxu0 }
 0xb64   :  { %v1852_v63 = vld [vmem:[#allocation5 + $0x130] sm:$0xff] }
 0xb65   :  { %v5004_v55 = vrot.slane %v4990_v6, %v12269_v7  ;;  %v5005_v25 = vcombine.high %v4997_v21, %v4997_v21  ;;  %v5029_v14 = vadd.f32 %v4997_v21, %v4784_v12 }
 0xb66   :  { %v4966_v39 = vpop.f32.mrb[40].mxu0 }
 0xb67   :  { %v5006_v48 = vcombine.high %v5004_v55, %v5004_v55  ;;  %v5030_v19 = vadd.f32 %v5005_v25, %v4785_v41  ;;  %v5031_v61 = vadd.f32 %v5004_v55, %v4786_v46  ;;  %v5013_v59 = vrot.slane %v4966_v39, %v12269_v7  ;;  %v11421_v60 = vpop.f32.mrb[41].mxu0  ;;  %v1853_v55 = vld [vmem:[#allocation5 + $0x138] sm:$0xff]  ;;  %v1854_v25 = vld [vmem:[#allocation5 + $0x140] sm:$0xff]  ;;  %v1855_v39 = vld [vmem:[#allocation5 + $0x148] sm:$0xff] }
 0xb68   :  { %v5065_v27 = vadd.f32 %v13315_v38, %v5029_v14  ;;  %v11820_v14 = vpack.c.bf16 %v1853_v55, %v1852_v63  ;;  %v12182_v63 = vld [vmem:[#allocation5 + $0x120] ss:$0 sm:$0xff] }
 0xb69   :  { %v5032_v29 = vadd.f32 %v5006_v48, %v4787_v10  ;;  %v13334_v44 = vadd.f32 %v13315_v38, %v5030_v19  ;;  %v13336_v49 = vadd.f32 %v5055_v23, %v5031_v61  ;;  %v5014_v42 = vcombine.high %v5013_v59, %v5013_v59 }
 0xb6a   :  { %v5033_v11 = vadd.f32 %v5013_v59, %v4788_v30  ;;  %v13354_v16 = vrot.slane %v5065_v27, %v12269_v7  ;;  %11821 = vmatpush3.bf16.msra.mxu1 %v11820_v14  ;;  %v11823_v48 = vpack.c.bf16 %v1855_v39, %v1854_v25  ;;  %v5438_v55 = vcombine.high %v12182_v63, %v12182_v63  ;;  %v12183_v25 = vld [vmem:[#allocation5 + $0x128] ss:$0 sm:$0xff] }
 0xb6b   :  { %v5034_v9 = vadd.f32 %v5014_v42, %v4789_v35  ;;  %v5068_v3 = vadd.f32 %v5054_v40, %v5032_v29  ;;  %v5105_v12 = vcombine.low %v13334_v44, %v13336_v49  ;;  %11822 = vmatprep.subr.bf16.mxu1 %v12213_v0  ;;  %v5470_v14 = vcombine.high %v12183_v25, %v12183_v25 }
 0xb6c   :  { %v5069_v1 = vadd.f32 %v5056_v26, %v5033_v11  ;;  %v5140_v24 = vsel %vm1870_vm7, %v13354_v16, 0.0  ;;  %v13423_v39 = vrot.slane %v12182_v63, %v12269_v7 }
 0xb6d   :  { %v5070_v41 = vadd.f32 %v13315_v38, %v5034_v9  ;;  %v5113_v10 = vrot.slane %v5105_v12, %v12269_v7 }
 0xb6e   :  { %v5106_v46 = vcombine.low %v5068_v3, %v5069_v1  ;;  %11824 = vmatpush3.bf16.msra.mxu1 %v11823_v48  ;;  %v5452_v48 = vrot.slane %v5438_v55, %v12269_v7 }
 0xb6f   :  { %v13342_v37 = vrot.slane %v5070_v41, %v12269_v7  ;;  %11837 = vmatprep.subr.bf16.mxu1 %v12213_v0 }
 0xb70   :  { %v5120_v17 = vrot.slane %v5106_v46, %v12269_v7 }
 0xb71   :  { %v5146_v30 = vsel %vm1870_vm7, %v13342_v37, 0.0 }
 0xb72   :  { %5147 = vadd.xlane.f32.xlu1 %v5146_v30  ;;  %v13349_v40 = vcombine.low %v5113_v10, %v5120_v17 }
 0xb74   :  { %v5143_v13 = vsel %vm1866_vm6, %v13349_v40, 0.0 }
 0xb75   :  { %5144 = vadd.xlane.f32.xlu0 %v5143_v13 }
 0xb79   :  { %5141 = vadd.xlane.f32.xlu0 %v5140_v24 }
 0xbd2   :  { %v5139_v23 = vpop.xlane.xlu1 %5138 }
 0xbd3   :  { %v5149_v35 = vmul.f32 0.03125, %v5139_v23 }
 0xbd5   :  { %v5163_v38 = vrot.slane %v5149_v35, %v12378_v50  ;;  %v5170_v31 = vrot.slane %v5149_v35, %v12381_v51  ;;  %v5177_v32 = vrot.slane %v5149_v35, %v12384_v52  ;;  %v5184_v20 = vrot.slane %v5149_v35, %v12387_v53 }
 0xbd7   :  { %v13362_v26 = vsub.f32 %v5061_v34, %v5163_v38  ;;  %v13364_v4 = vsub.f32 %v5062_v28, %v5170_v31  ;;  %v13366_v47 = vsub.f32 %v5063_v45, %v5177_v32  ;;  %v13368_v8 = vsub.f32 %v5064_v57, %v5184_v20 }
 0xbd9   :  { %v5247_v15 = vmul.f32 %v13362_v26, %v13362_v26  ;;  %v5248_v58 = vmul.f32 %v13364_v4, %v13364_v4  ;;  %v5249_v18 = vmul.f32 %v13366_v47, %v13366_v47  ;;  %v5250_v22 = vmul.f32 %v13368_v8, %v13368_v8 }
 0xbdb   :  { %v5267_v34 = vcombine.low %v5247_v15, %v5248_v58  ;;  %v5268_v6 = vcombine.low %v5249_v18, %v5250_v22 }
 0xbdd   :  { %v5275_v28 = vrot.slane %v5267_v34, %v12269_v7  ;;  %v5282_v45 = vrot.slane %v5268_v6, %v12269_v7 }
 0xbdf   :  { %v5283_v57 = vcombine.low %v5275_v28, %v5282_v45 }
 0xbe1   :  { %v5319_v21 = vsel %vm1866_vm6, %v5283_v57, 0.0 }
 0xbe2   :  { %5320 = vadd.xlane.f32.xlu0 %v5319_v21 }
 0xbff   :  { %v5148_v19 = vpop.xlane.xlu1 %5147 }
 0xc00   :  { %v5152_v61 = vmul.f32 0.03125, %v5148_v19  ;;  %v13427_v19 = vrot.slane %v12183_v25, %v12269_v7 }
 0xc02   :  { %v5145_v59 = vpop.xlane.xlu0 %5144  ;;  %v5226_v29 = vrot.slane %v5152_v61, %v12378_v50  ;;  %v13430_v61 = vrot.slane %v5470_v14, %v12269_v7 }
 0xc03   :  { %v5151_v60 = vmul.f32 0.03125, %v5145_v59 }
 0xc04   :  { %v13396_v24 = vsub.f32 %v5070_v41, %v5226_v29  ;;  %v5454_v29 = vcombine.high %v5452_v48, %v5452_v48 }
 0xc05   :  { %v5198_v42 = vrot.slane %v5151_v60, %v12378_v50  ;;  %v5205_v11 = vrot.slane %v5151_v60, %v12381_v51  ;;  %v5212_v9 = vrot.slane %v5151_v60, %v12384_v52  ;;  %v5219_v12 = vrot.slane %v5151_v60, %v12387_v53 }
 0xc06   :  { %v5142_v46 = vpop.xlane.xlu0 %5141  ;;  %v5256_v15 = vmul.f32 %v13396_v24, %v13396_v24  ;;  %v5453_v60 = vcombine.high %v13423_v39, %v13423_v39 }
 0xc07   :  { %v5150_v10 = vmul.f32 0.03125, %v5142_v46  ;;  %v13389_v17 = vsub.f32 %v13334_v44, %v5198_v42  ;;  %v13392_v30 = vsub.f32 %v13336_v49, %v5205_v11  ;;  %v13394_v13 = vsub.f32 %v5068_v3, %v5212_v9 }
 0xc08   :  { %v13398_v23 = vsub.f32 %v5069_v1, %v5219_v12  ;;  %v5485_v46 = vcombine.high %v13427_v19, %v13427_v19 }
 0xc09   :  { %v5191_v35 = vrot.slane %v5150_v10, %v12378_v50  ;;  %v5252_v38 = vmul.f32 %v13389_v17, %v13389_v17  ;;  %v5253_v31 = vmul.f32 %v13392_v30, %v13392_v30  ;;  %v5254_v44 = vmul.f32 %v13394_v13, %v13394_v13 }
 0xc0a   :  { %v5255_v49 = vmul.f32 %v13398_v23, %v13398_v23  ;;  %v5486_v10 = vcombine.high %v13430_v61, %v13430_v61 }
 0xc0b   :  { %v13409_v3 = vsub.f32 %v5065_v27, %v5191_v35  ;;  %v5291_v41 = vcombine.low %v5252_v38, %v5253_v31  ;;  %v5314_v27 = vrot.slane %v5256_v15, %v12269_v7 }
 0xc0c   :  { %v5292_v32 = vcombine.low %v5254_v44, %v5255_v49 }
 0xc0d   :  { %v5299_v1 = vrot.slane %v5291_v41, %v12269_v7  ;;  %v5251_v20 = vmul.f32 %v13409_v3, %v13409_v3  ;;  %v5328_v28 = vsel %vm1870_vm7, %v5314_v27, 0.0 }
 0xc0e   :  { %v5306_v58 = vrot.slane %v5292_v32, %v12269_v7 }
 0xc0f   :  { %v5290_v18 = vrot.slane %v5251_v20, %v12269_v7 }
 0xc10   :  { %v5307_v22 = vcombine.low %v5299_v1, %v5306_v58 }
 0xc11   :  { %v5322_v34 = vsel %vm1870_vm7, %v5290_v18, 0.0 }
 0xc12   :  { %v5325_v6 = vsel %vm1866_vm6, %v5307_v22, 0.0  ;;  %5323 = vadd.xlane.f32.xlu1 %v5322_v34 }
 0xc13   :  { %5326 = vadd.xlane.f32.xlu0 %v5325_v6 }
 0xc16   :  { %5329 = vadd.xlane.f32.xlu1 %v5328_v28 }
 0xc6f   :  { %v5321_v45 = vpop.xlane.xlu0 %5320 }
 0xc70   :  { %v5331_v57 = vmul.f32 0.03125, %v5321_v45 }
 0xc72   :  { %v5335_v21 = vadd.f32 1e-05, %v5331_v57 }
 0xc74   :  { %12090 = vrsqrt.f32 %v5335_v21 }
 0xc7e   :  { %v12091_v59 = vpop.eup %12090 }
 0xc7f   :  { %v5353_v42 = vrot.slane %v12091_v59, %v12378_v50  ;;  %v5360_v11 = vrot.slane %v12091_v59, %v12381_v51  ;;  %v5367_v9 = vrot.slane %v12091_v59, %v12384_v52  ;;  %v5374_v12 = vrot.slane %v12091_v59, %v12387_v53 }
 0xc81   :  { %v5427_v35 = vmul.f32 %v5353_v42, %v13362_v26  ;;  %v5428_v38 = vmul.f32 %v5360_v11, %v13364_v4  ;;  %v5429_v31 = vmul.f32 %v5367_v9, %v13366_v47  ;;  %v5430_v44 = vmul.f32 %v5374_v12, %v13368_v8 }
 0xc83   :  { %v5459_v49 = vmul.f32 %v13423_v39, %v5427_v35  ;;  %v5460_v41 = vmul.f32 %v5453_v60, %v5428_v38  ;;  %v5461_v32 = vmul.f32 %v5452_v48, %v5429_v31  ;;  %v5462_v1 = vmul.f32 %v5454_v29, %v5430_v44 }
 0xc85   :  { %v5491_v20 = vadd.f32 %v13427_v19, %v5459_v49  ;;  %v5492_v15 = vadd.f32 %v5485_v46, %v5460_v41  ;;  %v5493_v58 = vadd.f32 %v13430_v61, %v5461_v32  ;;  %v5494_v18 = vadd.f32 %v5486_v10, %v5462_v1 }
 0xc87   :  { %v5533_v22 = vcombine.low %v5491_v20, %v5492_v15  ;;  %v5534_v34 = vcombine.low %v5493_v58, %v5494_v18 }
 0xc89   :  { %v5541_v26 = vrot.slane %v5533_v22, %v12269_v7  ;;  %v5548_v4 = vrot.slane %v5534_v34, %v12269_v7 }
 0xc8b   :  { %v5549_v47 = vcombine.low %v5541_v26, %v5548_v4 }
 0xc8d   :  { %11431 = vmatmul.mubr.msk.f32.vlgmr.msra.gmra.mrb[32].mxu1 %vm1866_vm6, %v5549_v47 }
 0xc8e   :  { %11433 = vmatprep.mubr.msk.f32.mxu1 %vm12214_vm0, %v12215_v2 }
 0xc9f   :  { %v5324_v8 = vpop.xlane.xlu1 %5323 }
 0xca0   :  { %v5327_v27 = vpop.xlane.xlu0 %5326  ;;  %v5332_v6 = vmul.f32 0.03125, %v5324_v8 }
 0xca1   :  { %v5333_v28 = vmul.f32 0.03125, %v5327_v27 }
 0xca2   :  { %v5336_v45 = vadd.f32 1e-05, %v5332_v6  ;;  %v1861_v6 = vld [vmem:[#allocation5 + $0x178] sm:$0xff] }
 0xca3   :  { %v5337_v57 = vadd.f32 1e-05, %v5333_v28  ;;  %v5330_v21 = vpop.xlane.xlu1 %5329  ;;  %v1862_v28 = vld [vmem:[#allocation5 + $0x180] sm:$0xff] }
 0xca4   :  { %12092 = vrsqrt.f32 %v5336_v45  ;;  %v5334_v63 = vmul.f32 0.03125, %v5330_v21  ;;  %v11832_v45 = vpack.c.bf16 %v1862_v28, %v1861_v6  ;;  %v1864_v21 = vld [vmem:[#allocation5 + $0x190] sm:$0xff] }
 0xca5   :  { %12094 = vrsqrt.f32 %v5337_v57  ;;  %v1863_v57 = vld [vmem:[#allocation5 + $0x188] sm:$0xff] }
 0xca6   :  { %v5338_v55 = vadd.f32 1e-05, %v5334_v63  ;;  %v11835_v63 = vpack.c.bf16 %v1864_v21, %v1863_v57 }
 0xca8   :  { %12096 = vrsqrt.f32 %v5338_v55  ;;  %v10842_v55 = vld [vmem:[#allocation5 + $0x150] ss:$0 sm:$0xff] }
 0xcae   :  { %v12093_v25 = vpop.eup %12092 }
 0xcaf   :  { %v12095_v14 = vpop.eup %12094  ;;  %v5381_v59 = vrot.slane %v12093_v25, %v12378_v50  ;;  %v5506_v25 = vcombine.high %v10842_v55, %v10842_v55 }
 0xcb0   :  { %v5388_v42 = vrot.slane %v12095_v14, %v12378_v50  ;;  %v5395_v11 = vrot.slane %v12095_v14, %v12381_v51  ;;  %v5402_v9 = vrot.slane %v12095_v14, %v12384_v52  ;;  %v5409_v12 = vrot.slane %v12095_v14, %v12387_v53 }
 0xcb1   :  { %v5431_v35 = vmul.f32 %v5381_v59, %v13409_v3  ;;  %v5513_v14 = vrot.slane %v10842_v55, %v12269_v7  ;;  %v5520_v59 = vrot.slane %v5506_v25, %v12269_v7 }
 0xcb2   :  { %v12097_v38 = vpop.eup %12096  ;;  %v5432_v31 = vmul.f32 %v5388_v42, %v13389_v17  ;;  %v5433_v44 = vmul.f32 %v5395_v11, %v13392_v30  ;;  %v5434_v49 = vmul.f32 %v5402_v9, %v13394_v13  ;;  %v5435_v41 = vmul.f32 %v5409_v12, %v13398_v23 }
 0xcb3   :  { %v5416_v32 = vrot.slane %v12097_v38, %v12378_v50  ;;  %v5463_v1 = vmul.f32 %v13423_v39, %v5431_v35  ;;  %v5521_v42 = vcombine.high %v5513_v14, %v5513_v14  ;;  %v5522_v11 = vcombine.high %v5520_v59, %v5520_v59 }
 0xcb4   :  { %v5464_v20 = vmul.f32 %v13423_v39, %v5432_v31  ;;  %v5465_v15 = vmul.f32 %v5453_v60, %v5433_v44  ;;  %v5466_v58 = vmul.f32 %v5452_v48, %v5434_v49  ;;  %v5467_v13 = vmul.f32 %v5454_v29, %v5435_v41 }
 0xcb5   :  { %v5436_v18 = vmul.f32 %v5416_v32, %v13396_v24  ;;  %v5495_v3 = vadd.f32 %v13427_v19, %v5463_v1  ;;  %v5575_v9 = vcombine.low %v5513_v14, %v5521_v42  ;;  %v5576_v12 = vcombine.low %v5520_v59, %v5522_v11 }
 0xcb6   :  { %v5496_v17 = vadd.f32 %v13427_v19, %v5464_v20  ;;  %v5497_v22 = vadd.f32 %v5485_v46, %v5465_v15  ;;  %v5498_v30 = vadd.f32 %v13430_v61, %v5466_v58  ;;  %v5499_v60 = vadd.f32 %v5486_v10, %v5467_v13  ;;  %v1859_v46 = vld [vmem:[#allocation5 + $0x168] sm:$0xff]  ;;  %v1860_v10 = vld [vmem:[#allocation5 + $0x170] sm:$0xff] }
 0xcb7   :  { %v5468_v23 = vmul.f32 %v13423_v39, %v5436_v18  ;;  %v1857_v39 = vld [vmem:[#allocation5 + $0x158] sm:$0xff]  ;;  %v11829_v27 = vpack.c.bf16 %v1860_v10, %v1859_v46  ;;  %v5583_v35 = vrot.slane %v5575_v9, %v12269_v7  ;;  %v5590_v38 = vrot.slane %v5576_v12, %v12269_v7 }
 0xcb8   :  { %v5550_v34 = vcombine.low %v5495_v3, %v5496_v17  ;;  %v5551_v26 = vcombine.low %v5497_v22, %v5498_v30 }
 0xcb9   :  { %v5500_v4 = vadd.f32 %v13427_v19, %v5468_v23  ;;  %v1858_v19 = vld [vmem:[#allocation5 + $0x160] sm:$0xff]  ;;  %v5591_v31 = vcombine.low %v5583_v35, %v5590_v38 }
 0xcba   :  { %v5558_v47 = vrot.slane %v5550_v34, %v12269_v7  ;;  %v5565_v48 = vrot.slane %v5551_v26, %v12269_v7  ;;  %v11826_v29 = vpack.c.bf16 %v1858_v19, %v1857_v39 }
 0xcbb   :  { %v5567_v8 = vcombine.low %v5499_v60, %v5500_v4  ;;  %v5592_v4 = vcombine.low %v5513_v14, %v5513_v14 }
 0xcbc   :  { %v5566_v24 = vcombine.low %v5558_v47, %v5565_v48  ;;  %11827 = vmatpush3.bf16.msra.mxu0 %v11826_v29  ;;  %v5593_v47 = vcombine.low %v5521_v42, %v5520_v59 }
 0xcbd   :  { %v5574_v61 = vrot.slane %v5567_v8, %v12269_v7  ;;  %11828 = vmatprep.subr.bf16.mxu0 %v12213_v0  ;;  %v5600_v48 = vrot.slane %v5592_v4, %v12269_v7  ;;  %v5609_v8 = vcombine.low %v5522_v11, %v5513_v14 }
 0xcbe   :  { %11434 = vmatmul.mubr.msk.f32.gmra.mrb[34].mxu1 %vm1866_vm6, %v5566_v24  ;;  %v5607_v60 = vrot.slane %v5593_v47, %v12269_v7 }
 0xcbf   :  { %11436 = vmatprep.mubr.msk.f32.mxu1 %vm12214_vm0, %v12215_v2  ;;  %v5616_v29 = vrot.slane %v5609_v8, %v12269_v7 }
 0xcc0   :  { %11830 = vmatpush3.bf16.msra.mxu0 %v11829_v27  ;;  %v5608_v24 = vcombine.low %v5600_v48, %v5607_v60 }
 0xcc1   :  { %11831 = vmatprep.subr.bf16.mxu0 %v12213_v0 }
 0xcc2   :  { %11437 = vmatmul.mubr.msk.f32.gmra.mrb[36].mxu1 %vm1866_vm6, %v5574_v61 }
 0xcc3   :  { %11472 = vmatprep.mubr.msk.f32.mxu1 %vm12214_vm0, %v12215_v2 }
 0xcc4   :  { %11833 = vmatpush3.bf16.msra.mxu0 %v11832_v45 }
 0xcc5   :  { %11834 = vmatprep.subr.bf16.mxu0 %v12213_v0 }
 0xcc8   :  { %11836 = vmatpush3.bf16.msra.mxu0 %v11835_v63 }
 0xd60   :  { %v5692_v44 = vpop.f32.mrb[32].mxu1 }
 0xd61   :  { %v5693_v49 = vadd.f32 %v5692_v44, %v5591_v31  ;;  %v11432_v41 = vpop.f32.mrb[33].mxu1 }
 0xd63   :  { %v5709_v32 = vcombine.high %v5693_v49, %v5693_v49  ;;  %v5716_v1 = vrot.slane %v5693_v49, %v12269_v7 }
 0xd65   :  { %v5723_v20 = vrot.slane %v5709_v32, %v12269_v7  ;;  %v5724_v15 = vcombine.high %v5716_v1, %v5716_v1  ;;  %v5761_v18 = vmax.f32 %v5716_v1, 0.0 }
 0xd67   :  { %v5725_v58 = vcombine.high %v5723_v20, %v5723_v20  ;;  %v5762_v3 = vmax.f32 %v5724_v15, 0.0  ;;  %v5763_v17 = vmax.f32 %v5723_v20, 0.0 }
 0xd69   :  { %v5764_v22 = vmax.f32 %v5725_v58, 0.0  ;;  %v5781_v30 = vcombine.low %v5761_v18, %v5762_v3 }
 0xd6b   :  { %v5782_v13 = vcombine.low %v5763_v17, %v5764_v22  ;;  %v5789_v23 = vrot.slane %v5781_v30, %v12269_v7 }
 0xd6d   :  { %v5796_v34 = vrot.slane %v5782_v13, %v12269_v7 }
 0xd6f   :  { %v5797_v26 = vcombine.low %v5789_v23, %v5796_v34  ;;  %v5133_v23 = vadd.f32 %v13326_v56, %v12720_v33 }
 0xd71   :  { %11456 = vmatmul.mubr.msk.f32.vlgmr.msra.gmra.mrb[42].mxu0 %vm414_vm3, %v5797_v26  ;;  %v10849_v26 = vld [vmem:[#allocation5 + $0x198] ss:$0 sm:$0xff] }
 0xd72   :  { %11458 = vmatprep.mubr.msk.f32.mxu0 %vm12214_vm0, %v12215_v2 }
 0xd91   :  { %v5697_v61 = vpop.f32.mrb[34].mxu1 }
 0xd92   :  { %v5698_v39 = vadd.f32 %v5697_v61, %v5608_v24  ;;  %v11435_v19 = vpop.f32.mrb[35].mxu1 }
 0xd94   :  { %v5726_v46 = vcombine.high %v5698_v39, %v5698_v39  ;;  %v5733_v10 = vrot.slane %v5698_v39, %v12269_v7  ;;  %v5134_v39 = vadd.f32 %v13354_v16, %v12735_v62 }
 0xd95   :  { %v5702_v27 = vpop.f32.mrb[36].mxu1 }
 0xd96   :  { %v5740_v6 = vrot.slane %v5726_v46, %v12269_v7  ;;  %v5741_v28 = vcombine.high %v5733_v10, %v5733_v10  ;;  %v5703_v45 = vadd.f32 %v5702_v27, %v5616_v29  ;;  %v11438_v57 = vpop.f32.mrb[37].mxu1  ;;  %v5765_v63 = vmax.f32 %v5733_v10, 0.0 }
 0xd98   :  { %v5742_v21 = vcombine.high %v5740_v6, %v5740_v6  ;;  %v5766_v55 = vmax.f32 %v5741_v28, 0.0  ;;  %v5749_v25 = vrot.slane %v5703_v45, %v12269_v7  ;;  %v5767_v14 = vmax.f32 %v5740_v6, 0.0 }
 0xd9a   :  { %v5768_v59 = vmax.f32 %v5742_v21, 0.0  ;;  %v5798_v42 = vcombine.low %v5765_v63, %v5766_v55  ;;  %v5750_v11 = vcombine.high %v5749_v25, %v5749_v25  ;;  %v5769_v38 = vmax.f32 %v5749_v25, 0.0 }
 0xd9b   :  { %v5136_v63 = vadd.f32 %v13342_v37, %v12727_v54 }
 0xd9c   :  { %v5799_v9 = vcombine.low %v5767_v14, %v5768_v59  ;;  %v5770_v12 = vmax.f32 %v5750_v11, 0.0  ;;  %v5806_v35 = vrot.slane %v5798_v42, %v12269_v7  ;;  %v5135_v14 = vadd.f32 %v13349_v40, %v12730_v5 }
 0xd9e   :  { %v5813_v31 = vrot.slane %v5799_v9, %v12269_v7  ;;  %v5815_v44 = vcombine.low %v5769_v38, %v5770_v12 }
 0xda0   :  { %v5814_v49 = vcombine.low %v5806_v35, %v5813_v31  ;;  %v5822_v41 = vrot.slane %v5815_v44, %v12269_v7 }
 0xda2   :  { %11459 = vmatmul.mubr.msk.f32.gmra.mrb[44].mxu0 %vm414_vm3, %v5814_v49 }
 0xda3   :  { %11461 = vmatprep.mubr.msk.f32.mxu0 %vm12214_vm0, %v12215_v2 }
 0xda6   :  { %11462 = vmatmul.mubr.msk.f32.gmra.mrb[46].mxu0 %vm414_vm3, %v5822_v41 }
 0xe44   :  { %v5895_v32 = vpop.f32.mrb[42].mxu0 }
 0xe45   :  { %v5912_v1 = vcombine.high %v5895_v32, %v5895_v32  ;;  %v5919_v20 = vrot.slane %v5895_v32, %v12269_v7  ;;  %v11457_v15 = vpop.f32.mrb[43].mxu0 }
 0xe46   :  { %v6019_v15 = vld [vmem:[#allocation5 + $0x1a8] sm:$0xff] }
 0xe47   :  { %v5926_v58 = vrot.slane %v5912_v1, %v12269_v7  ;;  %v5927_v18 = vcombine.high %v5919_v20, %v5919_v20 }
 0xe49   :  { %v5928_v3 = vcombine.high %v5926_v58, %v5926_v58  ;;  %v5954_v17 = vcombine.low %v5919_v20, %v5927_v18  ;;  %v6018_v20 = vld [vmem:[#allocation5 + $0x1a0] sm:$0xff] }
 0xe4b   :  { %v5955_v22 = vcombine.low %v5926_v58, %v5928_v3  ;;  %v5962_v30 = vrot.slane %v5954_v17, %v12269_v7  ;;  %v6020_v58 = vld [vmem:[#allocation5 + $0x1b0] sm:$0xff]  ;;  %v11838_v3 = vpack.c.bf16 %v6019_v15, %v6018_v20  ;;  %v6021_v17 = vld [vmem:[#allocation5 + $0x1b8] sm:$0xff] }
 0xe4d   :  { %v5969_v13 = vrot.slane %v5955_v22, %v12269_v7  ;;  %11839 = vmatpush3.bf16.msra.mxu1 %v11838_v3 }
 0xe4e   :  { %11840 = vmatprep.subr.bf16.mxu1 %v12213_v0 }
 0xe4f   :  { %v5970_v34 = vcombine.low %v5962_v30, %v5969_v13  ;;  %v11841_v30 = vpack.c.bf16 %v6021_v17, %v6020_v58 }
 0xe51   :  { %v6006_v4 = vadd.f32 %v5970_v34, %v5133_v23  ;;  %11842 = vmatpush3.bf16.msra.mxu1 %v11841_v30 }
 0xe53   :  { %v13515_v47 = vadd.f32 %v10849_v26, %v6006_v4 }
 0xe55   :  { %v6044_v48 = vsel %vm1866_vm6, %v13515_v47, 0.0 }
 0xe56   :  { %6045 = vadd.xlane.f32.xlu0 %v6044_v48 }
 0xe75   :  { %v5900_v60 = vpop.f32.mrb[44].mxu0 }
 0xe76   :  { %v5929_v24 = vcombine.high %v5900_v60, %v5900_v60  ;;  %v5936_v8 = vrot.slane %v5900_v60, %v12269_v7  ;;  %v11460_v61 = vpop.f32.mrb[45].mxu0 }
 0xe78   :  { %v5943_v19 = vrot.slane %v5929_v24, %v12269_v7  ;;  %v5944_v33 = vcombine.high %v5936_v8, %v5936_v8  ;;  %v5977_v56 = vrot.slane %v5936_v8, %v12269_v7 }
 0xe79   :  { %v5905_v29 = vpop.f32.mrb[46].mxu0 }
 0xe7a   :  { %v5978_v46 = vcombine.low %v5944_v33, %v5943_v19  ;;  %v5945_v10 = vcombine.high %v5943_v19, %v5943_v19  ;;  %v5952_v27 = vrot.slane %v5905_v29, %v12269_v7  ;;  %v11463_v6 = vpop.f32.mrb[47].mxu0  ;;  %v6007_v28 = vadd.f32 %v5977_v56, %v5134_v39  ;;  %v10850_v33 = vld [vmem:[#allocation5 + $0x1f0] ss:$0 sm:$0xff]  ;;  %v10851_v29 = vld [vmem:[#allocation5 + $0x1f8] ss:$0 sm:$0xff] }
 0xe7c   :  { %v5953_v45 = vcombine.high %v5952_v27, %v5952_v27  ;;  %v5979_v57 = vcombine.low %v5945_v10, %v5952_v27  ;;  %v6015_v21 = vadd.f32 %v10849_v26, %v6007_v28  ;;  %v5986_v62 = vrot.slane %v5978_v46, %v12269_v7 }
 0xe7e   :  { %v5993_v16 = vrot.slane %v5979_v57, %v12269_v7  ;;  %v6001_v55 = vrot.slane %v5953_v45, %v12269_v7  ;;  %v6047_v25 = vsel %vm1870_vm7, %v6015_v21, 0.0 }
 0xe7f   :  { %6048 = vadd.xlane.f32.xlu0 %v6047_v25 }
 0xe80   :  { %v5994_v59 = vcombine.low %v5986_v62, %v5993_v16  ;;  %v6009_v42 = vadd.f32 %v6001_v55, %v5136_v63 }
 0xe82   :  { %v6008_v11 = vadd.f32 %v5994_v59, %v5135_v14  ;;  %v6017_v37 = vadd.f32 %v10849_v26, %v6009_v42 }
 0xe84   :  { %v13533_v9 = vadd.f32 %v10849_v26, %v6008_v11  ;;  %v6053_v12 = vsel %vm1870_vm7, %v6017_v37, 0.0 }
 0xe86   :  { %v6050_v54 = vsel %vm1866_vm6, %v13533_v9, 0.0 }
 0xe87   :  { %6051 = vadd.xlane.f32.xlu1 %v6050_v54 }
 0xe8b   :  { %6054 = vadd.xlane.f32.xlu1 %v6053_v12 }
 0xee3   :  { %v6046_v35 = vpop.xlane.xlu0 %6045 }
 0xee4   :  { %v6056_v38 = vmul.f32 0.03125, %v6046_v35 }
 0xee6   :  { %v6060_v31 = vsub.f32 %v13515_v47, %v6056_v38 }
 0xee8   :  { %v6064_v44 = vmul.f32 %v6060_v31, %v6060_v31 }
 0xeea   :  { %v6068_v5 = vsel %vm1866_vm6, %v6064_v44, 0.0 }
 0xeeb   :  { %6069 = vadd.xlane.f32.xlu0 %v6068_v5 }
 0xf0c   :  { %v6049_v40 = vpop.xlane.xlu0 %6048 }
 0xf0d   :  { %v6057_v49 = vmul.f32 0.03125, %v6049_v40 }
 0xf0f   :  { %v6061_v41 = vsub.f32 %v6015_v21, %v6057_v49 }
 0xf11   :  { %v6065_v32 = vmul.f32 %v6061_v41, %v6061_v41 }
 0xf13   :  { %v6071_v1 = vsel %vm1870_vm7, %v6065_v32, 0.0 }
 0xf14   :  { %6072 = vadd.xlane.f32.xlu0 %v6071_v1  ;;  %v6052_v18 = vpop.xlane.xlu1 %6051 }
 0xf15   :  { %v6058_v22 = vmul.f32 0.03125, %v6052_v18 }
 0xf17   :  { %v6062_v13 = vsub.f32 %v13533_v9, %v6058_v22 }
 0xf18   :  { %v6055_v23 = vpop.xlane.xlu1 %6054 }
 0xf19   :  { %v6059_v34 = vmul.f32 0.03125, %v6055_v23  ;;  %v6066_v26 = vmul.f32 %v6062_v13, %v6062_v13 }
 0xf1b   :  { %v6063_v4 = vsub.f32 %v6017_v37, %v6059_v34  ;;  %v6074_v48 = vsel %vm1866_vm6, %v6066_v26, 0.0 }
 0xf1c   :  { %6075 = vadd.xlane.f32.xlu1 %v6074_v48 }
 0xf1d   :  { %v6067_v60 = vmul.f32 %v6063_v4, %v6063_v4 }
 0xf1f   :  { %v6077_v24 = vsel %vm1870_vm7, %v6067_v60, 0.0 }
 0xf20   :  { %6078 = vadd.xlane.f32.xlu1 %v6077_v24 }
 0xf78   :  { %v6070_v8 = vpop.xlane.xlu0 %6069 }
 0xf79   :  { %v6080_v61 = vmul.f32 0.03125, %v6070_v8 }
 0xf7b   :  { %v6084_v39 = vadd.f32 1e-05, %v6080_v61  ;;  %v10852_v61 = vld [vmem:[#allocation5 + $0x1c0] ss:$0 sm:$0xff] }
 0xf7d   :  { %12098 = vrsqrt.f32 %v6084_v39  ;;  %v6169_v39 = vcombine.high %v10852_v61, %v10852_v61 }
 0xf87   :  { %v12099_v19 = vpop.eup %12098 }
 0xf88   :  { %v6092_v56 = vmul.f32 %v12099_v19, %v6060_v31  ;;  %v6176_v19 = vrot.slane %v10852_v61, %v12269_v7 }
 0xf8a   :  { %v6100_v46 = vmul.f32 %v10850_v33, %v6092_v56  ;;  %v6184_v56 = vcombine.high %v6176_v19, %v6176_v19 }
 0xf8c   :  { %v6108_v10 = vadd.f32 %v10851_v29, %v6100_v46  ;;  %v6228_v46 = vcombine.low %v6176_v19, %v6184_v56 }
 0xf8e   :  { %v6120_v27 = vcombine.high %v6108_v10, %v6108_v10  ;;  %v6127_v6 = vrot.slane %v6108_v10, %v12269_v7 }
 0xf90   :  { %v6134_v28 = vrot.slane %v6120_v27, %v12269_v7  ;;  %v6135_v45 = vcombine.high %v6127_v6, %v6127_v6  ;;  %v6236_v27 = vrot.slane %v6228_v46, %v12269_v7 }
 0xf92   :  { %v6136_v57 = vcombine.high %v6134_v28, %v6134_v28  ;;  %v6186_v21 = vcombine.low %v6127_v6, %v6135_v45 }
 0xf94   :  { %v6187_v63 = vcombine.low %v6134_v28, %v6136_v57  ;;  %v6194_v62 = vrot.slane %v6186_v21, %v12269_v7 }
 0xf96   :  { %v6201_v16 = vrot.slane %v6187_v63, %v12269_v7 }
 0xf98   :  { %v6202_v55 = vcombine.low %v6194_v62, %v6201_v16 }
 0xf9a   :  { %11473 = vmatmul.mubr.msk.f32.vlgmr.msra.gmra.mrb[38].mxu1 %vm1866_vm6, %v6202_v55 }
 0xf9b   :  { %11475 = vmatprep.mubr.msk.f32.mxu1 %vm12214_vm0, %v12215_v2 }
 0xfa1   :  { %v6073_v25 = vpop.xlane.xlu0 %6072 }
 0xfa2   :  { %v6081_v14 = vmul.f32 0.03125, %v6073_v25 }
 0xfa4   :  { %v6085_v59 = vadd.f32 1e-05, %v6081_v14 }
 0xfa6   :  { %12100 = vrsqrt.f32 %v6085_v59 }
 0xfa9   :  { %v6076_v42 = vpop.xlane.xlu1 %6075 }
 0xfaa   :  { %v6082_v11 = vmul.f32 0.03125, %v6076_v42 }
 0xfac   :  { %v6086_v54 = vadd.f32 1e-05, %v6082_v11 }
 0xfad   :  { %v6079_v37 = vpop.xlane.xlu1 %6078 }
 0xfae   :  { %12102 = vrsqrt.f32 %v6086_v54  ;;  %v6083_v12 = vmul.f32 0.03125, %v6079_v37 }
 0xfb0   :  { %v12101_v35 = vpop.eup %12100  ;;  %v6087_v38 = vadd.f32 1e-05, %v6083_v12  ;;  %v6245_v12 = vcombine.low %v6176_v19, %v6176_v19 }
 0xfb1   :  { %v6093_v31 = vmul.f32 %v12101_v35, %v6061_v41 }
 0xfb2   :  { %12104 = vrsqrt.f32 %v6087_v38  ;;  %v6253_v38 = vrot.slane %v6245_v12, %v12269_v7 }
 0xfb3   :  { %v6101_v44 = vmul.f32 %v10850_v33, %v6093_v31 }
 0xfb5   :  { %v6109_v32 = vadd.f32 %v10851_v29, %v6101_v44 }
 0xfb7   :  { %v6143_v18 = vrot.slane %v6109_v32, %v12269_v7 }
 0xfb8   :  { %v12103_v5 = vpop.eup %12102 }
 0xfb9   :  { %v6094_v40 = vmul.f32 %v12103_v5, %v6062_v13 }
 0xfbb   :  { %v6102_v49 = vmul.f32 %v10850_v33, %v6094_v40 }
 0xfbc   :  { %v12105_v1 = vpop.eup %12104 }
 0xfbd   :  { %v6095_v20 = vmul.f32 %v12105_v1, %v6063_v4  ;;  %v6110_v15 = vadd.f32 %v10851_v29, %v6102_v49 }
 0xfbf   :  { %v6103_v58 = vmul.f32 %v10850_v33, %v6095_v20  ;;  %v6144_v3 = vcombine.high %v6110_v15, %v6110_v15  ;;  %v6151_v17 = vrot.slane %v6110_v15, %v12269_v7  ;;  %v6183_v33 = vrot.slane %v6169_v39, %v12269_v7 }
 0xfc1   :  { %v6158_v22 = vrot.slane %v6144_v3, %v12269_v7  ;;  %v6159_v30 = vcombine.high %v6151_v17, %v6151_v17  ;;  %v6203_v23 = vcombine.low %v6143_v18, %v6151_v17  ;;  %v6111_v34 = vadd.f32 %v10851_v29, %v6103_v58 }
 0xfc2   :  { %v6185_v29 = vcombine.high %v6183_v33, %v6183_v33  ;;  %v6246_v35 = vcombine.low %v6184_v56, %v6183_v33 }
 0xfc3   :  { %v6204_v41 = vcombine.low %v6159_v30, %v6158_v22  ;;  %v6160_v26 = vcombine.high %v6158_v22, %v6158_v22  ;;  %v6167_v13 = vrot.slane %v6111_v34, %v12269_v7  ;;  %v6211_v48 = vrot.slane %v6203_v23, %v12269_v7 }
 0xfc4   :  { %v6229_v10 = vcombine.low %v6183_v33, %v6185_v29  ;;  %v6260_v31 = vrot.slane %v6246_v35, %v12269_v7  ;;  %v6262_v5 = vcombine.low %v6185_v29, %v6176_v19 }
 0xfc5   :  { %v6218_v4 = vrot.slane %v6204_v41, %v12269_v7  ;;  %v6220_v24 = vcombine.low %v6160_v26, %v6167_v13 }
 0xfc6   :  { %v6243_v6 = vrot.slane %v6229_v10, %v12269_v7  ;;  %v6261_v44 = vcombine.low %v6253_v38, %v6260_v31  ;;  %v6269_v1 = vrot.slane %v6262_v5, %v12269_v7 }
 0xfc7   :  { %v6219_v60 = vcombine.low %v6211_v48, %v6218_v4  ;;  %v6227_v8 = vrot.slane %v6220_v24, %v12269_v7 }
 0xfc8   :  { %v6244_v28 = vcombine.low %v6236_v27, %v6243_v6 }
 0xfc9   :  { %11476 = vmatmul.mubr.msk.f32.gmra.mrb[40].mxu1 %vm1866_vm6, %v6219_v60 }
 0xfca   :  { %11478 = vmatprep.mubr.msk.f32.mxu1 %vm12214_vm0, %v12215_v2 }
 0xfcd   :  { %11479 = vmatmul.mubr.msk.f32.gmra.mrb[42].mxu1 %vm1866_vm6, %v6227_v8 }
0x106d   :  { %v6345_v45 = vpop.f32.mrb[38].mxu1 }
0x106e   :  { %v6346_v57 = vadd.f32 %v6345_v45, %v6244_v28  ;;  %v11474_v21 = vpop.f32.mrb[39].mxu1 }
0x1070   :  { %v6362_v63 = vcombine.high %v6346_v57, %v6346_v57  ;;  %v6369_v62 = vrot.slane %v6346_v57, %v12269_v7 }
0x1072   :  { %v6376_v16 = vrot.slane %v6362_v63, %v12269_v7  ;;  %v6377_v55 = vcombine.high %v6369_v62, %v6369_v62 }
0x1074   :  { %v6378_v25 = vcombine.high %v6376_v16, %v6376_v16  ;;  %v6404_v14 = vcombine.low %v6369_v62, %v6377_v55 }
0x1076   :  { %v6405_v59 = vcombine.low %v6376_v16, %v6378_v25  ;;  %v6412_v42 = vrot.slane %v6404_v14, %v12269_v7 }
0x1078   :  { %v6419_v11 = vrot.slane %v6405_v59, %v12269_v7 }
0x107a   :  { %v13571_v54 = vcombine.low %v6412_v42, %v6419_v11 }
0x107c   :  { %6456 = vst.msk [vmem:[#allocation2] sm:$0xff] %vm2281_vm9, %v13571_v54 }
0x1083   :  { %v6636_v37 = vld [vmem:[#allocation2] sm:$0xff] }
0x1084   :  { %11485 = vmatprep.mubr.msk.f32.mxu0 %vm2281_vm9, %v6636_v37 }
0x109c   :  { %v6350_v40 = vpop.f32.mrb[40].mxu1 }
0x109d   :  { %v6351_v49 = vadd.f32 %v6350_v40, %v6261_v44  ;;  %v11477_v32 = vpop.f32.mrb[41].mxu1 }
0x109f   :  { %v6379_v20 = vcombine.high %v6351_v49, %v6351_v49  ;;  %v6386_v15 = vrot.slane %v6351_v49, %v12269_v7 }
0x10a0   :  { %v6355_v58 = vpop.f32.mrb[42].mxu1 }
0x10a1   :  { %v6393_v18 = vrot.slane %v6379_v20, %v12269_v7  ;;  %v6394_v3 = vcombine.high %v6386_v15, %v6386_v15  ;;  %v13582_v17 = vrot.slane %v6386_v15, %v12269_v7  ;;  %v6356_v22 = vadd.f32 %v6355_v58, %v6269_v1  ;;  %v11480_v30 = vpop.f32.mrb[43].mxu1 }
0x10a3   :  { %v6428_v23 = vcombine.low %v6394_v3, %v6393_v18  ;;  %6457 = vst.msk [vmem:[#allocation2 + $0x8] sm:$0x3] %vm2283_vm8, %v13582_v17  ;;  %v6395_v34 = vcombine.high %v6393_v18, %v6393_v18  ;;  %v6402_v41 = vrot.slane %v6356_v22, %v12269_v7  ;;  %6510 = vrot.lane.b32.xlu0 %v13582_v17, %s12222_s30 }
0x10a4   :  { %6462 = vrot.lane.b32.xlu1 %v13582_v17, %s12223_s3 }
0x10a5   :  { %v6403_v26 = vcombine.high %v6402_v41, %v6402_v41  ;;  %v6429_v13 = vcombine.low %v6395_v34, %v6402_v41  ;;  %v6436_v48 = vrot.slane %v6428_v23, %v12269_v7 }
0x10a7   :  { %v6443_v4 = vrot.slane %v6429_v13, %v12269_v7  ;;  %v13594_v60 = vrot.slane %v6403_v26, %v12269_v7  ;;  %6558 = vrot.lane.b32.xlu0 %v13582_v17, %s12224_s4 }
0x10a8   :  { %6508 = vrot.lane.b32.xlu1 %v13571_v54, %s12222_s30 }
0x10a9   :  { %v13600_v24 = vcombine.low %v6436_v48, %v6443_v4  ;;  %6459 = vst.msk [vmem:[#allocation2 + $0x18] sm:$0x3] %vm2283_vm8, %v13594_v60 }
0x10aa   :  { %v6637_v37 = vld [vmem:[#allocation2 + $0x8] sm:$0x3] }
0x10ab   :  { %6458 = vst.msk [vmem:[#allocation2 + $0x10] sm:$0xff] %vm2281_vm9, %v13600_v24  ;;  %6460 = vrot.lane.b32.xlu0 %v13571_v54, %s12223_s3 }
0x10ac   :  { %6556 = vrot.lane.b32.xlu1 %v13571_v54, %s12224_s4 }
0x10af   :  { %6494 = vrot.lane.b32.xlu0 %v13582_v17, %s12225_s5 }
0x10b0   :  { %6492 = vrot.lane.b32.xlu1 %v13571_v54, %s12225_s5  ;;  %v6639_v58 = vld [vmem:[#allocation2 + $0x18] sm:$0x3] }
0x10b2   :  { %v6638_v8 = vld [vmem:[#allocation2 + $0x10] sm:$0xff] }
0x10b3   :  { %11492 = vmatprep.mubr.msk.f32.mxu1 %vm2281_vm9, %v6638_v8  ;;  %6466 = vrot.lane.b32.xlu0 %v13594_v60, %s12223_s3 }
0x10b4   :  { %6464 = vrot.lane.b32.xlu1 %v13600_v24, %s12223_s3 }
0x10b7   :  { %6514 = vrot.lane.b32.xlu0 %v13594_v60, %s12222_s30 }
0x10b8   :  { %6540 = vrot.lane.b32.xlu1 %v13571_v54, %s12226_s6 }
0x10bb   :  { %6562 = vrot.lane.b32.xlu0 %v13594_v60, %s12224_s4 }
0x10bc   :  { %6512 = vrot.lane.b32.xlu1 %v13600_v24, %s12222_s30 }
0x10bf   :  { %6498 = vrot.lane.b32.xlu0 %v13594_v60, %s12225_s5 }
0x10c0   :  { %6560 = vrot.lane.b32.xlu1 %v13600_v24, %s12224_s4 }
0x10c3   :  { %6542 = vrot.lane.b32.xlu0 %v13582_v17, %s12226_s6 }
0x10c4   :  { %6496 = vrot.lane.b32.xlu1 %v13600_v24, %s12225_s5 }
0x10c7   :  { %6606 = vrot.lane.b32.xlu0 %v13582_v17, %s12227_s7 }
0x10c8   :  { %6604 = vrot.lane.b32.xlu1 %v13571_v54, %s12227_s7 }
0x10cb   :  { %6546 = vrot.lane.b32.xlu0 %v13594_v60, %s12226_s6 }
0x10cc   :  { %6544 = vrot.lane.b32.xlu1 %v13600_v24, %s12226_s6 }
0x10cf   :  { %6610 = vrot.lane.b32.xlu0 %v13594_v60, %s12227_s7 }
0x10d0   :  { %6608 = vrot.lane.b32.xlu1 %v13600_v24, %s12227_s7 }
0x10d3   :  { %6590 = vrot.lane.b32.xlu0 %v13582_v17, %s12228_s8 }
0x10d4   :  { %6588 = vrot.lane.b32.xlu1 %v13571_v54, %s12228_s8 }
0x10d7   :  { %6594 = vrot.lane.b32.xlu0 %v13594_v60, %s12228_s8 }
0x10d8   :  { %6592 = vrot.lane.b32.xlu1 %v13600_v24, %s12228_s8 }
0x10db   :  { %6476 = vrot.lane.b32.xlu0 %v13571_v54, %s12217_s0 }
0x10dc   :  { %6478 = vrot.lane.b32.xlu1 %v13582_v17, %s12217_s0 }
0x10df   :  { %6526 = vrot.lane.b32.xlu0 %v13582_v17, %s12229_s9 }
0x10e0   :  { %6524 = vrot.lane.b32.xlu1 %v13571_v54, %s12229_s9 }
0x10e3   :  { %6482 = vrot.lane.b32.xlu0 %v13594_v60, %s12217_s0 }
0x10e4   :  { %6574 = vrot.lane.b32.xlu1 %v13582_v17, %s12230_s10 }
0x10e7   :  { %6572 = vrot.lane.b32.xlu0 %v13571_v54, %s12230_s10 }
0x10e8   :  { %6480 = vrot.lane.b32.xlu1 %v13600_v24, %s12217_s0 }
0x10eb   :  { %6530 = vrot.lane.b32.xlu0 %v13594_v60, %s12229_s9 }
0x10ec   :  { %6528 = vrot.lane.b32.xlu1 %v13600_v24, %s12229_s9 }
0x10f0   :  { %6576 = vrot.lane.b32.xlu1 %v13600_v24, %s12230_s10 }
0x1115   :  { %v6511_v61 = vpop.permute.xlu0 %6510 }
0x1116   :  { %v6463_v39 = vpop.permute.xlu1 %6462  ;;  %6521 = vst.msk [vmem:[#allocation3 + $0x28] sm:$0x3] %vm2283_vm8, %v6511_v61 }
0x1117   :  { %6473 = vst.msk [vmem:[#allocation3 + $0x8] sm:$0x3] %vm2283_vm8, %v6463_v39 }
0x1119   :  { %v6559_v19 = vpop.permute.xlu0 %6558 }
0x111a   :  { %v6509_v33 = vpop.permute.xlu1 %6508  ;;  %6569 = vst.msk [vmem:[#allocation3 + $0x48] sm:$0x3] %vm2283_vm8, %v6559_v19 }
0x111b   :  { %6520 = vst.msk [vmem:[#allocation3 + $0x20] sm:$0xff] %vm2281_vm9, %v6509_v33 }
0x111d   :  { %v6461_v56 = vpop.permute.xlu0 %6460  ;;  %v6657_v63 = vld [vmem:[#allocation3 + $0x28] sm:$0x3] }
0x111e   :  { %v6557_v29 = vpop.permute.xlu1 %6556  ;;  %6472 = vst.msk [vmem:[#allocation3] sm:$0xff] %vm2281_vm9, %v6461_v56  ;;  %v6653_v28 = vld [vmem:[#allocation3 + $0x8] sm:$0x3] }
0x111f   :  { %6568 = vst.msk [vmem:[#allocation3 + $0x40] sm:$0xff] %vm2281_vm9, %v6557_v29 }
0x1121   :  { %v6495_v46 = vpop.permute.xlu0 %6494  ;;  %v6661_v35 = vld [vmem:[#allocation3 + $0x48] sm:$0x3] }
0x1122   :  { %v6493_v10 = vpop.permute.xlu1 %6492  ;;  %6505 = vst.msk [vmem:[#allocation2 + $0x28] sm:$0x3] %vm2283_vm8, %v6495_v46  ;;  %v6656_v45 = vld [vmem:[#allocation3 + $0x20] sm:$0xff] }
0x1123   :  { %6504 = vst.msk [vmem:[#allocation2 + $0x20] sm:$0xff] %vm2281_vm9, %v6493_v10  ;;  %v11855_v62 = vpack.c.bf16 %v6657_v63, %v6656_v45 }
0x1125   :  { %v6652_v6 = vld [vmem:[#allocation3] sm:$0xff]  ;;  %v6467_v57 = vpop.permute.xlu0 %6466 }
0x1126   :  { %v6465_v27 = vpop.permute.xlu1 %6464  ;;  %v11843_v21 = vpack.c.bf16 %v6653_v28, %v6652_v6  ;;  %6475 = vst.msk [vmem:[#allocation3 + $0x18] sm:$0x3] %vm2283_vm8, %v6467_v57  ;;  %v6660_v11 = vld [vmem:[#allocation3 + $0x40] sm:$0xff] }
0x1127   :  { %6474 = vst.msk [vmem:[#allocation3 + $0x10] sm:$0xff] %vm2281_vm9, %v6465_v27  ;;  %v11867_v44 = vpack.c.bf16 %v6661_v35, %v6660_v11 }
0x1128   :  { %11845 = vmatprep.subr.msk.bf16.mxu0 %vm12890_vm10, %v11843_v21 }
0x1129   :  { %11848 = vmatpush3.bf16.xpose.msk.msra.mxu0 %vm12890_vm10, %v11843_v21  ;;  %v6515_v55 = vpop.permute.xlu0 %6514  ;;  %v6641_v15 = vld [vmem:[#allocation2 + $0x28] sm:$0x3] }
0x112a   :  { %v6541_v16 = vpop.permute.xlu1 %6540  ;;  %11857 = vmatprep.subr.msk.bf16.mxu0 %vm12890_vm10, %v11855_v62  ;;  %6523 = vst.msk [vmem:[#allocation3 + $0x38] sm:$0x3] %vm2283_vm8, %v6515_v55  ;;  %v6640_v38 = vld [vmem:[#allocation2 + $0x20] sm:$0xff] }
0x112b   :  { %6552 = vst.msk [vmem:[#allocation2 + $0x40] sm:$0xff] %vm2281_vm9, %v6541_v16 }
0x112d   :  { %v6563_v59 = vpop.permute.xlu0 %6562  ;;  %v6655_v42 = vld [vmem:[#allocation3 + $0x18] sm:$0x3] }
0x112e   :  { %v6513_v25 = vpop.permute.xlu1 %6512  ;;  %v6654_v14 = vld [vmem:[#allocation3 + $0x10] sm:$0xff]  ;;  %6571 = vst.msk [vmem:[#allocation3 + $0x58] sm:$0x3] %vm2283_vm8, %v6563_v59 }
0x112f   :  { %6522 = vst.msk [vmem:[#allocation3 + $0x30] sm:$0xff] %vm2281_vm9, %v6513_v25  ;;  %v11849_v12 = vpack.c.bf16 %v6655_v42, %v6654_v14 }
0x1130   :  { %11486 = vmatmul.mubr.msk.f32.vlgmr.msra.gmra.mrb[48].mxu0 %vm2281_vm9, %v6637_v37 }
0x1131   :  { %11851 = vmatprep.subr.msk.bf16.mxu1 %vm12890_vm10, %v11849_v12  ;;  %11860 = vmatpush3.bf16.xpose.msk.msra.mxu0 %vm12890_vm10, %v11855_v62  ;;  %v6499_v5 = vpop.permute.xlu0 %6498  ;;  %v6659_v32 = vld [vmem:[#allocation3 + $0x38] sm:$0x3] }
0x1132   :  { %v6561_v31 = vpop.permute.xlu1 %6560  ;;  %11854 = vmatpush3.bf16.xpose.msk.msra.mxu1 %vm12890_vm10, %v11849_v12  ;;  %11499 = vmatprep.mubr.msk.f32.mxu0 %vm2281_vm9, %v6640_v38  ;;  %6507 = vst.msk [vmem:[#allocation2 + $0x38] sm:$0x3] %vm2283_vm8, %v6499_v5  ;;  %v6644_v18 = vld [vmem:[#allocation2 + $0x40] sm:$0xff] }
0x1133   :  { %6570 = vst.msk [vmem:[#allocation3 + $0x50] sm:$0xff] %vm2281_vm9, %v6561_v31  ;;  %11869 = vmatprep.subr.msk.bf16.mxu0 %vm12890_vm10, %v11867_v44 }
0x1135   :  { %v6543_v1 = vpop.permute.xlu0 %6542  ;;  %v6663_v30 = vld [vmem:[#allocation3 + $0x58] sm:$0x3] }
0x1136   :  { %v6497_v40 = vpop.permute.xlu1 %6496  ;;  %v6658_v49 = vld [vmem:[#allocation3 + $0x30] sm:$0xff]  ;;  %6553 = vst.msk [vmem:[#allocation2 + $0x48] sm:$0x3] %vm2283_vm8, %v6543_v1 }
0x1137   :  { %6506 = vst.msk [vmem:[#allocation2 + $0x30] sm:$0xff] %vm2281_vm9, %v6497_v40  ;;  %v11861_v20 = vpack.c.bf16 %v6659_v32, %v6658_v49 }
0x1138   :  { %11500 = vmatmul.mubr.msk.f32.vlgmr.msra.gmra.mrb[50].mxu0 %vm2281_vm9, %v6641_v15 }
0x1139   :  { %11863 = vmatprep.subr.msk.bf16.mxu1 %vm12890_vm10, %v11861_v20  ;;  %11493 = vmatmul.mubr.msk.f32.vlgmr.msra.gmra.mrb[44].mxu1 %vm2281_vm9, %v6639_v58  ;;  %v6607_v23 = vpop.permute.xlu0 %6606  ;;  %v6643_v4 = vld [vmem:[#allocation2 + $0x38] sm:$0x3] }
0x113a   :  { %11872 = vmatpush3.bf16.xpose.msk.msra.mxu0 %vm12890_vm10, %v11867_v44  ;;  %v6605_v3 = vpop.permute.xlu1 %6604  ;;  %v6662_v22 = vld [vmem:[#allocation3 + $0x50] sm:$0xff]  ;;  %11866 = vmatpush3.bf16.xpose.msk.msra.mxu1 %vm12890_vm10, %v11861_v20  ;;  %6617 = vst.msk [vmem:[#allocation3 + $0x68] sm:$0x3] %vm2283_vm8, %v6607_v23 }
0x113b   :  { %11513 = vmatprep.mubr.msk.f32.mxu0 %vm2281_vm9, %v6644_v18  ;;  %6616 = vst.msk [vmem:[#allocation3 + $0x60] sm:$0xff] %vm2281_vm9, %v6605_v3  ;;  %v11873_v34 = vpack.c.bf16 %v6663_v30, %v6662_v22 }
0x113d   :  { %11875 = vmatprep.subr.msk.bf16.mxu1 %vm12890_vm10, %v11873_v34  ;;  %v6547_v13 = vpop.permute.xlu0 %6546  ;;  %v6645_v48 = vld [vmem:[#allocation2 + $0x48] sm:$0x3] }
0x113e   :  { %v6545_v41 = vpop.permute.xlu1 %6544  ;;  %v6642_v26 = vld [vmem:[#allocation2 + $0x30] sm:$0xff]  ;;  %6555 = vst.msk [vmem:[#allocation2 + $0x58] sm:$0x3] %vm2283_vm8, %v6547_v13 }
0x113f   :  { %6554 = vst.msk [vmem:[#allocation2 + $0x50] sm:$0xff] %vm2281_vm9, %v6545_v41  ;;  %11506 = vmatprep.mubr.msk.f32.mxu1 %vm2281_vm9, %v6642_v26 }
0x1141   :  { %11514 = vmatmul.mubr.msk.f32.vlgmr.msra.gmra.mrb[52].mxu0 %vm2281_vm9, %v6645_v48  ;;  %11507 = vmatmul.mubr.msk.f32.vlgmr.msra.gmra.mrb[46].mxu1 %vm2281_vm9, %v6643_v4  ;;  %v6611_v39 = vpop.permute.xlu0 %6610  ;;  %v6665_v19 = vld [vmem:[#allocation3 + $0x68] sm:$0x3] }
0x1142   :  { %v6609_v8 = vpop.permute.xlu1 %6608  ;;  %v6664_v61 = vld [vmem:[#allocation3 + $0x60] sm:$0xff]  ;;  %11878 = vmatpush3.bf16.xpose.msk.msra.mxu1 %vm12890_vm10, %v11873_v34  ;;  %6619 = vst.msk [vmem:[#allocation3 + $0x78] sm:$0x3] %vm2283_vm8, %v6611_v39 }
0x1143   :  { %6618 = vst.msk [vmem:[#allocation3 + $0x70] sm:$0xff] %vm2281_vm9, %v6609_v8  ;;  %v11879_v33 = vpack.c.bf16 %v6665_v19, %v6664_v61 }
0x1145   :  { %11881 = vmatprep.subr.msk.bf16.mxu0 %vm12890_vm10, %v11879_v33  ;;  %v6591_v46 = vpop.permute.xlu0 %6590  ;;  %v6647_v10 = vld [vmem:[#allocation2 + $0x58] sm:$0x3] }
0x1146   :  { %v6589_v56 = vpop.permute.xlu1 %6588  ;;  %v6646_v29 = vld [vmem:[#allocation2 + $0x50] sm:$0xff]  ;;  %11884 = vmatpush3.bf16.xpose.msk.msra.mxu0 %vm12890_vm10, %v11879_v33  ;;  %6601 = vst.msk [vmem:[#allocation2 + $0x68] sm:$0x3] %vm2283_vm8, %v6591_v46 }
0x1147   :  { %6600 = vst.msk [vmem:[#allocation2 + $0x60] sm:$0xff] %vm2281_vm9, %v6589_v56  ;;  %11520 = vmatprep.mubr.msk.f32.mxu1 %vm2281_vm9, %v6646_v29 }
0x1149   :  { %11521 = vmatmul.mubr.msk.f32.vlgmr.msra.gmra.mrb[48].mxu1 %vm2281_vm9, %v6647_v10  ;;  %v6595_v28 = vpop.permute.xlu0 %6594  ;;  %v6667_v45 = vld [vmem:[#allocation3 + $0x78] sm:$0x3] }
0x114a   :  { %v6593_v27 = vpop.permute.xlu1 %6592  ;;  %v6666_v6 = vld [vmem:[#allocation3 + $0x70] sm:$0xff]  ;;  %6603 = vst.msk [vmem:[#allocation2 + $0x78] sm:$0x3] %vm2283_vm8, %v6595_v28 }
0x114b   :  { %6602 = vst.msk [vmem:[#allocation2 + $0x70] sm:$0xff] %vm2281_vm9, %v6593_v27  ;;  %v11885_v57 = vpack.c.bf16 %v6667_v45, %v6666_v6 }
0x114d   :  { %11887 = vmatprep.subr.msk.bf16.mxu1 %vm12890_vm10, %v11885_v57  ;;  %v6477_v62 = vpop.permute.xlu0 %6476  ;;  %v6649_v16 = vld [vmem:[#allocation2 + $0x68] sm:$0x3] }
0x114e   :  { %v6479_v21 = vpop.permute.xlu1 %6478  ;;  %v6648_v63 = vld [vmem:[#allocation2 + $0x60] sm:$0xff]  ;;  %11890 = vmatpush3.bf16.xpose.msk.msra.mxu1 %vm12890_vm10, %v11885_v57  ;;  %6488 = vst.msk [vmem:[#allocation4] sm:$0xff] %vm2281_vm9, %v6477_v62 }
0x114f   :  { %6489 = vst.msk [vmem:[#allocation4 + $0x8] sm:$0x3] %vm2283_vm8, %v6479_v21  ;;  %11527 = vmatprep.mubr.msk.f32.mxu0 %vm2281_vm9, %v6648_v63 }
0x1150   :  { %11528 = vmatmul.mubr.msk.f32.vlgmr.msra.gmra.mrb[54].mxu0 %vm2281_vm9, %v6649_v16 }
0x1151   :  { %v6527_v14 = vpop.permute.xlu0 %6526  ;;  %v6651_v36 = vld [vmem:[#allocation2 + $0x78] sm:$0x3] }
0x1152   :  { %v6525_v55 = vpop.permute.xlu1 %6524  ;;  %v6650_v25 = vld [vmem:[#allocation2 + $0x70] sm:$0xff]  ;;  %6537 = vst.msk [vmem:[#allocation4 + $0x28] sm:$0x3] %vm2283_vm8, %v6527_v14 }
0x1153   :  { %6536 = vst.msk [vmem:[#allocation4 + $0x20] sm:$0xff] %vm2281_vm9, %v6525_v55  ;;  %11534 = vmatprep.mubr.msk.f32.mxu1 %vm2281_vm9, %v6650_v25 }
0x1155   :  { %11535 = vmatmul.mubr.msk.f32.vlgmr.msra.gmra.mrb[50].mxu1 %vm2281_vm9, %v6651_v36  ;;  %v6483_v11 = vpop.permute.xlu0 %6482  ;;  %v6668_v37 = vld [vmem:[#allocation4] sm:$0xff] }
0x1156   :  { %v6575_v59 = vpop.permute.xlu1 %6574  ;;  %v6669_v42 = vld [vmem:[#allocation4 + $0x8] sm:$0x3]  ;;  %6491 = vst.msk [vmem:[#allocation4 + $0x18] sm:$0x3] %vm2283_vm8, %v6483_v11 }
0x1157   :  { %6585 = vst.msk [vmem:[#allocation4 + $0x48] sm:$0x3] %vm2283_vm8, %v6575_v59  ;;  %v11891_v12 = vpack.c.bf16 %v6669_v42, %v6668_v37 }
0x1159   :  { %11893 = vmatprep.subr.msk.bf16.mxu0 %vm12964_vm12, %v11891_v12  ;;  %v6573_v31 = vpop.permute.xlu0 %6572  ;;  %v6673_v44 = vld [vmem:[#allocation4 + $0x28] sm:$0x3] }
0x115a   :  { %v6481_v35 = vpop.permute.xlu1 %6480  ;;  %v6672_v38 = vld [vmem:[#allocation4 + $0x20] sm:$0xff]  ;;  %11896 = vmatpush3.bf16.msk.msra.mxu0 %vm12964_vm12, %v11891_v12  ;;  %6584 = vst.msk [vmem:[#allocation4 + $0x40] sm:$0xff] %vm2281_vm9, %v6573_v31 }
0x115b   :  { %6490 = vst.msk [vmem:[#allocation4 + $0x10] sm:$0xff] %vm2281_vm9, %v6481_v35  ;;  %v11903_v5 = vpack.c.bf16 %v6673_v44, %v6672_v38 }
0x115d   :  { %11905 = vmatprep.subr.msk.bf16.mxu1 %vm12964_vm12, %v11903_v5  ;;  %v6531_v49 = vpop.permute.xlu0 %6530  ;;  %v6671_v20 = vld [vmem:[#allocation4 + $0x18] sm:$0x3] }
0x115e   :  { %v6529_v40 = vpop.permute.xlu1 %6528  ;;  %11908 = vmatpush3.bf16.msk.msra.mxu1 %vm12964_vm12, %v11903_v5  ;;  %6539 = vst.msk [vmem:[#allocation4 + $0x38] sm:$0x3] %vm2283_vm8, %v6531_v49  ;;  %v6677_v18 = vld [vmem:[#allocation4 + $0x48] sm:$0x3] }
0x115f   :  { %6538 = vst.msk [vmem:[#allocation4 + $0x30] sm:$0xff] %vm2281_vm9, %v6529_v40 }
0x1161   :  { %v6676_v58 = vld [vmem:[#allocation4 + $0x40] sm:$0xff] }
0x1162   :  { %v6577_v32 = vpop.permute.xlu1 %6576  ;;  %v6670_v1 = vld [vmem:[#allocation4 + $0x10] sm:$0xff]  ;;  %v13772_v3 = vpack.c.bf16 %v6677_v18, %v6676_v58 }
0x1163   :  { %6586 = vst.msk [vmem:[#allocation4 + $0x50] sm:$0xff] %vm2281_vm9, %v6577_v32  ;;  %v13770_v15 = vpack.c.bf16 %v6671_v20, %v6670_v1 }
0x1164   :  { %11917 = vmatprep.subr.msk.bf16.mxu1 %vm12964_vm12, %v13772_v3 }
0x1165   :  { %11899 = vmatprep.subr.msk.bf16.mxu0 %vm12964_vm12, %v13770_v15 }
0x1203   :  { %v11487_v22 = vpop.f32.mrb[48].mxu0 }
0x1204   :  { %v13780_v30 = vmul.f32 0.35355338, %v11487_v22  ;;  %v6762_v23 = vpop.f32.mrb[49].mxu0 }
0x1205   :  { %v13782_v34 = vmul.f32 0.35355338, %v6762_v23 }
0x1206   :  { %v7399_v41 = vsel %vm3236_vm13, %v13780_v30, -inf }
0x1207   :  { %7400 = vmax.xlane.f32.xlu0 %v7399_v41  ;;  %v7396_v26 = vsel %vm3232_vm14, %v13782_v34, -inf }
0x1208   :  { %7397 = vmax.xlane.f32.xlu1 %v7396_v26 }
0x120b   :  { %v11501_v13 = vpop.f32.mrb[50].mxu0 }
0x120c   :  { %v11494_v48 = vpop.f32.mrb[44].mxu1  ;;  %v6936_v4 = vpop.f32.mrb[51].mxu0  ;;  %v13792_v19 = vmul.f32 0.35355338, %v11501_v13 }
0x120d   :  { %v13788_v8 = vmul.f32 0.35355338, %v11494_v48  ;;  %v6849_v61 = vpop.f32.mrb[45].mxu1  ;;  %v13796_v56 = vmul.f32 0.35355338, %v6936_v4 }
0x120e   :  { %v13790_v39 = vmul.f32 0.35355338, %v6849_v61  ;;  %v7411_v46 = vsel %vm3236_vm13, %v13792_v19, -inf }
0x120f   :  { %v7405_v33 = vsel %vm3236_vm13, %v13788_v8, -inf  ;;  %v7408_v6 = vsel %vm3232_vm14, %v13796_v56, -inf }
0x1210   :  { %7406 = vmax.xlane.f32.xlu1 %v7405_v33  ;;  %v7402_v29 = vsel %vm3232_vm14, %v13790_v39, -inf }
0x1211   :  { %7403 = vmax.xlane.f32.xlu0 %v7402_v29 }
0x1214   :  { %v11515_v10 = vpop.f32.mrb[52].mxu0  ;;  %v11508_v27 = vpop.f32.mrb[46].mxu1  ;;  %7412 = vmax.xlane.f32.xlu1 %v7411_v46 }
0x1215   :  { %v7110_v28 = vpop.f32.mrb[53].mxu0  ;;  %v13804_v45 = vmul.f32 0.35355338, %v11508_v27  ;;  %v7023_v57 = vpop.f32.mrb[47].mxu1  ;;  %7409 = vmax.xlane.f32.xlu0 %v7408_v6  ;;  %v13808_v63 = vmul.f32 0.35355338, %v11515_v10 }
0x1216   :  { %v13806_v21 = vmul.f32 0.35355338, %v7023_v57  ;;  %v13812_v16 = vmul.f32 0.35355338, %v7110_v28 }
0x1217   :  { %v7417_v62 = vsel %vm3236_vm13, %v13804_v45, -inf  ;;  %v7423_v25 = vsel %vm3236_vm13, %v13808_v63, -inf }
0x1218   :  { %7418 = vmax.xlane.f32.xlu1 %v7417_v62  ;;  %v7414_v55 = vsel %vm3232_vm14, %v13806_v21, -inf  ;;  %v7420_v36 = vsel %vm3232_vm14, %v13812_v16, -inf }
0x1219   :  { %7415 = vmax.xlane.f32.xlu0 %v7414_v55 }
0x121c   :  { %v11522_v14 = vpop.f32.mrb[48].mxu1  ;;  %7424 = vmax.xlane.f32.xlu1 %v7423_v25 }
0x121d   :  { %v13820_v59 = vmul.f32 0.35355338, %v11522_v14  ;;  %v7197_v42 = vpop.f32.mrb[49].mxu1  ;;  %7421 = vmax.xlane.f32.xlu0 %v7420_v36 }
0x121e   :  { %v13836_v49 = vmul.f32 0.35355338, %v7197_v42 }
0x121f   :  { %v7429_v11 = vsel %vm3236_vm13, %v13820_v59, -inf }
0x1220   :  { %7430 = vmax.xlane.f32.xlu1 %v7429_v11  ;;  %v7426_v1 = vsel %vm3232_vm14, %v13836_v49, -inf }
0x1223   :  { %v11529_v37 = vpop.f32.mrb[54].mxu0 }
0x1224   :  { %v13824_v12 = vmul.f32 0.35355338, %v11529_v37  ;;  %v7284_v35 = vpop.f32.mrb[55].mxu0 }
0x1225   :  { %v13838_v32 = vmul.f32 0.35355338, %v7284_v35 }
0x1226   :  { %v7435_v38 = vsel %vm3236_vm13, %v13824_v12, -inf }
0x1227   :  { %7436 = vmax.xlane.f32.xlu1 %v7435_v38  ;;  %v7432_v58 = vsel %vm3232_vm14, %v13838_v32, -inf }
0x1228   :  { %v11536_v31 = vpop.f32.mrb[50].mxu1 }
0x1229   :  { %v13828_v44 = vmul.f32 0.35355338, %v11536_v31  ;;  %v7371_v5 = vpop.f32.mrb[51].mxu1 }
0x122a   :  { %v13842_v20 = vmul.f32 0.35355338, %v7371_v5 }
0x122b   :  { %v7441_v40 = vsel %vm3236_vm13, %v13828_v44, -inf }
0x122c   :  { %7442 = vmax.xlane.f32.xlu1 %v7441_v40  ;;  %v7438_v18 = vsel %vm3232_vm14, %v13842_v20, -inf }
0x1233   :  { %6578 = vrot.lane.b32.xlu0 %v13594_v60, %s12230_s10 }
0x123d   :  { %6620 = vrot.lane.b32.xlu1 %v13571_v54, %s12232_s11 }
0x1252   :  { %7427 = vmax.xlane.f32.xlu0 %v7426_v1 }
0x1256   :  { %7433 = vmax.xlane.f32.xlu0 %v7432_v58 }
0x125a   :  { %7439 = vmax.xlane.f32.xlu0 %v7438_v18 }
0x1270   :  { %6622 = vrot.lane.b32.xlu0 %v13582_v17, %s12232_s11 }
0x1294   :  { %v7401_v54 = vpop.xlane.xlu0 %7400 }
0x1295   :  { %v7445_v22 = vsub.f32 %v13780_v30, %v7401_v54  ;;  %v7398_v23 = vpop.xlane.xlu1 %7397 }
0x1296   :  { %v7444_v41 = vsub.f32 %v13782_v34, %v7398_v23 }
0x1297   :  { %v7462_v26 = vmul.f32 1.442695, %v7445_v22 }
0x1298   :  { %v7460_v13 = vmul.f32 1.442695, %v7444_v41 }
0x1299   :  { %12106 = vpow2.f32 %v7462_v26 }
0x129a   :  { %12108 = vpow2.f32 %v7460_v13 }
0x129d   :  { %v7407_v48 = vpop.xlane.xlu1 %7406 }
0x129e   :  { %v7447_v4 = vsub.f32 %v13788_v8, %v7407_v48  ;;  %v7404_v61 = vpop.xlane.xlu0 %7403 }
0x129f   :  { %v7446_v33 = vsub.f32 %v13790_v39, %v7404_v61 }
0x12a0   :  { %v7466_v29 = vmul.f32 1.442695, %v7447_v4 }
0x12a1   :  { %v7464_v46 = vmul.f32 1.442695, %v7446_v33  ;;  %v7413_v10 = vpop.xlane.xlu1 %7412 }
0x12a2   :  { %12110 = vpow2.f32 %v7466_v29  ;;  %v7449_v17 = vsub.f32 %v13792_v19, %v7413_v10  ;;  %v7410_v30 = vpop.xlane.xlu0 %7409 }
0x12a3   :  { %v13855_v27 = vpop.eup %12106  ;;  %12112 = vpow2.f32 %v7464_v46  ;;  %v7448_v34 = vsub.f32 %v13796_v56, %v7410_v30 }
0x12a4   :  { %v13858_v6 = vpop.eup %12108  ;;  %v7470_v28 = vmul.f32 1.442695, %v7449_v17  ;;  %v7495_v8 = vsel %vm3236_vm13, %v13855_v27, 0.0 }
0x12a5   :  { %v7468_v57 = vmul.f32 1.442695, %v7448_v34  ;;  %v7419_v39 = vpop.xlane.xlu1 %7418  ;;  %7496 = vadd.xlane.f32.xlu1 %v7495_v8  ;;  %v7492_v62 = vsel %vm3232_vm14, %v13858_v6, 0.0 }
0x12a6   :  { %12114 = vpow2.f32 %v7470_v28  ;;  %v7451_v19 = vsub.f32 %v13804_v45, %v7419_v39  ;;  %v7416_v55 = vpop.xlane.xlu0 %7415  ;;  %7493 = vadd.xlane.f32.xlu0 %v7492_v62 }
0x12a7   :  { %12116 = vpow2.f32 %v7468_v57  ;;  %v7450_v56 = vsub.f32 %v13806_v21, %v7416_v55 }
0x12a8   :  { %v7474_v25 = vmul.f32 1.442695, %v7451_v19 }
0x12a9   :  { %v7472_v14 = vmul.f32 1.442695, %v7450_v56  ;;  %v7425_v36 = vpop.xlane.xlu1 %7424 }
0x12aa   :  { %12118 = vpow2.f32 %v7474_v25  ;;  %v7453_v42 = vsub.f32 %v13808_v63, %v7425_v36  ;;  %v7422_v11 = vpop.xlane.xlu0 %7421 }
0x12ab   :  { %12120 = vpow2.f32 %v7472_v14  ;;  %v7452_v37 = vsub.f32 %v13812_v16, %v7422_v11 }
0x12ac   :  { %v13868_v35 = vpop.eup %12110  ;;  %v7478_v38 = vmul.f32 1.442695, %v7453_v42 }
0x12ad   :  { %v13870_v31 = vpop.eup %12112  ;;  %v7476_v45 = vmul.f32 1.442695, %v7452_v37  ;;  %v7431_v5 = vpop.xlane.xlu1 %7430  ;;  %v7501_v21 = vsel %vm3236_vm13, %v13868_v35, 0.0 }
0x12ae   :  { %12122 = vpow2.f32 %v7478_v38  ;;  %v7455_v40 = vsub.f32 %v13820_v59, %v7431_v5  ;;  %v6579_v1 = vpop.permute.xlu0 %6578  ;;  %7502 = vadd.xlane.f32.xlu1 %v7501_v21  ;;  %v7498_v63 = vsel %vm3232_vm14, %v13870_v31, 0.0 }
0x12af   :  { %12124 = vpow2.f32 %v7476_v45  ;;  %6587 = vst.msk [vmem:[#allocation4 + $0x58] sm:$0x3] %vm2283_vm8, %v6579_v1  ;;  %7499 = vadd.xlane.f32.xlu0 %v7498_v63 }
0x12b0   :  { %v13878_v16 = vpop.eup %12114  ;;  %v7482_v58 = vmul.f32 1.442695, %v7455_v40 }
0x12b1   :  { %v13880_v18 = vpop.eup %12116  ;;  %v7507_v54 = vsel %vm3236_vm13, %v13878_v16, 0.0 }
0x12b2   :  { %12126 = vpow2.f32 %v7482_v58  ;;  %7508 = vadd.xlane.f32.xlu1 %v7507_v54  ;;  %v7504_v59 = vsel %vm3232_vm14, %v13880_v18, 0.0 }
0x12b3   :  { %7505 = vadd.xlane.f32.xlu0 %v7504_v59 }
0x12b4   :  { %v7437_v22 = vpop.xlane.xlu1 %7436  ;;  %v13886_v23 = vpop.eup %12118 }
0x12b5   :  { %v7457_v41 = vsub.f32 %v13824_v12, %v7437_v22  ;;  %v13889_v26 = vpop.eup %12120  ;;  %v7513_v13 = vsel %vm3236_vm13, %v13886_v23, 0.0 }
0x12b6   :  { %7514 = vadd.xlane.f32.xlu1 %v7513_v13  ;;  %v7510_v4 = vsel %vm3232_vm14, %v13889_v26, 0.0 }
0x12b7   :  { %v7486_v48 = vmul.f32 1.442695, %v7457_v41  ;;  %7511 = vadd.xlane.f32.xlu0 %v7510_v4 }
0x12b8   :  { %v13895_v61 = vpop.eup %12122 }
0x12b9   :  { %12128 = vpow2.f32 %v7486_v48  ;;  %v13897_v33 = vpop.eup %12124  ;;  %v7443_v29 = vpop.xlane.xlu1 %7442  ;;  %v7519_v12 = vsel %vm3236_vm13, %v13895_v61, 0.0 }
0x12ba   :  { %7520 = vadd.xlane.f32.xlu1 %v7519_v12  ;;  %v7516_v46 = vsel %vm3232_vm14, %v13897_v33, 0.0  ;;  %v7459_v39 = vsub.f32 %v13828_v44, %v7443_v29 }
0x12bb   :  { %7517 = vadd.xlane.f32.xlu0 %v7516_v46 }
0x12bc   :  { %v13903_v10 = vpop.eup %12126  ;;  %v7490_v56 = vmul.f32 1.442695, %v7459_v39 }
0x12bd   :  { %v6621_v17 = vpop.permute.xlu1 %6620  ;;  %v7525_v30 = vsel %vm3236_vm13, %v13903_v10, 0.0 }
0x12be   :  { %6632 = vst.msk [vmem:[#allocation4 + $0x60] sm:$0xff] %vm2281_vm9, %v6621_v17  ;;  %7526 = vadd.xlane.f32.xlu1 %v7525_v30  ;;  %v6674_v17 = vld [vmem:[#allocation4 + $0x30] sm:$0xff]  ;;  %v6675_v30 = vld [vmem:[#allocation4 + $0x38] sm:$0x3] }
0x12c3   :  { %v13908_v34 = vpop.eup %12128 }
0x12c4   :  { %v7531_v28 = vsel %vm3236_vm13, %v13908_v34, 0.0 }
0x12c5   :  { %7532 = vadd.xlane.f32.xlu1 %v7531_v28 }
0x12df   :  { %v7428_v8 = vpop.xlane.xlu0 %7427 }
0x12e0   :  { %v7454_v57 = vsub.f32 %v13836_v49, %v7428_v8 }
0x12e2   :  { %v7480_v62 = vmul.f32 1.442695, %v7454_v57 }
0x12e3   :  { %v7434_v19 = vpop.xlane.xlu0 %7433 }
0x12e4   :  { %12130 = vpow2.f32 %v7480_v62  ;;  %v7456_v55 = vsub.f32 %v13838_v32, %v7434_v19 }
0x12e6   :  { %v7484_v25 = vmul.f32 1.442695, %v7456_v55 }
0x12e7   :  { %v7440_v14 = vpop.xlane.xlu0 %7439 }
0x12e8   :  { %12132 = vpow2.f32 %v7484_v25  ;;  %v7458_v36 = vsub.f32 %v13842_v20, %v7440_v14 }
0x12e9   :  { %12134 = vpow2.f32 %v7490_v56  ;;  %v11909_v56 = vpack.c.bf16 %v6675_v30, %v6674_v17  ;;  %v6680_v30 = vld [vmem:[#allocation4 + $0x60] sm:$0xff] }
0x12ea   :  { %v7488_v42 = vmul.f32 1.442695, %v7458_v36 }
0x12eb   :  { %v6623_v11 = vpop.permute.xlu0 %6622 }
0x12ec   :  { %12136 = vpow2.f32 %v7488_v42  ;;  %6633 = vst.msk [vmem:[#allocation4 + $0x68] sm:$0x3] %vm2283_vm8, %v6623_v11 }
0x12ee   :  { %v13917_v49 = vpop.eup %12130 }
0x12ef   :  { %v7522_v44 = vsel %vm3232_vm14, %v13917_v49, 0.0 }
0x12f0   :  { %7523 = vadd.xlane.f32.xlu0 %v7522_v44 }
0x12f2   :  { %v13921_v37 = vpop.eup %12132 }
0x12f3   :  { %v7528_v32 = vsel %vm3232_vm14, %v13921_v37, 0.0  ;;  %v13925_v38 = vpop.eup %12134 }
0x12f4   :  { %7529 = vadd.xlane.f32.xlu0 %v7528_v32  ;;  %v7537_v45 = vsel %vm3236_vm13, %v13925_v38, 0.0 }
0x12f6   :  { %v13927_v20 = vpop.eup %12136 }
0x12f7   :  { %v7534_v5 = vsel %vm3232_vm14, %v13927_v20, 0.0 }
0x12f8   :  { %7538 = vadd.xlane.f32.xlu0 %v7537_v45  ;;  %7535 = vadd.xlane.f32.xlu1 %v7534_v5 }
0x1309   :  { %6624 = vrot.lane.b32.xlu1 %v13600_v24, %s12232_s11 }
0x130e   :  { %6626 = vrot.lane.b32.xlu0 %v13594_v60, %s12232_s11 }
0x1332   :  { %v7497_v21 = vpop.xlane.xlu1 %7496 }
0x1333   :  { %12138 = vrcp.f32 %v7497_v21  ;;  %v7494_v40 = vpop.xlane.xlu0 %7493 }
0x1334   :  { %12140 = vrcp.f32 %v7494_v40 }
0x133b   :  { %v7503_v1 = vpop.xlane.xlu1 %7502 }
0x133c   :  { %12142 = vrcp.f32 %v7503_v1  ;;  %v7500_v63 = vpop.xlane.xlu0 %7499 }
0x133d   :  { %v12139_v58 = vpop.eup %12138  ;;  %12144 = vrcp.f32 %v7500_v63 }
0x133e   :  { %v12141_v54 = vpop.eup %12140  ;;  %v7557_v59 = vmul.f32 %v12139_v58, %v7497_v21 }
0x133f   :  { %v7556_v22 = vmul.f32 %v12141_v54, %v7494_v40  ;;  %v7509_v41 = vpop.xlane.xlu1 %7508  ;;  %v6679_v40 = vld [vmem:[#allocation4 + $0x58] sm:$0x3] }
0x1340   :  { %v7573_v13 = vsub.f32 2.0, %v7557_v59  ;;  %12146 = vrcp.f32 %v7509_v41  ;;  %v7506_v48 = vpop.xlane.xlu0 %7505 }
0x1341   :  { %v7572_v24 = vsub.f32 2.0, %v7556_v22  ;;  %12148 = vrcp.f32 %v7506_v48  ;;  %v6678_v22 = vld [vmem:[#allocation4 + $0x50] sm:$0xff] }
0x1342   :  { %v7589_v4 = vmul.f32 %v12139_v58, %v7573_v13 }
0x1343   :  { %v7588_v60 = vmul.f32 %v12141_v54, %v7572_v24  ;;  %v7515_v29 = vpop.xlane.xlu1 %7514 }
0x1344   :  { %12150 = vrcp.f32 %v7515_v29  ;;  %v7512_v12 = vpop.xlane.xlu0 %7511  ;;  %v7605_v8 = vmul.f32 %v13855_v27, %v7589_v4  ;;  %v6681_v4 = vld [vmem:[#allocation4 + $0x68] sm:$0x3] }
0x1345   :  { %v7604_v46 = vmul.f32 %v13858_v6, %v7588_v60  ;;  %12152 = vrcp.f32 %v7512_v12 }
0x1346   :  { %v12143_v28 = vpop.eup %12142 }
0x1347   :  { %v12145_v57 = vpop.eup %12144  ;;  %v7559_v39 = vmul.f32 %v12143_v28, %v7503_v1  ;;  %v7521_v62 = vpop.xlane.xlu1 %7520  ;;  %11541 = vmatprep.mubr.msk.f32.mxu0 %vm3232_vm14, %v7604_v46 }
0x1348   :  { %v7558_v19 = vmul.f32 %v12145_v57, %v7500_v63  ;;  %12154 = vrcp.f32 %v7521_v62  ;;  %v7518_v55 = vpop.xlane.xlu0 %7517  ;;  %11542 = vmatmul.mubr.msk.f32.vlgmr.msra.gmra.mrb[56].mxu0 %vm3232_vm14, %v7605_v8 }
0x1349   :  { %v7575_v25 = vsub.f32 2.0, %v7559_v39  ;;  %12156 = vrcp.f32 %v7518_v55  ;;  %11902 = vmatpush3.bf16.msk.msra.mxu0 %vm12964_vm12, %v13770_v15 }
0x134a   :  { %v12147_v6 = vpop.eup %12146  ;;  %v7574_v14 = vsub.f32 2.0, %v7558_v19  ;;  %11911 = vmatprep.subr.msk.bf16.mxu0 %vm12964_vm12, %v11909_v56 }
0x134b   :  { %v12149_v27 = vpop.eup %12148  ;;  %v7591_v36 = vmul.f32 %v12143_v28, %v7575_v25  ;;  %v7561_v42 = vmul.f32 %v12147_v6, %v7509_v41  ;;  %v11921_v41 = vpack.c.bf16 %v6679_v40, %v6678_v22 }
0x134c   :  { %v7590_v11 = vmul.f32 %v12145_v57, %v7574_v14  ;;  %v7560_v44 = vmul.f32 %v12149_v27, %v7506_v48 }
0x134d   :  { %v7577_v32 = vsub.f32 2.0, %v7561_v42  ;;  %v7607_v63 = vmul.f32 %v13868_v35, %v7591_v36 }
0x134e   :  { %v12151_v45 = vpop.eup %12150  ;;  %v7606_v5 = vmul.f32 %v13870_v31, %v7590_v11  ;;  %v7576_v21 = vsub.f32 2.0, %v7560_v44 }
0x134f   :  { %v12153_v1 = vpop.eup %12152  ;;  %v7593_v15 = vmul.f32 %v12147_v6, %v7577_v32  ;;  %v7563_v58 = vmul.f32 %v12151_v45, %v7515_v29 }
0x1350   :  { %v7592_v54 = vmul.f32 %v12149_v27, %v7576_v21  ;;  %v7562_v59 = vmul.f32 %v12153_v1, %v7512_v12  ;;  %11548 = vmatprep.mubr.msk.f32.mxu0 %vm3232_vm14, %v7606_v5 }
0x1351   :  { %v7579_v13 = vsub.f32 2.0, %v7563_v58  ;;  %11549 = vmatmul.mubr.msk.f32.vlgmr.msra.gmra.mrb[58].mxu0 %vm3232_vm14, %v7607_v63  ;;  %v7609_v60 = vmul.f32 %v13878_v16, %v7593_v15 }
0x1352   :  { %v12155_v48 = vpop.eup %12154  ;;  %v7608_v24 = vmul.f32 %v13880_v18, %v7592_v54  ;;  %v7578_v31 = vsub.f32 2.0, %v7562_v59  ;;  %11914 = vmatpush3.bf16.msk.msra.mxu0 %vm12964_vm12, %v11909_v56  ;;  %v11927_v18 = vpack.c.bf16 %v6681_v4, %v6680_v30 }
0x1353   :  { %v12157_v35 = vpop.eup %12156  ;;  %v7595_v29 = vmul.f32 %v12151_v45, %v7579_v13  ;;  %v7565_v12 = vmul.f32 %v12155_v48, %v7521_v62  ;;  %11923 = vmatprep.subr.msk.bf16.mxu0 %vm12964_vm12, %v11921_v41 }
0x1354   :  { %v7594_v46 = vmul.f32 %v12153_v1, %v7578_v31  ;;  %v7564_v17 = vmul.f32 %v12157_v35, %v7518_v55  ;;  %11555 = vmatprep.mubr.msk.f32.mxu1 %vm3232_vm14, %v7608_v24 }
0x1355   :  { %v7581_v28 = vsub.f32 2.0, %v7565_v12  ;;  %11556 = vmatmul.mubr.msk.f32.vlgmr.msra.gmra.mrb[52].mxu1 %vm3232_vm14, %v7609_v60  ;;  %v7611_v16 = vmul.f32 %v13886_v23, %v7595_v29 }
0x1356   :  { %v7610_v8 = vmul.f32 %v13889_v26, %v7594_v46  ;;  %v7580_v57 = vsub.f32 2.0, %v7564_v17  ;;  %11920 = vmatpush3.bf16.msk.msra.mxu1 %vm12964_vm12, %v13772_v3  ;;  %v7527_v3 = vpop.xlane.xlu1 %7526  ;;  %v6025_v17 = vld [vmem:[#allocation5 + $0x1d8] sm:$0xff] }
0x1357   :  { %v7597_v39 = vmul.f32 %v12155_v48, %v7581_v28  ;;  %11929 = vmatprep.subr.msk.bf16.mxu1 %vm12964_vm12, %v11927_v18  ;;  %12158 = vrcp.f32 %v7527_v3 }
0x1358   :  { %v7596_v62 = vmul.f32 %v12157_v35, %v7580_v57  ;;  %11562 = vmatprep.mubr.msk.f32.mxu0 %vm3232_vm14, %v7610_v8 }
0x1359   :  { %11563 = vmatmul.mubr.msk.f32.vlgmr.msra.gmra.mrb[60].mxu0 %vm3232_vm14, %v7611_v16  ;;  %v7613_v26 = vmul.f32 %v13895_v61, %v7597_v39 }
0x135a   :  { %v7612_v19 = vmul.f32 %v13897_v33, %v7596_v62  ;;  %11926 = vmatpush3.bf16.msk.msra.mxu0 %vm12964_vm12, %v11921_v41  ;;  %v7533_v23 = vpop.xlane.xlu1 %7532 }
0x135b   :  { %12160 = vrcp.f32 %v7533_v23 }
0x135c   :  { %11569 = vmatprep.mubr.msk.f32.mxu1 %vm3232_vm14, %v7612_v19 }
0x135d   :  { %11570 = vmatmul.mubr.msk.f32.vlgmr.msra.gmra.mrb[54].mxu1 %vm3232_vm14, %v7613_v26 }
0x135e   :  { %11932 = vmatpush3.bf16.msk.msra.mxu1 %vm12964_vm12, %v11927_v18 }
0x135f   :  { %11593 = vmatprep.subr.mxu1 %v12215_v2 }
0x1361   :  { %v12159_v33 = vpop.eup %12158 }
0x1362   :  { %v7567_v25 = vmul.f32 %v12159_v33, %v7527_v3 }
0x1364   :  { %v7583_v36 = vsub.f32 2.0, %v7567_v25 }
0x1365   :  { %v12161_v61 = vpop.eup %12160 }
0x1366   :  { %v7569_v42 = vmul.f32 %v12161_v61, %v7533_v23  ;;  %v7599_v21 = vmul.f32 %v12159_v33, %v7583_v36 }
0x1368   :  { %v7585_v40 = vsub.f32 2.0, %v7569_v42  ;;  %v7615_v59 = vmul.f32 %v13903_v10, %v7599_v21 }
0x136a   :  { %v7601_v22 = vmul.f32 %v12161_v61, %v7585_v40 }
0x137d   :  { %v7524_v55 = vpop.xlane.xlu0 %7523 }
0x137e   :  { %12162 = vrcp.f32 %v7524_v55 }
0x1381   :  { %v7530_v56 = vpop.xlane.xlu0 %7529 }
0x1382   :  { %12164 = vrcp.f32 %v7530_v56 }
0x1385   :  { %v7536_v6 = vpop.xlane.xlu1 %7535  ;;  %v7539_v14 = vpop.xlane.xlu0 %7538 }
0x1386   :  { %12166 = vrcp.f32 %v7536_v6 }
0x1387   :  { %12168 = vrcp.f32 %v7539_v14 }
0x1388   :  { %v12163_v27 = vpop.eup %12162 }
0x1389   :  { %v7566_v11 = vmul.f32 %v12163_v27, %v7524_v55  ;;  %v6625_v44 = vpop.permute.xlu1 %6624  ;;  %v6627_v32 = vpop.permute.xlu0 %6626 }
0x138a   :  { %6634 = vst.msk [vmem:[#allocation4 + $0x70] sm:$0xff] %vm2281_vm9, %v6625_v44 }
0x138b   :  { %6635 = vst.msk [vmem:[#allocation4 + $0x78] sm:$0x3] %vm2283_vm8, %v6627_v32  ;;  %v7582_v45 = vsub.f32 2.0, %v7566_v11 }
0x138c   :  { %v12165_v5 = vpop.eup %12164 }
0x138d   :  { %v7598_v1 = vmul.f32 %v12163_v27, %v7582_v45  ;;  %v7568_v63 = vmul.f32 %v12165_v5, %v7530_v56 }
0x138f   :  { %v7614_v15 = vmul.f32 %v13917_v49, %v7598_v1  ;;  %v7584_v58 = vsub.f32 2.0, %v7568_v63  ;;  %v7617_v49 = vmul.f32 %v13908_v34, %v7601_v22 }
0x1390   :  { %v12167_v54 = vpop.eup %12166 }
0x1391   :  { %v12169_v13 = vpop.eup %12168  ;;  %v7600_v41 = vmul.f32 %v12165_v5, %v7584_v58  ;;  %v7570_v48 = vmul.f32 %v12167_v54, %v7536_v6  ;;  %11576 = vmatprep.mubr.msk.f32.mxu0 %vm3232_vm14, %v7614_v15  ;;  %v6682_v24 = vld [vmem:[#allocation4 + $0x70] sm:$0xff] }
0x1392   :  { %v6683_v31 = vld [vmem:[#allocation4 + $0x78] sm:$0x3]  ;;  %v7571_v4 = vmul.f32 %v12169_v13, %v7539_v14  ;;  %11577 = vmatmul.mubr.msk.f32.vlgmr.msra.gmra.mrb[62].mxu0 %vm3232_vm14, %v7615_v59 }
0x1393   :  { %v11933_v35 = vpack.c.bf16 %v6683_v31, %v6682_v24  ;;  %v7616_v60 = vmul.f32 %v13921_v37, %v7600_v41  ;;  %v7586_v29 = vsub.f32 2.0, %v7570_v48 }
0x1394   :  { %v7587_v12 = vsub.f32 2.0, %v7571_v4 }
0x1395   :  { %11935 = vmatprep.subr.msk.bf16.mxu0 %vm12964_vm12, %v11933_v35  ;;  %v7602_v10 = vmul.f32 %v12167_v54, %v7586_v29  ;;  %11583 = vmatprep.mubr.msk.f32.mxu1 %vm3232_vm14, %v7616_v60 }
0x1396   :  { %11938 = vmatpush3.bf16.msk.msra.mxu0 %vm12964_vm12, %v11933_v35  ;;  %v7603_v46 = vmul.f32 %v12169_v13, %v7587_v12  ;;  %11584 = vmatmul.mubr.msk.f32.vlgmr.msra.gmra.mrb[56].mxu1 %vm3232_vm14, %v7617_v49 }
0x1397   :  { %11615 = vmatprep.subr.mxu0 %v12215_v2  ;;  %v7618_v37 = vmul.f32 %v13927_v20, %v7602_v10  ;;  %11595 = vmatprep.mubr.msk.f32.mxu1 %vm12214_vm0, %v12215_v2 }
0x1398   :  { %v7619_v34 = vmul.f32 %v13925_v38, %v7603_v46  ;;  %11594 = vmatpush3.msra.mxu1 %v6024_v43 }
0x1399   :  { %11590 = vmatprep.mubr.msk.f32.mxu0 %vm3232_vm14, %v7618_v37  ;;  %11604 = vmatprep.subr.mxu1 %v12215_v2  ;;  %v6023_v37 = vld [vmem:[#allocation5 + $0x1c8] sm:$0xff] }
0x139a   :  { %11591 = vmatmul.mubr.msk.f32.vlgmr.msra.gmra.mrb[64].mxu0 %vm3232_vm14, %v7619_v34 }
0x139b   :  { %11617 = vmatprep.mubr.msk.f32.mxu0 %vm12214_vm0, %v12215_v2  ;;  %11616 = vmatpush3.msra.mxu0 %v6025_v17 }
0x139c   :  { %11626 = vmatprep.subr.mxu0 %v12215_v2 }
0x141b   :  { %v11543_v20 = vpop.f32.mrb[56].mxu0 }
0x141c   :  { %v7695_v30 = vpop.f32.mrb[57].mxu0  ;;  %v8499_v38 = vrot.slane %v11543_v20, %v12269_v7 }
0x141d   :  { %v8476_v56 = vcombine.high %v7695_v30, %v7695_v30  ;;  %v8483_v22 = vrot.slane %v7695_v30, %v12269_v7 }
0x141f   :  { %v8490_v40 = vrot.slane %v8476_v56, %v12269_v7  ;;  %v8491_v17 = vcombine.high %v8483_v22, %v8483_v22 }
0x1421   :  { %v8492_v35 = vcombine.high %v8490_v40, %v8490_v40 }
0x1424   :  { %v11550_v28 = vpop.f32.mrb[58].mxu0 }
0x1425   :  { %v7779_v18 = vpop.f32.mrb[59].mxu0  ;;  %v8523_v3 = vrot.slane %v11550_v28, %v12269_v7 }
0x1426   :  { %v8500_v8 = vcombine.high %v7779_v18, %v7779_v18  ;;  %v8507_v57 = vrot.slane %v7779_v18, %v12269_v7  ;;  %v8525_v18 = vcombine.low %v8490_v40, %v8492_v35 }
0x1428   :  { %v8514_v16 = vrot.slane %v8500_v8, %v12269_v7  ;;  %v8515_v39 = vcombine.high %v8507_v57, %v8507_v57  ;;  %v8541_v62 = vcombine.low %v8499_v38, %v8507_v57  ;;  %v11557_v19 = vpop.f32.mrb[52].mxu1  ;;  %v8524_v8 = vcombine.low %v8483_v22, %v8491_v17 }
0x1429   :  { %v7863_v26 = vpop.f32.mrb[53].mxu1  ;;  %v8319_v42 = vrot.slane %v11557_v19, %v12269_v7 }
0x142a   :  { %v8516_v23 = vcombine.high %v8514_v16, %v8514_v16  ;;  %v8542_v55 = vcombine.low %v8515_v39, %v8514_v16  ;;  %v8296_v33 = vcombine.high %v7863_v26, %v7863_v26  ;;  %v8303_v25 = vrot.slane %v7863_v26, %v12269_v7  ;;  %v6026_v26 = vld [vmem:[#allocation5 + $0x1e0] sm:$0xff] }
0x142b   :  { %v8549_v61 = vrot.slane %v8541_v62, %v12269_v7  ;;  %v8539_v39 = vrot.slane %v8525_v18, %v12269_v7 }
0x142c   :  { %v8556_v6 = vrot.slane %v8542_v55, %v12269_v7  ;;  %v14008_v14 = vcombine.low %v8516_v23, %v8523_v3  ;;  %v8310_v27 = vrot.slane %v8296_v33, %v12269_v7  ;;  %v11564_v36 = vpop.f32.mrb[60].mxu0  ;;  %v8311_v11 = vcombine.high %v8303_v25, %v8303_v25 }
0x142d   :  { %v7947_v44 = vpop.f32.mrb[61].mxu0  ;;  %v8343_v13 = vrot.slane %v11564_v36, %v12269_v7  ;;  %v8532_v3 = vrot.slane %v8524_v8, %v12269_v7 }
0x142e   :  { %v8312_v32 = vcombine.high %v8310_v27, %v8310_v27  ;;  %v8320_v45 = vcombine.high %v7947_v44, %v7947_v44  ;;  %v8327_v5 = vrot.slane %v7947_v44, %v12269_v7  ;;  %v8557_v21 = vcombine.low %v8549_v61, %v8556_v6 }
0x142f   :  { %v8344_v1 = vcombine.low %v8303_v25, %v8311_v11  ;;  %v8540_v23 = vcombine.low %v8532_v3, %v8539_v39  ;;  %v8565_v55 = vrot.slane %v14008_v14, %v12269_v7 }
0x1430   :  { %v8345_v63 = vcombine.low %v8310_v27, %v8312_v32  ;;  %v8334_v15 = vrot.slane %v8320_v45, %v12269_v7  ;;  %v8335_v58 = vcombine.high %v8327_v5, %v8327_v5  ;;  %v8361_v54 = vcombine.low %v8319_v42, %v8327_v5  ;;  %v11571_v59 = vpop.f32.mrb[54].mxu1 }
0x1431   :  { %v8031_v41 = vpop.f32.mrb[55].mxu1  ;;  %v8352_v48 = vrot.slane %v8344_v1, %v12269_v7  ;;  %v8734_v25 = vrot.slane %v11571_v59, %v12269_v7 }
0x1432   :  { %v8359_v24 = vrot.slane %v8345_v63, %v12269_v7  ;;  %v8336_v31 = vcombine.high %v8334_v15, %v8334_v15  ;;  %v8362_v4 = vcombine.low %v8335_v58, %v8334_v15  ;;  %v8711_v60 = vcombine.high %v8031_v41, %v8031_v41 }
0x1433   :  { %v8718_v29 = vrot.slane %v8031_v41, %v12269_v7  ;;  %v8369_v12 = vrot.slane %v8361_v54, %v12269_v7 }
0x1434   :  { %v8360_v49 = vcombine.low %v8352_v48, %v8359_v24  ;;  %v8376_v10 = vrot.slane %v8362_v4, %v12269_v7  ;;  %v8378_v46 = vcombine.low %v8336_v31, %v8343_v13  ;;  %v8725_v34 = vrot.slane %v8711_v60, %v12269_v7 }
0x1435   :  { %v8726_v43 = vcombine.high %v8718_v29, %v8718_v29 }
0x1436   :  { %11596 = vmatmul.mubr.msk.f32.vlgmr.msra.gmra.mrb[58].mxu1 %vm2281_vm9, %v8360_v49  ;;  %v8377_v20 = vcombine.low %v8369_v12, %v8376_v10  ;;  %v8727_v30 = vcombine.high %v8725_v34, %v8725_v34  ;;  %v8385_v62 = vrot.slane %v8378_v46, %v12269_v7 }
0x1437   :  { %v8759_v28 = vcombine.low %v8718_v29, %v8726_v43  ;;  %11598 = vmatprep.mubr.msk.f32.mxu1 %vm12214_vm0, %v12215_v2  ;;  %11605 = vmatpush3.msra.mxu1 %v6023_v37 }
0x1438   :  { %11939 = vmatprep.subr.bf16.mxu1 %v12213_v0  ;;  %v8760_v38 = vcombine.low %v8725_v34, %v8727_v30 }
0x1439   :  { %v8767_v57 = vrot.slane %v8759_v28, %v12269_v7 }
0x143a   :  { %11599 = vmatmul.mubr.msk.f32.gmra.mrb[60].mxu1 %vm2281_vm9, %v8377_v20  ;;  %v8774_v16 = vrot.slane %v8760_v38, %v12269_v7 }
0x143b   :  { %11601 = vmatprep.mubr.msk.f32.mxu1 %vm12214_vm0, %v12215_v2 }
0x143c   :  { %v8775_v19 = vcombine.low %v8767_v57, %v8774_v16 }
0x143e   :  { %11602 = vmatmul.mubr.msk.f32.gmra.mrb[62].mxu1 %vm2281_vm9, %v8385_v62  ;;  %11618 = vmatmul.mubr.msk.f32.vlgmr.msra.gmra.mrb[66].mxu0 %vm2281_vm9, %v8775_v19 }
0x143f   :  { %11606 = vmatprep.mubr.msk.f32.mxu1 %vm12214_vm0, %v12215_v2  ;;  %11620 = vmatprep.mubr.msk.f32.mxu0 %vm12214_vm0, %v12215_v2 }
0x1440   :  { %11627 = vmatpush3.msra.mxu0 %v6026_v26 }
0x1441   :  { %11945 = vmatprep.subr.bf16.mxu0 %v12213_v0 }
0x1442   :  { %11607 = vmatmul.mubr.msk.f32.vlgmr.msra.gmra.mrb[58].mxu1 %vm2281_vm9, %v8540_v23 }
0x1443   :  { %11609 = vmatprep.mubr.msk.f32.mxu1 %vm12214_vm0, %v12215_v2 }
0x1446   :  { %11610 = vmatmul.mubr.msk.f32.gmra.mrb[60].mxu1 %vm2281_vm9, %v8557_v21 }
0x1447   :  { %11612 = vmatprep.mubr.msk.f32.mxu1 %vm12214_vm0, %v12215_v2 }
0x144a   :  { %11613 = vmatmul.mubr.msk.f32.gmra.mrb[62].mxu1 %vm2281_vm9, %v8565_v55 }
0x144b   :  { %11645 = vmatprep.mubr.msk.f32.mxu1 %vm12214_vm0, %v12215_v2 }
0x1465   :  { %v11578_v33 = vpop.f32.mrb[62].mxu0 }
0x1466   :  { %v8115_v56 = vpop.f32.mrb[63].mxu0  ;;  %v8758_v14 = vrot.slane %v11578_v33, %v12269_v7 }
0x1467   :  { %v8735_v61 = vcombine.high %v8115_v56, %v8115_v56  ;;  %v8742_v6 = vrot.slane %v8115_v56, %v12269_v7 }
0x1469   :  { %v8749_v27 = vrot.slane %v8735_v61, %v12269_v7  ;;  %v8750_v36 = vcombine.high %v8742_v6, %v8742_v6  ;;  %v8776_v42 = vcombine.low %v8734_v25, %v8742_v6  ;;  %v11585_v11 = vpop.f32.mrb[56].mxu1 }
0x146a   :  { %v8199_v44 = vpop.f32.mrb[57].mxu1  ;;  %v8979_v54 = vrot.slane %v11585_v11, %v12269_v7 }
0x146b   :  { %v8751_v32 = vcombine.high %v8749_v27, %v8749_v27  ;;  %v8777_v45 = vcombine.low %v8750_v36, %v8749_v27  ;;  %v8956_v5 = vcombine.high %v8199_v44, %v8199_v44  ;;  %v8963_v21 = vrot.slane %v8199_v44, %v12269_v7 }
0x146c   :  { %v8784_v40 = vrot.slane %v8776_v42, %v12269_v7 }
0x146d   :  { %v8791_v1 = vrot.slane %v8777_v45, %v12269_v7  ;;  %v8793_v63 = vcombine.low %v8751_v32, %v8758_v14  ;;  %v8970_v15 = vrot.slane %v8956_v5, %v12269_v7  ;;  %v11592_v58 = vpop.f32.mrb[64].mxu0  ;;  %v8971_v59 = vcombine.high %v8963_v21, %v8963_v21 }
0x146e   :  { %v8283_v22 = vpop.f32.mrb[65].mxu0  ;;  %v9003_v49 = vrot.slane %v11592_v58, %v12269_v7 }
0x146f   :  { %v8972_v13 = vcombine.high %v8970_v15, %v8970_v15  ;;  %v8980_v41 = vcombine.high %v8283_v22, %v8283_v22  ;;  %v8987_v48 = vrot.slane %v8283_v22, %v12269_v7  ;;  %v8792_v24 = vcombine.low %v8784_v40, %v8791_v1 }
0x1470   :  { %v9004_v31 = vcombine.low %v8963_v21, %v8971_v59  ;;  %v8800_v37 = vrot.slane %v8793_v63, %v12269_v7 }
0x1471   :  { %v9005_v4 = vcombine.low %v8970_v15, %v8972_v13  ;;  %v8994_v35 = vrot.slane %v8980_v41, %v12269_v7  ;;  %v8995_v60 = vcombine.high %v8987_v48, %v8987_v48  ;;  %v9021_v29 = vcombine.low %v8979_v54, %v8987_v48  ;;  %11621 = vmatmul.mubr.msk.f32.gmra.mrb[68].mxu0 %vm2281_vm9, %v8792_v24  ;;  %v10924_v15 = vld [vmem:[#allocation5 + $0x1e8] ss:$0 sm:$0xff] }
0x1472   :  { %11623 = vmatprep.mubr.msk.f32.mxu0 %vm12214_vm0, %v12215_v2  ;;  %v9012_v34 = vrot.slane %v9004_v31, %v12269_v7  ;;  %v9202_v24 = vcombine.high %v10924_v15, %v10924_v15 }
0x1473   :  { %v9019_v12 = vrot.slane %v9005_v4, %v12269_v7  ;;  %v8996_v10 = vcombine.high %v8994_v35, %v8994_v35  ;;  %v9022_v46 = vcombine.low %v8995_v60, %v8994_v35  ;;  %v9029_v43 = vrot.slane %v9021_v29, %v12269_v7 }
0x1475   :  { %v9036_v17 = vrot.slane %v9022_v46, %v12269_v7  ;;  %v9038_v20 = vcombine.low %v8996_v10, %v9003_v49  ;;  %11624 = vmatmul.mubr.msk.f32.gmra.mrb[70].mxu0 %vm2281_vm9, %v8800_v37  ;;  %v9020_v30 = vcombine.low %v9012_v34, %v9019_v12  ;;  %v9209_v49 = vrot.slane %v10924_v15, %v12269_v7 }
0x1476   :  { %11628 = vmatprep.mubr.msk.f32.mxu0 %vm12214_vm0, %v12215_v2 }
0x1477   :  { %v9037_v28 = vcombine.low %v9029_v43, %v9036_v17  ;;  %v9045_v18 = vrot.slane %v9038_v20, %v12269_v7 }
0x1479   :  { %11629 = vmatmul.mubr.msk.f32.vlgmr.msra.gmra.mrb[72].mxu0 %vm2281_vm9, %v9020_v30  ;;  %v9216_v30 = vrot.slane %v9202_v24, %v12269_v7 }
0x147a   :  { %11631 = vmatprep.mubr.msk.f32.mxu0 %vm12214_vm0, %v12215_v2 }
0x147d   :  { %11632 = vmatmul.mubr.msk.f32.gmra.mrb[74].mxu0 %vm2281_vm9, %v9037_v28 }
0x147e   :  { %11634 = vmatprep.mubr.msk.f32.mxu0 %vm12214_vm0, %v12215_v2 }
0x1481   :  { %11635 = vmatmul.mubr.msk.f32.gmra.mrb[76].mxu0 %vm2281_vm9, %v9045_v18 }
0x1482   :  { %11670 = vmatprep.mubr.msk.f32.mxu0 %vm12214_vm0, %v12215_v2 }
0x1511   :  { %v8873_v38 = vpop.f32.mrb[66].mxu0 }
0x1512   :  { %v8890_v8 = vcombine.high %v8873_v38, %v8873_v38  ;;  %v11619_v57 = vpop.f32.mrb[67].mxu0  ;;  %v8897_v16 = vrot.slane %v8873_v38, %v12269_v7 }
0x1513   :  { %v9217_v57 = vcombine.high %v9209_v49, %v9209_v49 }
0x1514   :  { %v8904_v62 = vrot.slane %v8890_v8, %v12269_v7  ;;  %v8905_v23 = vcombine.high %v8897_v16, %v8897_v16 }
0x1515   :  { %v8638_v39 = vpop.f32.mrb[58].mxu1 }
0x1516   :  { %v8655_v19 = vcombine.high %v8638_v39, %v8638_v39  ;;  %v8662_v26 = vrot.slane %v8638_v39, %v12269_v7  ;;  %v11608_v3 = vpop.f32.mrb[59].mxu1  ;;  %v8906_v61 = vcombine.high %v8904_v62, %v8904_v62 }
0x1517   :  { %v9218_v3 = vcombine.high %v9216_v30, %v9216_v30 }
0x1518   :  { %v8669_v55 = vrot.slane %v8655_v19, %v12269_v7  ;;  %v8670_v33 = vcombine.high %v8662_v26, %v8662_v26  ;;  %v8942_v56 = vadd.f32 %v8897_v16, %v8662_v26 }
0x1519   :  { %v8643_v25 = vpop.f32.mrb[60].mxu1 }
0x151a   :  { %v8671_v6 = vcombine.high %v8669_v55, %v8669_v55  ;;  %v8943_v27 = vadd.f32 %v8905_v23, %v8670_v33  ;;  %v8944_v36 = vadd.f32 %v8904_v62, %v8669_v55  ;;  %v11611_v42 = vpop.f32.mrb[61].mxu1  ;;  %v8672_v32 = vcombine.high %v8643_v25, %v8643_v25 }
0x151b   :  { %v8679_v45 = vrot.slane %v8643_v25, %v12269_v7 }
0x151c   :  { %v8945_v11 = vadd.f32 %v8906_v61, %v8671_v6  ;;  %v8686_v5 = vrot.slane %v8672_v32, %v12269_v7 }
0x151d   :  { %v8648_v44 = vpop.f32.mrb[62].mxu1  ;;  %v8687_v58 = vcombine.high %v8679_v45, %v8679_v45 }
0x151e   :  { %v11614_v14 = vpop.f32.mrb[63].mxu1  ;;  %v8695_v54 = vrot.slane %v8648_v44, %v12269_v7  ;;  %v8688_v41 = vcombine.high %v8686_v5, %v8686_v5 }
0x1520   :  { %v8696_v12 = vcombine.high %v8695_v54, %v8695_v54 }
0x1544   :  { %v8878_v21 = vpop.f32.mrb[68].mxu0 }
0x1545   :  { %v8907_v40 = vcombine.high %v8878_v21, %v8878_v21  ;;  %v8914_v1 = vrot.slane %v8878_v21, %v12269_v7  ;;  %v11622_v63 = vpop.f32.mrb[69].mxu0 }
0x1547   :  { %v8921_v59 = vrot.slane %v8907_v40, %v12269_v7  ;;  %v8922_v22 = vcombine.high %v8914_v1, %v8914_v1  ;;  %v8946_v13 = vadd.f32 %v8914_v1, %v8679_v45 }
0x1548   :  { %v8883_v48 = vpop.f32.mrb[70].mxu0 }
0x1549   :  { %v8923_v31 = vcombine.high %v8921_v59, %v8921_v59  ;;  %v8947_v4 = vadd.f32 %v8922_v22, %v8687_v58  ;;  %v8948_v35 = vadd.f32 %v8921_v59, %v8686_v5  ;;  %v8930_v60 = vrot.slane %v8883_v48, %v12269_v7  ;;  %v11625_v29 = vpop.f32.mrb[71].mxu0 }
0x154b   :  { %v8949_v10 = vadd.f32 %v8923_v31, %v8688_v41  ;;  %v8931_v46 = vcombine.high %v8930_v60, %v8930_v60  ;;  %v8950_v37 = vadd.f32 %v8930_v60, %v8695_v54 }
0x154c   :  { %v9118_v34 = vpop.f32.mrb[72].mxu0 }
0x154d   :  { %v8951_v43 = vadd.f32 %v8931_v46, %v8696_v12  ;;  %v9135_v17 = vcombine.high %v9118_v34, %v9118_v34  ;;  %v9142_v20 = vrot.slane %v9118_v34, %v12269_v7  ;;  %v11630_v28 = vpop.f32.mrb[73].mxu0 }
0x154f   :  { %v9149_v18 = vrot.slane %v9135_v17, %v12269_v7  ;;  %v9150_v38 = vcombine.high %v9142_v20, %v9142_v20  ;;  %v9187_v8 = vadd.f32 %v9142_v20, %v8942_v56 }
0x1550   :  { %v9123_v16 = vpop.f32.mrb[74].mxu0 }
0x1551   :  { %v9151_v39 = vcombine.high %v9149_v18, %v9149_v18  ;;  %v9188_v62 = vadd.f32 %v9150_v38, %v8943_v27  ;;  %v9189_v19 = vadd.f32 %v9149_v18, %v8944_v36  ;;  %v11633_v26 = vpop.f32.mrb[75].mxu0  ;;  %v9152_v23 = vcombine.high %v9123_v16, %v9123_v16 }
0x1552   :  { %v9159_v55 = vrot.slane %v9123_v16, %v12269_v7  ;;  %v9223_v25 = vadd.f32 %v9209_v49, %v9187_v8 }
0x1553   :  { %v9190_v33 = vadd.f32 %v9151_v39, %v8945_v11  ;;  %v9224_v61 = vadd.f32 %v9217_v57, %v9188_v62  ;;  %v9166_v6 = vrot.slane %v9152_v23, %v12269_v7  ;;  %v9225_v32 = vadd.f32 %v9216_v30, %v9189_v19 }
0x1554   :  { %v9167_v42 = vcombine.high %v9159_v55, %v9159_v55  ;;  %v9191_v44 = vadd.f32 %v9159_v55, %v8946_v13  ;;  %v9128_v14 = vpop.f32.mrb[76].mxu0 }
0x1555   :  { %v9175_v56 = vrot.slane %v9128_v14, %v12269_v7  ;;  %v9226_v45 = vadd.f32 %v9218_v3, %v9190_v33  ;;  %v11636_v5 = vpop.f32.mrb[77].mxu0  ;;  %v9243_v27 = vcombine.low %v9223_v25, %v9224_v61  ;;  %v9168_v36 = vcombine.high %v9166_v6, %v9166_v6 }
0x1556   :  { %v9192_v21 = vadd.f32 %v9167_v42, %v8947_v4  ;;  %v9193_v40 = vadd.f32 %v9166_v6, %v8948_v35  ;;  %v9227_v46 = vadd.f32 %v9209_v49, %v9191_v44 }
0x1557   :  { %v9176_v1 = vcombine.high %v9175_v56, %v9175_v56  ;;  %v9195_v63 = vadd.f32 %v9175_v56, %v8950_v37  ;;  %v9244_v15 = vcombine.low %v9225_v32, %v9226_v45  ;;  %v9194_v11 = vadd.f32 %v9168_v36, %v8949_v10 }
0x1558   :  { %v9228_v58 = vadd.f32 %v9209_v49, %v9192_v21  ;;  %v9229_v54 = vadd.f32 %v9217_v57, %v9193_v40  ;;  %v9251_v13 = vrot.slane %v9243_v27, %v12269_v7  ;;  %v9266_v17 = vrot.slane %v9227_v46, %v12269_v7 }
0x1559   :  { %v9196_v59 = vadd.f32 %v9176_v1, %v8951_v43  ;;  %v9231_v22 = vadd.f32 %v9218_v3, %v9195_v63  ;;  %v9258_v41 = vrot.slane %v9244_v15, %v12269_v7  ;;  %v9230_v48 = vadd.f32 %v9216_v30, %v9194_v11 }
0x155a   :  { %v9267_v24 = vcombine.low %v9228_v58, %v9229_v54  ;;  %v9300_v20 = vsel %vm1870_vm7, %v9266_v17, 0.0 }
0x155b   :  { %v14105_v31 = vcombine.low %v9251_v13, %v9258_v41  ;;  %v9232_v60 = vadd.f32 %v9209_v49, %v9196_v59  ;;  %v9268_v29 = vcombine.low %v9230_v48, %v9231_v22 }
0x155c   :  { %v9275_v12 = vrot.slane %v9267_v24, %v12269_v7 }
0x155d   :  { %v9297_v4 = vsel %vm1866_vm6, %v14105_v31, 0.0  ;;  %v9290_v35 = vrot.slane %v9232_v60, %v12269_v7  ;;  %v9282_v10 = vrot.slane %v9268_v29, %v12269_v7 }
0x155e   :  { %9298 = vadd.xlane.f32.xlu1 %v9297_v4 }
0x155f   :  { %v14112_v37 = vcombine.low %v9275_v12, %v9282_v10  ;;  %v9306_v34 = vsel %vm1870_vm7, %v9290_v35, 0.0 }
0x1561   :  { %v9303_v43 = vsel %vm1866_vm6, %v14112_v37, 0.0 }
0x1562   :  { %9307 = vadd.xlane.f32.xlu1 %v9306_v34  ;;  %9304 = vadd.xlane.f32.xlu0 %v9303_v43 }
0x1566   :  { %9301 = vadd.xlane.f32.xlu0 %v9300_v20 }
0x15eb   :  { %v9299_v30 = vpop.xlane.xlu1 %9298 }
0x15ec   :  { %v9309_v28 = vmul.f32 0.03125, %v9299_v30 }
0x15ee   :  { %v9323_v18 = vrot.slane %v9309_v28, %v12378_v50  ;;  %v9330_v49 = vrot.slane %v9309_v28, %v12381_v51  ;;  %v9337_v38 = vrot.slane %v9309_v28, %v12384_v52  ;;  %v9344_v8 = vrot.slane %v9309_v28, %v12387_v53  ;;  %v6030_v28 = vld [vmem:[#allocation5 + $0x200] sm:$0xff] }
0x15ef   :  { %v9308_v57 = vpop.xlane.xlu1 %9307  ;;  %v9305_v26 = vpop.xlane.xlu0 %9304 }
0x15f0   :  { %v14123_v16 = vsub.f32 %v9223_v25, %v9323_v18  ;;  %v14125_v39 = vsub.f32 %v9224_v61, %v9330_v49  ;;  %v14127_v62 = vsub.f32 %v9225_v32, %v9337_v38  ;;  %v14129_v19 = vsub.f32 %v9226_v45, %v9344_v8  ;;  %v6031_v18 = vld [vmem:[#allocation5 + $0x208] sm:$0xff]  ;;  %v6032_v38 = vld [vmem:[#allocation5 + $0x210] sm:$0xff]  ;;  %v6033_v8 = vld [vmem:[#allocation5 + $0x218] sm:$0xff] }
0x15f1   :  { %v9311_v3 = vmul.f32 0.03125, %v9305_v26  ;;  %v9312_v23 = vmul.f32 0.03125, %v9308_v57  ;;  %v11940_v49 = vpack.c.bf16 %v6031_v18, %v6030_v28  ;;  %v11943_v57 = vpack.c.bf16 %v6033_v8, %v6032_v38 }
0x15f2   :  { %v9407_v55 = vmul.f32 %v14123_v16, %v14123_v16  ;;  %v9408_v33 = vmul.f32 %v14125_v39, %v14125_v39  ;;  %v9409_v6 = vmul.f32 %v14127_v62, %v14127_v62  ;;  %v9410_v25 = vmul.f32 %v14129_v19, %v14129_v19 }
0x15f3   :  { %v9358_v61 = vrot.slane %v9311_v3, %v12378_v50  ;;  %v9365_v42 = vrot.slane %v9311_v3, %v12381_v51  ;;  %v9372_v44 = vrot.slane %v9311_v3, %v12384_v52  ;;  %v9379_v14 = vrot.slane %v9311_v3, %v12387_v53  ;;  %v9302_v56 = vpop.xlane.xlu0 %9301  ;;  %11941 = vmatpush3.bf16.msra.mxu1 %v11940_v49 }
0x15f4   :  { %v9386_v32 = vrot.slane %v9312_v23, %v12378_v50  ;;  %v9427_v45 = vcombine.low %v9407_v55, %v9408_v33  ;;  %v9428_v5 = vcombine.low %v9409_v6, %v9410_v25  ;;  %v9310_v1 = vmul.f32 0.03125, %v9302_v56  ;;  %11942 = vmatprep.subr.bf16.mxu1 %v12213_v0 }
0x15f5   :  { %v14144_v27 = vsub.f32 %v9228_v58, %v9358_v61  ;;  %v14146_v36 = vsub.f32 %v9229_v54, %v9365_v42  ;;  %v14148_v21 = vsub.f32 %v9230_v48, %v9372_v44  ;;  %v14150_v40 = vsub.f32 %v9231_v22, %v9379_v14  ;;  %v12184_v61 = vld [vmem:[#allocation5 + $0x1f0] ss:$0 sm:$0xff] }
0x15f6   :  { %v9435_v63 = vrot.slane %v9427_v45, %v12269_v7  ;;  %v9442_v15 = vrot.slane %v9428_v5, %v12269_v7  ;;  %v14162_v13 = vsub.f32 %v9232_v60, %v9386_v32  ;;  %v9351_v22 = vrot.slane %v9310_v1, %v12378_v50  ;;  %v12185_v1 = vld [vmem:[#allocation5 + $0x1f8] ss:$0 sm:$0xff] }
0x15f7   :  { %v9412_v11 = vmul.f32 %v14144_v27, %v14144_v27  ;;  %v9413_v59 = vmul.f32 %v14146_v36, %v14146_v36  ;;  %v9414_v58 = vmul.f32 %v14148_v21, %v14148_v21  ;;  %v9415_v54 = vmul.f32 %v14150_v40, %v14150_v40  ;;  %11944 = vmatpush3.bf16.msra.mxu1 %v11943_v57 }
0x15f8   :  { %v9443_v41 = vcombine.low %v9435_v63, %v9442_v15  ;;  %v14165_v29 = vsub.f32 %v9227_v46, %v9351_v22  ;;  %v9416_v60 = vmul.f32 %v14162_v13, %v14162_v13  ;;  %v9598_v42 = vcombine.high %v12184_v61, %v12184_v61 }
0x15f9   :  { %v9451_v48 = vcombine.low %v9412_v11, %v9413_v59  ;;  %v9452_v24 = vcombine.low %v9414_v58, %v9415_v54  ;;  %v14181_v32 = vrot.slane %v12184_v61, %v12269_v7  ;;  %v9630_v63 = vcombine.high %v12185_v1, %v12185_v1 }
0x15fa   :  { %v9479_v4 = vsel %vm1866_vm6, %v9443_v41, 0.0  ;;  %v9411_v10 = vmul.f32 %v14165_v29, %v14165_v29  ;;  %v9474_v20 = vrot.slane %v9416_v60, %v12269_v7  ;;  %v9612_v5 = vrot.slane %v9598_v42, %v12269_v7 }
0x15fb   :  { %9480 = vadd.xlane.f32.xlu0 %v9479_v4  ;;  %v9459_v35 = vrot.slane %v9451_v48, %v12269_v7  ;;  %v9466_v12 = vrot.slane %v9452_v24, %v12269_v7  ;;  %v9637_v15 = vrot.slane %v12185_v1, %v12269_v7  ;;  %v9613_v58 = vcombine.high %v14181_v32, %v14181_v32 }
0x15fc   :  { %v9450_v43 = vrot.slane %v9411_v10, %v12269_v7  ;;  %v9488_v30 = vsel %vm1870_vm7, %v9474_v20, 0.0  ;;  %v9614_v54 = vcombine.high %v9612_v5, %v9612_v5  ;;  %v9644_v22 = vrot.slane %v9630_v63, %v12269_v7 }
0x15fd   :  { %v9467_v34 = vcombine.low %v9459_v35, %v9466_v12  ;;  %v9645_v35 = vcombine.high %v9637_v15, %v9637_v15 }
0x15fe   :  { %v9482_v46 = vsel %vm1870_vm7, %v9450_v43, 0.0  ;;  %v9646_v43 = vcombine.high %v9644_v22, %v9644_v22 }
0x15ff   :  { %v9485_v17 = vsel %vm1866_vm6, %v9467_v34, 0.0  ;;  %9483 = vadd.xlane.f32.xlu1 %v9482_v46 }
0x1600   :  { %9486 = vadd.xlane.f32.xlu0 %v9485_v17 }
0x1603   :  { %9489 = vadd.xlane.f32.xlu1 %v9488_v30 }
0x1688   :  { %v9481_v26 = vpop.xlane.xlu0 %9480 }
0x1689   :  { %v9491_v3 = vmul.f32 0.03125, %v9481_v26 }
0x168b   :  { %v9495_v23 = vadd.f32 1e-05, %v9491_v3 }
0x168c   :  { %v9484_v6 = vpop.xlane.xlu1 %9483 }
0x168d   :  { %12170 = vrsqrt.f32 %v9495_v23  ;;  %v9487_v55 = vpop.xlane.xlu0 %9486  ;;  %v9492_v25 = vmul.f32 0.03125, %v9484_v6 }
0x168e   :  { %v9493_v33 = vmul.f32 0.03125, %v9487_v55 }
0x168f   :  { %v9496_v14 = vadd.f32 1e-05, %v9492_v25 }
0x1690   :  { %v9497_v44 = vadd.f32 1e-05, %v9493_v33  ;;  %v9490_v56 = vpop.xlane.xlu1 %9489 }
0x1691   :  { %v9494_v45 = vmul.f32 0.03125, %v9490_v56 }
0x1692   :  { %12172 = vrsqrt.f32 %v9497_v44 }
0x1693   :  { %12174 = vrsqrt.f32 %v9496_v14  ;;  %v9498_v11 = vadd.f32 1e-05, %v9494_v45 }
0x1695   :  { %12176 = vrsqrt.f32 %v9498_v11 }
0x1697   :  { %v12171_v59 = vpop.eup %12170 }
0x1698   :  { %v9513_v41 = vrot.slane %v12171_v59, %v12378_v50  ;;  %v9520_v48 = vrot.slane %v12171_v59, %v12381_v51  ;;  %v9527_v24 = vrot.slane %v12171_v59, %v12384_v52  ;;  %v9534_v4 = vrot.slane %v12171_v59, %v12387_v53 }
0x169a   :  { %v9587_v12 = vmul.f32 %v9513_v41, %v14123_v16  ;;  %v9588_v10 = vmul.f32 %v9520_v48, %v14125_v39  ;;  %v9589_v60 = vmul.f32 %v9527_v24, %v14127_v62  ;;  %v9590_v34 = vmul.f32 %v9534_v4, %v14129_v19 }
0x169c   :  { %v12173_v17 = vpop.eup %12172  ;;  %v9619_v46 = vmul.f32 %v14181_v32, %v9587_v12  ;;  %v9620_v20 = vmul.f32 %v9613_v58, %v9588_v10  ;;  %v9621_v30 = vmul.f32 %v9612_v5, %v9589_v60  ;;  %v9622_v28 = vmul.f32 %v9614_v54, %v9590_v34  ;;  %v6036_v12 = vld [vmem:[#allocation5 + $0x230] sm:$0xff]  ;;  %v6037_v60 = vld [vmem:[#allocation5 + $0x238] sm:$0xff]  ;;  %v6038_v34 = vld [vmem:[#allocation5 + $0x240] sm:$0xff] }
0x169d   :  { %v12175_v18 = vpop.eup %12174  ;;  %v9548_v49 = vrot.slane %v12173_v17, %v12378_v50  ;;  %v9555_v38 = vrot.slane %v12173_v17, %v12381_v51  ;;  %v9562_v16 = vrot.slane %v12173_v17, %v12384_v52  ;;  %v9569_v39 = vrot.slane %v12173_v17, %v12387_v53  ;;  %v6040_v17 = vld [vmem:[#allocation5 + $0x250] sm:$0xff] }
0x169e   :  { %v9541_v62 = vrot.slane %v12175_v18, %v12378_v50  ;;  %v9651_v8 = vadd.f32 %v9637_v15, %v9619_v46  ;;  %v9652_v19 = vadd.f32 %v9645_v35, %v9620_v20  ;;  %v9653_v57 = vadd.f32 %v9644_v22, %v9621_v30  ;;  %v6041_v20 = vld [vmem:[#allocation5 + $0x258] sm:$0xff]  ;;  %v6042_v30 = vld [vmem:[#allocation5 + $0x260] sm:$0xff] }
0x169f   :  { %v9654_v26 = vadd.f32 %v9646_v43, %v9622_v28  ;;  %v9592_v3 = vmul.f32 %v9548_v49, %v14144_v27  ;;  %v9593_v23 = vmul.f32 %v9555_v38, %v14146_v36  ;;  %v9594_v55 = vmul.f32 %v9562_v16, %v14148_v21  ;;  %v12177_v61 = vpop.eup %12176  ;;  %v10925_v18 = vld [vmem:[#allocation5 + $0x220] ss:$0 sm:$0xff] }
0x16a0   :  { %v9591_v33 = vmul.f32 %v9541_v62, %v14165_v29  ;;  %v9693_v6 = vcombine.low %v9651_v8, %v9652_v19  ;;  %v9595_v25 = vmul.f32 %v9569_v39, %v14150_v40  ;;  %v9576_v56 = vrot.slane %v12177_v61, %v12378_v50 }
0x16a1   :  { %v9694_v42 = vcombine.low %v9653_v57, %v9654_v26  ;;  %v9624_v53 = vmul.f32 %v14181_v32, %v9592_v3  ;;  %v9625_v44 = vmul.f32 %v9613_v58, %v9593_v23  ;;  %v9626_v14 = vmul.f32 %v9612_v5, %v9594_v55 }
0x16a2   :  { %v9701_v45 = vrot.slane %v9693_v6, %v12269_v7  ;;  %v9623_v27 = vmul.f32 %v14181_v32, %v9591_v33  ;;  %v9596_v63 = vmul.f32 %v9576_v56, %v14162_v13  ;;  %v9627_v11 = vmul.f32 %v9614_v54, %v9595_v25  ;;  %v6035_v54 = vld [vmem:[#allocation5 + $0x228] sm:$0xff] }
0x16a3   :  { %v9708_v36 = vrot.slane %v9694_v42, %v12269_v7  ;;  %v9656_v21 = vadd.f32 %v9637_v15, %v9624_v53  ;;  %v9657_v1 = vadd.f32 %v9645_v35, %v9625_v44  ;;  %v9658_v29 = vadd.f32 %v9644_v22, %v9626_v14 }
0x16a4   :  { %v9655_v40 = vadd.f32 %v9637_v15, %v9623_v27  ;;  %v9628_v5 = vmul.f32 %v14181_v32, %v9596_v63  ;;  %v9659_v4 = vadd.f32 %v9646_v43, %v9627_v11  ;;  %v11946_v10 = vpack.c.bf16 %v6036_v12, %v6035_v54  ;;  %v6039_v43 = vld [vmem:[#allocation5 + $0x248] sm:$0xff] }
0x16a5   :  { %v9709_v59 = vcombine.low %v9701_v45, %v9708_v36  ;;  %v9711_v41 = vcombine.low %v9657_v1, %v9658_v29  ;;  %v11952_v46 = vpack.c.bf16 %v6040_v17, %v6039_v43  ;;  %v11955_v28 = vpack.c.bf16 %v6042_v30, %v6041_v20 }
0x16a6   :  { %v9710_v48 = vcombine.low %v9655_v40, %v9656_v21  ;;  %v9660_v22 = vadd.f32 %v9637_v15, %v9628_v5  ;;  %11947 = vmatpush3.bf16.msra.mxu0 %v11946_v10  ;;  %v11949_v15 = vpack.c.bf16 %v6038_v34, %v6037_v60  ;;  %v9666_v49 = vcombine.high %v10925_v18, %v10925_v18 }
0x16a7   :  { %11646 = vmatmul.mubr.msk.f32.vlgmr.msra.gmra.mrb[64].mxu1 %vm1866_vm6, %v9709_v59  ;;  %v9725_v58 = vrot.slane %v9711_v41, %v12269_v7  ;;  %11948 = vmatprep.subr.bf16.mxu0 %v12213_v0  ;;  %v9673_v38 = vrot.slane %v10925_v18, %v12269_v7 }
0x16a8   :  { %11648 = vmatprep.mubr.msk.f32.mxu1 %vm12214_vm0, %v12215_v2  ;;  %v9718_v24 = vrot.slane %v9710_v48, %v12269_v7  ;;  %v9727_v13 = vcombine.low %v9659_v4, %v9660_v22  ;;  %v9680_v16 = vrot.slane %v9666_v49, %v12269_v7 }
0x16a9   :  { %v9681_v39 = vcombine.high %v9673_v38, %v9673_v38  ;;  %v9752_v3 = vcombine.low %v9673_v38, %v9673_v38 }
0x16aa   :  { %v9726_v35 = vcombine.low %v9718_v24, %v9725_v58  ;;  %v9734_v32 = vrot.slane %v9727_v13, %v12269_v7  ;;  %11950 = vmatpush3.bf16.msra.mxu0 %v11949_v15  ;;  %v9682_v62 = vcombine.high %v9680_v16, %v9680_v16 }
0x16ab   :  { %11951 = vmatprep.subr.bf16.mxu0 %v12213_v0  ;;  %v9735_v8 = vcombine.low %v9673_v38, %v9681_v39  ;;  %v9760_v55 = vrot.slane %v9752_v3, %v12269_v7  ;;  %v10160_v3 = vld [vmem:[#allocation5 + $0x288] sm:$0xff] }
0x16ac   :  { %11649 = vmatmul.mubr.msk.f32.gmra.mrb[66].mxu1 %vm1866_vm6, %v9726_v35  ;;  %v9736_v19 = vcombine.low %v9680_v16, %v9682_v62  ;;  %v9769_v53 = vcombine.low %v9682_v62, %v9673_v38 }
0x16ad   :  { %11651 = vmatprep.mubr.msk.f32.mxu1 %vm12214_vm0, %v12215_v2  ;;  %v9743_v57 = vrot.slane %v9735_v8, %v12269_v7  ;;  %v10157_v8 = vld [vmem:[#allocation5 + $0x270] sm:$0xff] }
0x16ae   :  { %11953 = vmatpush3.bf16.msra.mxu0 %v11952_v46  ;;  %v9750_v26 = vrot.slane %v9736_v19, %v12269_v7  ;;  %v9776_v1 = vrot.slane %v9769_v53, %v12269_v7  ;;  %v10158_v19 = vld [vmem:[#allocation5 + $0x278] sm:$0xff] }
0x16af   :  { %11954 = vmatprep.subr.bf16.mxu0 %v12213_v0  ;;  %v9753_v0 = vcombine.low %v9681_v39, %v9680_v16 }
0x16b0   :  { %11652 = vmatmul.mubr.msk.f32.gmra.mrb[68].mxu1 %vm1866_vm6, %v9734_v32  ;;  %v9751_v23 = vcombine.low %v9743_v57, %v9750_v26  ;;  %v11957_v57 = vpack.c.bf16 %v10158_v19, %v10157_v8  ;;  %v10159_v26 = vld [vmem:[#allocation5 + $0x280] sm:$0xff] }
0x16b1   :  { %v9767_v33 = vrot.slane %v9753_v0, %v12269_v7  ;;  %v11961_v0 = vpack.c.bf16 %v10160_v3, %v10159_v26 }
0x16b2   :  { %11956 = vmatpush3.bf16.msra.mxu0 %v11955_v28  ;;  %11958 = vmatprep.subr.bf16.mxu1 %v11957_v57 }
0x16b3   :  { %v9768_v42 = vcombine.low %v9760_v55, %v9767_v33  ;;  %11960 = vmatpush3.bf16.msra.mxu1 %v11957_v57 }
0x16b4   :  { %11962 = vmatprep.subr.bf16.mxu1 %v11961_v0 }
0x16b7   :  { %11964 = vmatpush3.bf16.msra.mxu1 %v11961_v0 }
0x177a   :  { %v9852_v6 = vpop.f32.mrb[64].mxu1 }
0x177b   :  { %v9853_v25 = vadd.f32 %v9852_v6, %v9751_v23  ;;  %v11647_v61 = vpop.f32.mrb[65].mxu1 }
0x177d   :  { %v9869_v44 = vcombine.high %v9853_v25, %v9853_v25  ;;  %v9876_v14 = vrot.slane %v9853_v25, %v12269_v7 }
0x177f   :  { %v9883_v56 = vrot.slane %v9869_v44, %v12269_v7  ;;  %v9884_v45 = vcombine.high %v9876_v14, %v9876_v14  ;;  %v9857_v27 = vpop.f32.mrb[66].mxu1  ;;  %v9921_v63 = vmax.f32 %v9876_v14, 0.0 }
0x1780   :  { %v9858_v36 = vadd.f32 %v9857_v27, %v9768_v42  ;;  %v11650_v21 = vpop.f32.mrb[67].mxu1 }
0x1781   :  { %v9885_v29 = vcombine.high %v9883_v56, %v9883_v56  ;;  %v9922_v40 = vmax.f32 %v9884_v45, 0.0  ;;  %v9923_v41 = vmax.f32 %v9883_v56, 0.0 }
0x1782   :  { %v9886_v11 = vcombine.high %v9858_v36, %v9858_v36  ;;  %v9893_v59 = vrot.slane %v9858_v36, %v12269_v7 }
0x1783   :  { %v9924_v48 = vmax.f32 %v9885_v29, 0.0  ;;  %v9941_v5 = vcombine.low %v9921_v63, %v9922_v40  ;;  %v9862_v58 = vpop.f32.mrb[68].mxu1 }
0x1784   :  { %v9900_v24 = vrot.slane %v9886_v11, %v12269_v7  ;;  %v9901_v4 = vcombine.high %v9893_v59, %v9893_v59  ;;  %v9863_v22 = vadd.f32 %v9862_v58, %v9776_v1  ;;  %v11653_v35 = vpop.f32.mrb[69].mxu1  ;;  %v9925_v54 = vmax.f32 %v9893_v59, 0.0 }
0x1785   :  { %v9942_v13 = vcombine.low %v9923_v41, %v9924_v48  ;;  %v9949_v60 = vrot.slane %v9941_v5, %v12269_v7  ;;  %v9293_v41 = vadd.f32 %v14105_v31, %v13515_v47  ;;  %v10932_v5 = vld [vmem:[#allocation5 + $0x268] ss:$0 sm:$0xff] }
0x1786   :  { %v9902_v32 = vcombine.high %v9900_v24, %v9900_v24  ;;  %v9926_v12 = vmax.f32 %v9901_v4, 0.0  ;;  %v9909_v10 = vrot.slane %v9863_v22, %v12269_v7  ;;  %v9927_v15 = vmax.f32 %v9900_v24, 0.0 }
0x1787   :  { %v9956_v34 = vrot.slane %v9942_v13, %v12269_v7  ;;  %v9294_v13 = vadd.f32 %v14112_v37, %v13533_v9 }
0x1788   :  { %v9928_v43 = vmax.f32 %v9902_v32, 0.0  ;;  %v9958_v17 = vcombine.low %v9925_v54, %v9926_v12  ;;  %v9910_v46 = vcombine.high %v9909_v10, %v9909_v10  ;;  %v9929_v49 = vmax.f32 %v9909_v10, 0.0 }
0x1789   :  { %v9957_v20 = vcombine.low %v9949_v60, %v9956_v34 }
0x178a   :  { %v9959_v30 = vcombine.low %v9927_v15, %v9928_v43  ;;  %v9930_v28 = vmax.f32 %v9910_v46, 0.0  ;;  %v9966_v18 = vrot.slane %v9958_v17, %v12269_v7 }
0x178b   :  { %11671 = vmatmul.mubr.msk.f32.vlgmr.msra.gmra.mrb[78].mxu0 %vm414_vm3, %v9957_v20 }
0x178c   :  { %11673 = vmatprep.mubr.msk.f32.mxu0 %vm12214_vm0, %v12215_v2  ;;  %v9973_v38 = vrot.slane %v9959_v30, %v12269_v7  ;;  %v9975_v16 = vcombine.low %v9929_v49, %v9930_v28  ;;  %v10933_v49 = vld [vmem:[#allocation5 + $0x290] ss:$0 sm:$0xff] }
0x178e   :  { %v9974_v39 = vcombine.low %v9966_v18, %v9973_v38  ;;  %v9982_v62 = vrot.slane %v9975_v16, %v12269_v7  ;;  %v10205_v38 = vcombine.high %v10933_v49, %v10933_v49  ;;  %v10212_v16 = vrot.slane %v10933_v49, %v12269_v7 }
0x1790   :  { %11674 = vmatmul.mubr.msk.f32.gmra.mrb[80].mxu0 %vm414_vm3, %v9974_v39  ;;  %v10219_v39 = vrot.slane %v10205_v38, %v12269_v7 }
0x1791   :  { %11676 = vmatprep.mubr.msk.f32.mxu0 %vm12214_vm0, %v12215_v2  ;;  %vm10730_vm0 = vcmask 1041409  }
0x1792   :  { %v10247_v19 = vcombine.low %v10219_v39, %v10212_v16 }
0x1794   :  { %11677 = vmatmul.mubr.msk.f32.gmra.mrb[82].mxu0 %vm414_vm3, %v9982_v62  ;;  %v10220_v62 = vcombine.high %v10212_v16, %v10212_v16  ;;  %v10261_v3 = vrot.slane %v10247_v19, %v12269_v7 }
0x1796   :  { %v10246_v8 = vcombine.low %v10212_v16, %v10220_v62  ;;  %v10263_v57 = vcombine.low %v10220_v62, %v10219_v39 }
0x1798   :  { %v10254_v26 = vrot.slane %v10246_v8, %v12269_v7  ;;  %v10270_v0 = vrot.slane %v10263_v57, %v12269_v7 }
0x185e   :  { %v10055_v23 = vpop.f32.mrb[78].mxu0 }
0x185f   :  { %v10072_v55 = vcombine.high %v10055_v23, %v10055_v23  ;;  %v10079_v33 = vrot.slane %v10055_v23, %v12269_v7  ;;  %v11672_v6 = vpop.f32.mrb[79].mxu0  ;;  %v10262_v23 = vcombine.low %v10254_v26, %v10261_v3 }
0x1861   :  { %v10086_v2 = vrot.slane %v10072_v55, %v12269_v7  ;;  %v10087_v25 = vcombine.high %v10079_v33, %v10079_v33 }
0x1863   :  { %v10088_v61 = vcombine.high %v10086_v2, %v10086_v2  ;;  %v10113_v42 = vcombine.low %v10079_v33, %v10087_v25  ;;  %v10060_v53 = vpop.f32.mrb[80].mxu0 }
0x1864   :  { %v10089_v44 = vcombine.high %v10060_v53, %v10060_v53  ;;  %v10096_v14 = vrot.slane %v10060_v53, %v12269_v7  ;;  %v11675_v56 = vpop.f32.mrb[81].mxu0 }
0x1865   :  { %v10114_v45 = vcombine.low %v10086_v2, %v10088_v61  ;;  %v10121_v21 = vrot.slane %v10113_v42, %v12269_v7 }
0x1866   :  { %v10103_v27 = vrot.slane %v10089_v44, %v12269_v7  ;;  %v10104_v36 = vcombine.high %v10096_v14, %v10096_v14 }
0x1867   :  { %v10128_v1 = vrot.slane %v10114_v45, %v12269_v7  ;;  %v10065_v29 = vpop.f32.mrb[82].mxu0 }
0x1868   :  { %v10130_v63 = vcombine.low %v10104_v36, %v10103_v27  ;;  %v10105_v40 = vcombine.high %v10103_v27, %v10103_v27  ;;  %v10112_v11 = vrot.slane %v10065_v29, %v12269_v7  ;;  %v11678_v59 = vpop.f32.mrb[83].mxu0 }
0x1869   :  { %v10129_v48 = vcombine.low %v10121_v21, %v10128_v1 }
0x186a   :  { %v10131_v58 = vcombine.low %v10105_v40, %v10112_v11  ;;  %v10138_v4 = vrot.slane %v10130_v63, %v12269_v7 }
0x186b   :  { %v10149_v24 = vadd.f32 %v10129_v48, %v9293_v41 }
0x186c   :  { %v10145_v22 = vrot.slane %v10131_v58, %v12269_v7 }
0x186d   :  { %v10155_v35 = vadd.f32 %v10932_v5, %v10149_v24 }
0x186e   :  { %v10146_v32 = vcombine.low %v10138_v4, %v10145_v22 }
0x186f   :  { %v10179_v54 = vrot.slane %v10155_v35, %v12269_v7  ;;  %v10172_v10 = vcombine.high %v10155_v35, %v10155_v35 }
0x1870   :  { %v10150_v12 = vadd.f32 %v10146_v32, %v9294_v13 }
0x1871   :  { %v10187_v60 = vcombine.high %v10179_v54, %v10179_v54  ;;  %v10186_v15 = vrot.slane %v10172_v10, %v12269_v7 }
0x1872   :  { %v10156_v34 = vadd.f32 %v10932_v5, %v10150_v12 }
0x1873   :  { %v10221_v43 = vcombine.low %v10179_v54, %v10187_v60 }
0x1874   :  { %v10188_v47 = vcombine.high %v10156_v34, %v10156_v34  ;;  %v10195_v31 = vrot.slane %v10156_v34, %v12269_v7 }
0x1875   :  { %v10229_v9 = vrot.slane %v10221_v43, %v12269_v7 }
0x1876   :  { %v10202_v17 = vrot.slane %v10188_v47, %v12269_v7  ;;  %v10203_v46 = vcombine.high %v10195_v31, %v10195_v31  ;;  %v10222_v20 = vcombine.low %v10186_v15, %v10195_v31 }
0x1878   :  { %v10238_v30 = vcombine.low %v10203_v46, %v10202_v17  ;;  %v10236_v37 = vrot.slane %v10222_v20, %v12269_v7 }
0x187a   :  { %v10237_v28 = vcombine.low %v10229_v9, %v10236_v37  ;;  %v10245_v18 = vrot.slane %v10238_v30, %v12269_v7 }
0x187c   :  { %11687 = vmatprep.mubr.msk.f32.mxu1 %vm1866_vm6, %v10237_v28 }
0x187d   :  { %11688 = vmatmul.mubr.msk.f32.vlgmr.msra.gmra.mrb[70].mxu1 %vm1866_vm6, %v10245_v18 }
0x1950   :  { %v11689_v55 = vpop.f32.mrb[70].mxu1 }
0x1951   :  { %v10349_v33 = vadd.f32 %v11689_v55, %v10270_v0  ;;  %v10343_v6 = vpop.f32.mrb[71].mxu1  ;;  %v10937_v55 = vld [vmem:[#allocation5 + $0x2a0] ss:$0 sm:$0xff] }
0x1952   :  { %v10344_v2 = vadd.f32 %v10343_v6, %v10262_v23  ;;  %v10936_v23 = vld [vmem:[#allocation5 + $0x298] ss:$0 sm:$0xff] }
0x1953   :  { %v10377_v25 = vrot.slane %v10349_v33, %v12269_v7  ;;  %v10603_v33 = vcombine.high %v10936_v23, %v10936_v23  ;;  %v10610_v6 = vrot.slane %v10936_v23, %v12269_v7 }
0x1954   :  { %v10354_v61 = vcombine.high %v10344_v2, %v10344_v2  ;;  %v10361_v42 = vrot.slane %v10344_v2, %v12269_v7  ;;  %v10633_v2 = vcombine.high %v10937_v55, %v10937_v55 }
0x1955   :  { %v10378_v14 = vcombine.high %v10377_v25, %v10377_v25 }
0x1956   :  { %v10368_v53 = vrot.slane %v10354_v61, %v12269_v7  ;;  %v10369_v44 = vcombine.high %v10361_v42, %v10361_v42 }
0x1957   :  { %v10415_v63 = vrot.slane %v10378_v14, %v12269_v7 }
0x1958   :  { %v10370_v56 = vcombine.high %v10368_v53, %v10368_v53  ;;  %v10385_v45 = vcombine.low %v10361_v42, %v10369_v44  ;;  %v10399_v36 = vrot.slane %v10368_v53, %v12269_v7 }
0x195a   :  { %v10392_v27 = vrot.slane %v10385_v45, %v12269_v7  ;;  %v10401_v21 = vcombine.low %v10370_v56, %v10377_v25  ;;  %v10647_v45 = vrot.slane %v10633_v2, %v12269_v7 }
0x195c   :  { %v10400_v1 = vcombine.low %v10392_v27, %v10399_v36  ;;  %v10408_v29 = vrot.slane %v10401_v21, %v12269_v7 }
0x195e   :  { %v10420_v40 = vsel %vm10419_vm15, %v10400_v1, 0.0  ;;  %v10416_v11 = vcombine.low %v10408_v29, %v10415_v63 }
0x195f   :  { %10421 = vadd.xlane.f32.xlu1 %v10420_v40 }
0x1960   :  { %v10423_v59 = vsel %vm10419_vm15, %v10416_v11, 0.0 }
0x1961   :  { %10424 = vadd.xlane.f32.xlu0 %v10423_v59 }
0x19ec   :  { %v10422_v41 = vpop.xlane.xlu1 %10421 }
0x19ed   :  { %v10426_v48 = vmul.f32 0.015625, %v10422_v41 }
0x19ee   :  { %v10425_v5 = vpop.xlane.xlu0 %10424 }
0x19ef   :  { %v10436_v58 = vrot.slane %v10426_v48, %v12378_v50  ;;  %v10443_v24 = vrot.slane %v10426_v48, %v12381_v51  ;;  %v10450_v4 = vrot.slane %v10426_v48, %v12384_v52  ;;  %v10427_v22 = vmul.f32 0.015625, %v10425_v5 }
0x19f1   :  { %v10478_v35 = vsub.f32 %v10361_v42, %v10436_v58  ;;  %v10479_v13 = vsub.f32 %v10369_v44, %v10443_v24  ;;  %v10480_v32 = vsub.f32 %v10368_v53, %v10450_v4  ;;  %v10457_v54 = vrot.slane %v10427_v22, %v12378_v50 }
0x19f2   :  { %v10464_v12 = vrot.slane %v10427_v22, %v12381_v51  ;;  %v10471_v10 = vrot.slane %v10427_v22, %v12384_v52  ;;  %v10617_v42 = vrot.slane %v10603_v33, %v12269_v7 }
0x19f3   :  { %v10484_v60 = vmul.f32 %v10478_v35, %v10478_v35  ;;  %v10485_v34 = vmul.f32 %v10479_v13, %v10479_v13  ;;  %v10481_v47 = vsub.f32 %v10370_v56, %v10457_v54  ;;  %v10486_v31 = vmul.f32 %v10480_v32, %v10480_v32 }
0x19f4   :  { %v10482_v15 = vsub.f32 %v10377_v25, %v10464_v12  ;;  %v10483_v43 = vsub.f32 %v10378_v14, %v10471_v10  ;;  %v10640_v25 = vrot.slane %v10937_v55, %v12269_v7  ;;  %v10618_v56 = vcombine.high %v10610_v6, %v10610_v6 }
0x19f5   :  { %v10487_v17 = vmul.f32 %v10481_v47, %v10481_v47  ;;  %v10496_v46 = vcombine.low %v10484_v60, %v10485_v34  ;;  %v10510_v37 = vrot.slane %v10486_v31, %v12269_v7 }
0x19f6   :  { %v10488_v20 = vmul.f32 %v10482_v15, %v10482_v15  ;;  %v10489_v30 = vmul.f32 %v10483_v43, %v10483_v43  ;;  %v10648_v29 = vcombine.high %v10640_v25, %v10640_v25 }
0x19f7   :  { %v10503_v9 = vrot.slane %v10496_v46, %v12269_v7 }
0x19f8   :  { %v10512_v28 = vcombine.low %v10487_v17, %v10488_v20  ;;  %v10526_v38 = vrot.slane %v10489_v30, %v12269_v7 }
0x19f9   :  { %v10511_v18 = vcombine.low %v10503_v9, %v10510_v37 }
0x19fa   :  { %v10519_v49 = vrot.slane %v10512_v28, %v12269_v7 }
0x19fb   :  { %v10530_v16 = vsel %vm10419_vm15, %v10511_v18, 0.0 }
0x19fc   :  { %10531 = vadd.xlane.f32.xlu1 %v10530_v16  ;;  %v10527_v39 = vcombine.low %v10519_v49, %v10526_v38 }
0x19fe   :  { %v10533_v62 = vsel %vm10419_vm15, %v10527_v39, 0.0 }
0x19ff   :  { %10534 = vadd.xlane.f32.xlu0 %v10533_v62 }
0x1a89   :  { %v10532_v8 = vpop.xlane.xlu1 %10531 }
0x1a8a   :  { %v10536_v19 = vmul.f32 0.015625, %v10532_v8 }
0x1a8c   :  { %v10538_v57 = vadd.f32 1e-05, %v10536_v19  ;;  %v10535_v26 = vpop.xlane.xlu0 %10534 }
0x1a8d   :  { %v10537_v3 = vmul.f32 0.015625, %v10535_v26 }
0x1a8e   :  { %12178 = vrsqrt.f32 %v10538_v57 }
0x1a8f   :  { %v10539_v0 = vadd.f32 1e-05, %v10537_v3 }
0x1a91   :  { %12180 = vrsqrt.f32 %v10539_v0 }
0x1a98   :  { %v12179_v61 = vpop.eup %12178 }
0x1a99   :  { %v10550_v53 = vrot.slane %v12179_v61, %v12378_v50  ;;  %v10557_v44 = vrot.slane %v12179_v61, %v12381_v51  ;;  %v10564_v14 = vrot.slane %v12179_v61, %v12384_v52 }
0x1a9b   :  { %v12181_v27 = vpop.eup %12180  ;;  %v10592_v36 = vmul.f32 %v10550_v53, %v10478_v35  ;;  %v10593_v21 = vmul.f32 %v10557_v44, %v10479_v13  ;;  %v10594_v1 = vmul.f32 %v10564_v14, %v10480_v32  ;;  %v10939_v53 = vld [vmem:[#allocation5 + $0x2b0] ss:$0 sm:$0xff] }
0x1a9c   :  { %v10571_v63 = vrot.slane %v12181_v27, %v12378_v50  ;;  %v10578_v40 = vrot.slane %v12181_v27, %v12381_v51  ;;  %v10585_v11 = vrot.slane %v12181_v27, %v12384_v52 }
0x1a9d   :  { %v10622_v59 = vmul.f32 %v10610_v6, %v10592_v36  ;;  %v10623_v41 = vmul.f32 %v10618_v56, %v10593_v21  ;;  %v10624_v48 = vmul.f32 %v10617_v42, %v10594_v1 }
0x1a9e   :  { %v10595_v5 = vmul.f32 %v10571_v63, %v10481_v47  ;;  %v10596_v58 = vmul.f32 %v10578_v40, %v10482_v15  ;;  %v10597_v24 = vmul.f32 %v10585_v11, %v10483_v43 }
0x1a9f   :  { %v10652_v4 = vadd.f32 %v10640_v25, %v10622_v59  ;;  %v10653_v22 = vadd.f32 %v10648_v29, %v10623_v41  ;;  %v10654_v54 = vadd.f32 %v10647_v45, %v10624_v48 }
0x1aa0   :  { %v10625_v12 = vmul.f32 %v10610_v6, %v10595_v5  ;;  %v10626_v35 = vmul.f32 %v10618_v56, %v10596_v58  ;;  %v10627_v13 = vmul.f32 %v10617_v42, %v10597_v24 }
0x1aa1   :  { %v10658_v32 = vmax.f32 %v10652_v4, 0.0  ;;  %v10659_v10 = vmax.f32 %v10653_v22, 0.0  ;;  %v10660_v60 = vmax.f32 %v10654_v54, 0.0 }
0x1aa2   :  { %v10655_v50 = vadd.f32 %v10640_v25, %v10625_v12  ;;  %v10656_v34 = vadd.f32 %v10648_v29, %v10626_v35  ;;  %v10657_v51 = vadd.f32 %v10647_v45, %v10627_v13 }
0x1aa3   :  { %v10670_v31 = vcombine.low %v10658_v32, %v10659_v10  ;;  %v10684_v15 = vrot.slane %v10660_v60, %v12269_v7 }
0x1aa4   :  { %v10661_v52 = vmax.f32 %v10655_v50, 0.0  ;;  %v10662_v17 = vmax.f32 %v10656_v34, 0.0  ;;  %v10663_v46 = vmax.f32 %v10657_v51, 0.0 }
0x1aa5   :  { %v10677_v47 = vrot.slane %v10670_v31, %v12269_v7 }
0x1aa6   :  { %v10686_v43 = vcombine.low %v10661_v52, %v10662_v17  ;;  %v10700_v9 = vrot.slane %v10663_v46, %v12269_v7 }
0x1aa7   :  { %v10685_v20 = vcombine.low %v10677_v47, %v10684_v15 }
0x1aa8   :  { %v10693_v30 = vrot.slane %v10686_v43, %v12269_v7  ;;  %v10938_v7 = vld [vmem:[#allocation5 + $0x2a8] ss:$0 sm:$0xff] }
0x1aa9   :  { %v10704_v37 = vsel %vm10419_vm15, %v10685_v20, 0.0 }
0x1aaa   :  { %v10701_v28 = vcombine.low %v10693_v30, %v10700_v9  ;;  %v10705_v18 = vrot.slane %v10704_v37, 4 }
0x1aac   :  { %v10706_v49 = vadd.f32 %v10705_v18, %v10704_v37  ;;  %v10711_v38 = vsel %vm10419_vm15, %v10701_v28, 0.0 }
0x1aad   :  { %v10712_v16 = vrot.slane %v10711_v38, 4 }
0x1aae   :  { %v10707_v39 = vrot.slane %v10706_v49, 2 }
0x1aaf   :  { %v10713_v62 = vadd.f32 %v10712_v16, %v10711_v38 }
0x1ab0   :  { %v10708_v8 = vadd.f32 %v10707_v39, %v10706_v49 }
0x1ab1   :  { %v10714_v19 = vrot.slane %v10713_v62, 2 }
0x1ab2   :  { %v10709_v57 = vrot.slane %v10708_v8, 1 }
0x1ab3   :  { %v10715_v26 = vadd.f32 %v10714_v19, %v10713_v62 }
0x1ab4   :  { %v10710_v3 = vadd.f32 %v10709_v57, %v10708_v8 }
0x1ab5   :  { %v10716_v0 = vrot.slane %v10715_v26, 1 }
0x1ab6   :  { %v10719_v55 = vmul.f32 0.16666667, %v10710_v3 }
0x1ab7   :  { %v10717_v23 = vadd.f32 %v10716_v0, %v10715_v26 }
0x1ab8   :  { %v10725_v2 = vmul.f32 %v10938_v7, %v10719_v55 }
0x1ab9   :  { %v10720_v33 = vmul.f32 0.16666667, %v10717_v23 }
0x1abb   :  { %v10726_v6 = vmul.f32 %v10938_v7, %v10720_v33 }
0x1abd   :  { %v10729_v25 = vrot.slane %v10726_v6, 7 }
0x1abf   :  { %v10731_v61 = vsel %vm10730_vm0, %v10729_v25, %v10725_v2 }
0x1ac0   :  { %v10733_v42 = vsel %vm418_vm4, %v10731_v61, 0.0 }
0x1ac1   :  { %10734 = vadd.xlane.f32.xlu0 %v10733_v42 }
0x1b4e   :  { %v10735_v44 = vpop.xlane.xlu0 %10734 }
0x1b4f   :  { %v10740_v14 = vadd.f32 %v10939_v53, %v10735_v44 }
0x1b51   :  { %10742 = vst.msk [vmem:[%s14321_s2] sm:$0x3] %vm10741_vm1, %v10740_v14 }
0x1b52   :  { %10747 = vsyncpa [#allocation6], 1 }

</bundles_post_ra>
